<compile_context>
chip_gen: v6e
topology: v6e:2x2x1
jax: 0.10.0
libtpu: 0.0.40
codegen_flags: <defaults>
</compile_context>

<pallas_src>
import math
import functools

import jax
import jax.numpy as jnp
from jax.experimental import pallas as pl
from jax.experimental.pallas import tpu as pltpu


def _layer_norm(x, w, b, eps=1e-5):
    mu = jnp.mean(x, axis=-1, keepdims=True)
    xc = x - mu
    var = jnp.mean(xc * xc, axis=-1, keepdims=True)
    return xc * jax.lax.rsqrt(var + eps) * w + b


def gaze_transformer_kernel(layers, heads, head_dim, b_tile, seq,
                            x_ref, maskf_ref, pe_ref,
                            proj_w_ref, proj_b_ref,
                            wqkv_ref, bqkv_ref, wo_ref, bo_ref,
                            ln1_w_ref, ln1_b_ref,
                            w1_ref, b1_ref, w2_ref, b2_ref,
                            ln2_w_ref, ln2_b_ref,
                            c1_w_ref, c1_b_ref, c2_w_ref, c2_b_ref,
                            out_ref):
    """One grid step == B_TILE sequences, processed as one (B_TILE*S, D) slab."""
    D = heads * head_dim
    rows = b_tile * seq
    in_dim = x_ref.shape[-1]

    x = x_ref[...].reshape(rows, in_dim)                                   # (rows, IN)

    # input projection + positional encoding (pre-tiled); dropout = identity (eval)
    h = jnp.dot(x, proj_w_ref[...],
                preferred_element_type=jnp.float32) + proj_b_ref[...]      # (rows, D)
    h = h + pe_ref[...]

    maskf = maskf_ref[...]                                                 # (BT, 1, S), 1.0 = valid
    key_bias = (1.0 - maskf) * (-1e9)                                      # additive key-padding bias
    scale = 1.0 / math.sqrt(head_dim)

    # NOTE: layer loop is unrolled (L is small); switch to lax.fori_loop with
    # dynamic layer indexing if L grows large.
    for l in range(layers):
        # ---------- multi-head self attention (post-norm) ----------
        # fused QKV projection: one lane-dense matmul per layer
        qkv = jnp.dot(h, wqkv_ref[l],
                      preferred_element_type=jnp.float32) + bqkv_ref[l]    # (rows, 3D)
        qkv3 = qkv.reshape(b_tile, seq, 3 * D)

        ctx_heads = []
        for hh in range(heads):
            lo = hh * head_dim
            q = qkv3[:, :, lo:lo + head_dim]                               # (BT, S, hd)
            k = qkv3[:, :, D + lo:D + lo + head_dim]
            v = qkv3[:, :, 2 * D + lo:2 * D + lo + head_dim]
            s = jnp.einsum('bqd,bkd->bqk', q, k,
                           preferred_element_type=jnp.float32) * scale + key_bias
            s = s - jnp.max(s, axis=-1, keepdims=True)
            p = jnp.exp(s)
            p = p * pl.reciprocal(jnp.sum(p, axis=-1, keepdims=True), approx=True)
            ctx_heads.append(jnp.einsum('bqk,bkd->bqd', p, v,
                                        preferred_element_type=jnp.float32))
        ctx = jnp.concatenate(ctx_heads, axis=-1).reshape(rows, D)         # (rows, D)

        attn = jnp.dot(ctx, wo_ref[l],
                       preferred_element_type=jnp.float32) + bo_ref[l]     # (rows, D)
        h = _layer_norm(h + attn, ln1_w_ref[l], ln1_b_ref[l])

        # ---------- feed-forward (ReLU, dim_feedforward = 4*D) ----------
        ff = jnp.dot(h, w1_ref[l], preferred_element_type=jnp.float32) + b1_ref[l]
        ff = jnp.maximum(ff, 0.0)
        ff = jnp.dot(ff, w2_ref[l], preferred_element_type=jnp.float32) + b2_ref[l]
        h = _layer_norm(h + ff, ln2_w_ref[l], ln2_b_ref[l])

    # ---------- masked mean pooling over the sequence ----------
    h3 = h.reshape(b_tile, seq, D)
    denom = jnp.maximum(jnp.sum(maskf, axis=-1, keepdims=True), 1.0)       # (BT, 1, 1)
    pooled = jnp.einsum('bos,bsd->bod', maskf, h3,
                        preferred_element_type=jnp.float32)                # (BT, 1, D)
    pooled = (pooled * pl.reciprocal(denom, approx=True)).reshape(b_tile, D)

    # ---------- classifier head ----------
    c = jnp.dot(pooled, c1_w_ref[...],
                preferred_element_type=jnp.float32) + c1_b_ref[...]
    c = jnp.maximum(c, 0.0)
    out = jnp.dot(c, c2_w_ref[...],
                  preferred_element_type=jnp.float32) + c2_b_ref[...]      # (BT, 2)
    out_ref[...] = out.reshape(b_tile, 1, 2)


def _pack_params(params, heads, b_tile):
    """Host-side (trace-time) repacking: transpose to (in, out) and fuse QKV."""
    D = params["proj_w"].shape[0]
    L = params["wq"].shape[0]

    wq = params["wq"].reshape(L, D, D)       # (L, out, in), head-major output rows
    wk = params["wk"].reshape(L, D, D)
    wv = params["wv"].reshape(L, D, D)
    wqkv_t = jnp.concatenate([wq.transpose(0, 2, 1),
                              wk.transpose(0, 2, 1),
                              wv.transpose(0, 2, 1)], axis=-1)             # (L, D, 3D)
    bqkv = jnp.concatenate([params["bq"].reshape(L, 1, D),
                            params["bk"].reshape(L, 1, D),
                            params["bv"].reshape(L, 1, D)], axis=-1)       # (L, 1, 3D)
    wo_t = params["wo"].transpose(0, 1, 3, 2).reshape(L, D, D)             # (L, D_in, D_out)

    return dict(
        pe=jnp.tile(params["pe"], (b_tile, 1)),                            # (b_tile*S, D)
        proj_w=params["proj_w"].T, proj_b=params["proj_b"],
        wqkv=wqkv_t, bqkv=bqkv, wo=wo_t, bo=params["bo"],
        ln1_w=params["ln1_w"], ln1_b=params["ln1_b"],
        w1=params["w1"].transpose(0, 2, 1), b1=params["b1"],
        w2=params["w2"].transpose(0, 2, 1), b2=params["b2"],
        ln2_w=params["ln2_w"], ln2_b=params["ln2_b"],
        c1_w=params["c1_w"].T, c1_b=params["c1_b"],
        c2_w=params["c2_w"].T, c2_b=params["c2_b"],
    )


def gaze_transformer_forward(x, mask, params, *, heads, b_tile=None):
    B, S, IN = x.shape
    D = params["proj_w"].shape[0]
    L = params["wq"].shape[0]
    hd = D // heads

    if b_tile is None:
        # largest batch tile that still leaves >= 2 grid steps (feeds both v7x TCs),
        # capped at 8 sequences per step.
        cands = [d for d in range(1, min(B, 8) + 1) if B % d == 0 and (B // d) >= 2]
        b_tile = max(cands) if cands else B
    assert B % b_tile == 0
    grid = B // b_tile

    maskf = mask.astype(jnp.float32).reshape(B, 1, S)
    packed = _pack_params(params, heads, b_tile)

    weight_names = ["pe", "proj_w", "proj_b", "wqkv", "bqkv", "wo", "bo",
                    "ln1_w", "ln1_b", "w1", "b1", "w2", "b2", "ln2_w", "ln2_b",
                    "c1_w", "c1_b", "c2_w", "c2_b"]
    weights = [packed[n] for n in weight_names]

    def rep(arr):  # replicated weight: constant index_map -> DMA'd once
        n = arr.ndim
        return pl.BlockSpec(arr.shape, lambda b, n=n: (0,) * n)

    in_specs = [
        pl.BlockSpec((b_tile, S, IN), lambda b: (b, 0, 0)),   # x: B_TILE sequences / step
        pl.BlockSpec((b_tile, 1, S), lambda b: (b, 0, 0)),    # float mask
    ] + [rep(w) for w in weights]

    out_spec = pl.BlockSpec((b_tile, 1, 2), lambda b: (b, 0, 0))

    kernel = functools.partial(gaze_transformer_kernel, L, heads, hd, b_tile, S)
    out = pl.pallas_call(
        kernel,
        out_shape=jax.ShapeDtypeStruct((B, 1, 2), jnp.float32),
        grid_spec=pltpu.PrefetchScalarGridSpec(
            num_scalar_prefetch=0,
            grid=(grid,),
            in_specs=in_specs,
            out_specs=out_spec,
        ),
        compiler_params=pltpu.CompilerParams(
            dimension_semantics=("parallel",),
            vmem_limit_bytes=32 * 1024 * 1024,
        ),
    )(x, maskf, *weights)
    return out.reshape(B, 2)


def init_params(key, input_dim, model_dim, heads, layers, max_len):
    D = model_dim
    hd = D // heads
    ff = 4 * D
    keys = jax.random.split(key, 16)

    def w(k, shape, scale=0.05):
        return (scale * jax.random.normal(k, shape)).astype(jnp.float32)

    p = {}
    p["proj_w"] = w(keys[0], (D, input_dim))
    p["proj_b"] = w(keys[1], (1, D))

    # sinusoidal positional encoding, same formula as PositionalEncoding.__init__
    pos = jnp.arange(max_len, dtype=jnp.float32)[:, None]
    div = jnp.exp(jnp.arange(0, D, 2, dtype=jnp.float32) * (-math.log(10000.0) / D))
    pe = jnp.zeros((max_len, D), jnp.float32)
    pe = pe.at[:, 0::2].set(jnp.sin(pos * div))
    pe = pe.at[:, 1::2].set(jnp.cos(pos * div))
    p["_pe_full"] = pe

    # MultiheadAttention packed in_proj (3D x D) + out_proj, split per head
    in_proj_w = w(keys[2], (layers, 3 * D, D))
    in_proj_b = w(keys[3], (layers, 3 * D))
    wq, wk, wv = in_proj_w[:, :D], in_proj_w[:, D:2 * D], in_proj_w[:, 2 * D:]
    bq, bk, bv = in_proj_b[:, :D], in_proj_b[:, D:2 * D], in_proj_b[:, 2 * D:]
    p["wq"] = wq.reshape(layers, heads, hd, D)
    p["wk"] = wk.reshape(layers, heads, hd, D)
    p["wv"] = wv.reshape(layers, heads, hd, D)
    p["bq"] = bq.reshape(layers, heads, 1, hd)
    p["bk"] = bk.reshape(layers, heads, 1, hd)
    p["bv"] = bv.reshape(layers, heads, 1, hd)
    out_w = w(keys[4], (layers, D, D))
    p["wo"] = out_w.reshape(layers, D, heads, hd).transpose(0, 2, 1, 3)   # (L, H, D, hd)
    p["bo"] = w(keys[5], (layers, 1, D))

    p["ln1_w"] = jnp.ones((layers, 1, D), jnp.float32)
    p["ln1_b"] = jnp.zeros((layers, 1, D), jnp.float32)
    p["ln2_w"] = jnp.ones((layers, 1, D), jnp.float32)
    p["ln2_b"] = jnp.zeros((layers, 1, D), jnp.float32)

    p["w1"] = w(keys[6], (layers, ff, D))
    p["b1"] = w(keys[7], (layers, 1, ff))
    p["w2"] = w(keys[8], (layers, D, ff))
    p["b2"] = w(keys[9], (layers, 1, D))

    p["c1_w"] = w(keys[10], (D, D))
    p["c1_b"] = w(keys[11], (1, D))
    p["c2_w"] = w(keys[12], (2, D))
    p["c2_b"] = w(keys[13], (1, 2))
    return p


def reference_forward(x, mask, params, heads):
    """Pure-JAX reference mirroring the PyTorch eval-mode forward."""
    D = params["proj_w"].shape[0]
    L = params["wq"].shape[0]
    hd = D // heads
    h = x @ params["proj_w"].T + params["proj_b"]
    h = h + params["pe"][None]
    maskf = mask.astype(jnp.float32)
    key_bias = (1.0 - maskf)[:, None, None, :] * (-1e9)
    scale = 1.0 / math.sqrt(hd)

    def ln(t, w, b):
        mu = t.mean(-1, keepdims=True)
        var = ((t - mu) ** 2).mean(-1, keepdims=True)
        return (t - mu) / jnp.sqrt(var + 1e-5) * w + b

    for l in range(L):
        q = jnp.einsum("bsd,hkd->bhsk", h, params["wq"][l]) + params["bq"][l][None]
        k = jnp.einsum("bsd,hkd->bhsk", h, params["wk"][l]) + params["bk"][l][None]
        v = jnp.einsum("bsd,hkd->bhsk", h, params["wv"][l]) + params["bv"][l][None]
        s = jnp.einsum("bhqk,bhmk->bhqm", q, k) * scale + key_bias
        pr = jax.nn.softmax(s, axis=-1)
        ctx = jnp.einsum("bhqm,bhmk->bhqk", pr, v)
        attn = jnp.einsum("bhsk,hdk->bsd", ctx, params["wo"][l]) + params["bo"][l][None]
        h = ln(h + attn, params["ln1_w"][l], params["ln1_b"][l])
        ffv = jax.nn.relu(h @ params["w1"][l].T + params["b1"][l])
        ffv = ffv @ params["w2"][l].T + params["b2"][l]
        h = ln(h + ffv, params["ln2_w"][l], params["ln2_b"][l])

    m = maskf[..., None]
    pooled = (h * m).sum(1) / jnp.maximum(m.sum(1), 1.0)
    c = jax.nn.relu(pooled @ params["c1_w"].T + params["c1_b"])
    return c @ params["c2_w"].T + params["c2_b"]


if __name__ == "__main__":
    B, S, IN = 8, 8, 4           # batch, seq len, input_dim (= _sample_x.shape[2])
    D, HEADS, LAYERS = 32, 4, 2  # model_dim, heads, encoder layers

    key = jax.random.PRNGKey(0)
    kx, kp = jax.random.split(key)
    x = jax.random.normal(kx, (B, S, IN), dtype=jnp.float32)
    lengths = jnp.array([8, 5, 8, 3, 7, 8, 1, 6])
    mask = jnp.arange(S)[None, :] < lengths[:, None]      # bool (B, S), True = valid token

    params = init_params(kp, IN, D, HEADS, LAYERS, max_len=64)
    params["pe"] = params.pop("_pe_full")[:S]              # (S, D) slice used by the kernel

    out = gaze_transformer_forward(x, mask, params, heads=HEADS)
    out = jax.block_until_ready(out)

    ref = reference_forward(x, mask, params, HEADS)
    assert out.shape == (B, 2)
    assert jnp.allclose(out, ref, rtol=2e-3, atol=2e-3), (out, ref)
    print("KERNEL_OK")
</pallas_src>

<mosaic_0001>
module attributes {stable_mosaic.version = 11 : i64} {
  func.func @gaze_transformer_kernel(%arg0: i32, %arg1: memref<4x8x4xf32, #tpu.memory_space<vmem>>, %arg2: memref<4x1x8xf32, #tpu.memory_space<vmem>>, %arg3: memref<32x32xf32, #tpu.memory_space<vmem>>, %arg4: memref<4x32xf32, #tpu.memory_space<vmem>>, %arg5: memref<1x32xf32, #tpu.memory_space<vmem>>, %arg6: memref<2x32x96xf32, #tpu.memory_space<vmem>>, %arg7: memref<2x1x96xf32, #tpu.memory_space<vmem>>, %arg8: memref<2x32x32xf32, #tpu.memory_space<vmem>>, %arg9: memref<2x1x32xf32, #tpu.memory_space<vmem>>, %arg10: memref<2x1x32xf32, #tpu.memory_space<vmem>>, %arg11: memref<2x1x32xf32, #tpu.memory_space<vmem>>, %arg12: memref<2x32x128xf32, #tpu.memory_space<vmem>>, %arg13: memref<2x1x128xf32, #tpu.memory_space<vmem>>, %arg14: memref<2x128x32xf32, #tpu.memory_space<vmem>>, %arg15: memref<2x1x32xf32, #tpu.memory_space<vmem>>, %arg16: memref<2x1x32xf32, #tpu.memory_space<vmem>>, %arg17: memref<2x1x32xf32, #tpu.memory_space<vmem>>, %arg18: memref<32x32xf32, #tpu.memory_space<vmem>>, %arg19: memref<1x32xf32, #tpu.memory_space<vmem>>, %arg20: memref<32x2xf32, #tpu.memory_space<vmem>>, %arg21: memref<1x2xf32, #tpu.memory_space<vmem>>, %arg22: memref<4x1x2xf32, #tpu.memory_space<vmem>>) attributes {dimension_semantics = [#tpu.dimension_semantics<parallel>], iteration_bounds = array<i64: 2>, scalar_prefetch = 0 : i64, scratch_operands = 0 : i64, tpu.core_type = #tpu.core_type<tc>, window_params = [{transform_indices = @transform_0, window_bounds = array<i64: 4, 8, 4>}, {transform_indices = @transform_1, window_bounds = array<i64: 4, 1, 8>}, {pipeline_mode = #tpu.pipeline_mode<synchronous>, transform_indices = @transform_2, window_bounds = array<i64: 32, 32>}, {pipeline_mode = #tpu.pipeline_mode<synchronous>, transform_indices = @transform_3, window_bounds = array<i64: 4, 32>}, {pipeline_mode = #tpu.pipeline_mode<synchronous>, transform_indices = @transform_4, window_bounds = array<i64: 1, 32>}, {pipeline_mode = #tpu.pipeline_mode<synchronous>, transform_indices = @transform_5, window_bounds = array<i64: 2, 32, 96>}, {pipeline_mode = #tpu.pipeline_mode<synchronous>, transform_indices = @transform_6, window_bounds = array<i64: 2, 1, 96>}, {pipeline_mode = #tpu.pipeline_mode<synchronous>, transform_indices = @transform_7, window_bounds = array<i64: 2, 32, 32>}, {pipeline_mode = #tpu.pipeline_mode<synchronous>, transform_indices = @transform_8, window_bounds = array<i64: 2, 1, 32>}, {pipeline_mode = #tpu.pipeline_mode<synchronous>, transform_indices = @transform_9, window_bounds = array<i64: 2, 1, 32>}, {pipeline_mode = #tpu.pipeline_mode<synchronous>, transform_indices = @transform_10, window_bounds = array<i64: 2, 1, 32>}, {pipeline_mode = #tpu.pipeline_mode<synchronous>, transform_indices = @transform_11, window_bounds = array<i64: 2, 32, 128>}, {pipeline_mode = #tpu.pipeline_mode<synchronous>, transform_indices = @transform_12, window_bounds = array<i64: 2, 1, 128>}, {pipeline_mode = #tpu.pipeline_mode<synchronous>, transform_indices = @transform_13, window_bounds = array<i64: 2, 128, 32>}, {pipeline_mode = #tpu.pipeline_mode<synchronous>, transform_indices = @transform_14, window_bounds = array<i64: 2, 1, 32>}, {pipeline_mode = #tpu.pipeline_mode<synchronous>, transform_indices = @transform_15, window_bounds = array<i64: 2, 1, 32>}, {pipeline_mode = #tpu.pipeline_mode<synchronous>, transform_indices = @transform_16, window_bounds = array<i64: 2, 1, 32>}, {pipeline_mode = #tpu.pipeline_mode<synchronous>, transform_indices = @transform_17, window_bounds = array<i64: 32, 32>}, {pipeline_mode = #tpu.pipeline_mode<synchronous>, transform_indices = @transform_18, window_bounds = array<i64: 1, 32>}, {pipeline_mode = #tpu.pipeline_mode<synchronous>, transform_indices = @transform_19, window_bounds = array<i64: 32, 2>}, {pipeline_mode = #tpu.pipeline_mode<synchronous>, transform_indices = @transform_20, window_bounds = array<i64: 1, 2>}, {transform_indices = @transform_21, window_bounds = array<i64: 4, 1, 2>}]} {
    %c0 = arith.constant 0 : index
    %c0_0 = arith.constant 0 : index
    %c0_1 = arith.constant 0 : index
    %0 = vector.load %arg1[%c0, %c0_0, %c0_1] : memref<4x8x4xf32, #tpu.memory_space<vmem>>, vector<4x8x4xf32>
    %1 = vector.shape_cast %0 : vector<4x8x4xf32> to vector<32x4xf32>
    %c0_2 = arith.constant 0 : index
    %c0_3 = arith.constant 0 : index
    %2 = vector.load %arg4[%c0_2, %c0_3] : memref<4x32xf32, #tpu.memory_space<vmem>>, vector<4x32xf32>
    %cst = arith.constant dense<0.000000e+00> : vector<32x32xf32>
    %3 = tpu.matmul %1, %2, %cst {dimension_numbers = #tpu.dot_dimension_numbers<[1], [0], [0], [1], [0, 0, 1, 1], [], []>} : vector<32x4xf32>, vector<4x32xf32>, vector<32x32xf32> -> vector<32x32xf32>
    %c0_4 = arith.constant 0 : index
    %c0_5 = arith.constant 0 : index
    %4 = vector.load %arg5[%c0_4, %c0_5] : memref<1x32xf32, #tpu.memory_space<vmem>>, vector<1x32xf32>
    %5 = vector.broadcast %4 : vector<1x32xf32> to vector<32x32xf32>
    %6 = arith.addf %3, %5 : vector<32x32xf32>
    %c0_6 = arith.constant 0 : index
    %c0_7 = arith.constant 0 : index
    %7 = vector.load %arg3[%c0_6, %c0_7] : memref<32x32xf32, #tpu.memory_space<vmem>>, vector<32x32xf32>
    %8 = arith.addf %6, %7 : vector<32x32xf32>
    %c0_8 = arith.constant 0 : index
    %c0_9 = arith.constant 0 : index
    %c0_10 = arith.constant 0 : index
    %9 = vector.load %arg2[%c0_8, %c0_9, %c0_10] : memref<4x1x8xf32, #tpu.memory_space<vmem>>, vector<4x1x8xf32>
    %cst_11 = arith.constant 1.000000e+00 : f32
    %10 = vector.broadcast %cst_11 : f32 to vector<4x1x8xf32>
    %11 = arith.subf %10, %9 : vector<4x1x8xf32>
    %cst_12 = arith.constant -1.000000e+09 : f32
    %12 = vector.broadcast %cst_12 : f32 to vector<4x1x8xf32>
    %13 = arith.mulf %11, %12 : vector<4x1x8xf32>
    %c0_13 = arith.constant 0 : index
    %c0_14 = arith.constant 0 : index
    %c0_15 = arith.constant 0 : index
    %14 = vector.load %arg6[%c0_13, %c0_14, %c0_15] : memref<2x32x96xf32, #tpu.memory_space<vmem>>, vector<1x32x96xf32>
    %15 = vector.shape_cast %14 : vector<1x32x96xf32> to vector<32x96xf32>
    %cst_16 = arith.constant dense<0.000000e+00> : vector<32x96xf32>
    %16 = tpu.matmul %8, %15, %cst_16 {dimension_numbers = #tpu.dot_dimension_numbers<[1], [0], [0], [1], [0, 0, 1, 1], [], []>} : vector<32x32xf32>, vector<32x96xf32>, vector<32x96xf32> -> vector<32x96xf32>
    %c0_17 = arith.constant 0 : index
    %c0_18 = arith.constant 0 : index
    %c0_19 = arith.constant 0 : index
    %17 = vector.load %arg7[%c0_17, %c0_18, %c0_19] : memref<2x1x96xf32, #tpu.memory_space<vmem>>, vector<1x1x96xf32>
    %18 = vector.shape_cast %17 : vector<1x1x96xf32> to vector<1x96xf32>
    %19 = vector.broadcast %18 : vector<1x96xf32> to vector<32x96xf32>
    %20 = arith.addf %16, %19 : vector<32x96xf32>
    %21 = vector.shape_cast %20 : vector<32x96xf32> to vector<4x8x96xf32>
    %22 = vector.extract_strided_slice %21 {offsets = [0, 0, 0], sizes = [4, 8, 8], strides = [1, 1, 1]} : vector<4x8x96xf32> to vector<4x8x8xf32>
    %23 = vector.extract_strided_slice %21 {offsets = [0, 0, 32], sizes = [4, 8, 8], strides = [1, 1, 1]} : vector<4x8x96xf32> to vector<4x8x8xf32>
    %24 = vector.extract_strided_slice %21 {offsets = [0, 0, 64], sizes = [4, 8, 8], strides = [1, 1, 1]} : vector<4x8x96xf32> to vector<4x8x8xf32>
    "tpu.trace_start"() <{level = 10 : i32, message = "bqd,bkd->bqk"}> : () -> ()
    %cst_20 = arith.constant dense<0.000000e+00> : vector<4x8x8xf32>
    %25 = tpu.matmul %22, %23, %cst_20 {dimension_numbers = #tpu.dot_dimension_numbers<[2], [2], [1], [1], [0, 0, 0, 1, 1, 1], [0], [0]>} : vector<4x8x8xf32>, vector<4x8x8xf32>, vector<4x8x8xf32> -> vector<4x8x8xf32>
    "tpu.trace_stop"() : () -> ()
    %cst_21 = arith.constant 0.353553385 : f32
    %26 = vector.broadcast %cst_21 : f32 to vector<4x8x8xf32>
    %27 = arith.mulf %25, %26 : vector<4x8x8xf32>
    %28 = vector.broadcast %13 : vector<4x1x8xf32> to vector<4x8x8xf32>
    %29 = arith.addf %27, %28 : vector<4x8x8xf32>
    %cst_22 = arith.constant dense<0xFF800000> : vector<4x8xf32>
    %30 = vector.multi_reduction <maximumf>, %29, %cst_22 [2] : vector<4x8x8xf32> to vector<4x8xf32>
    %31 = vector.shape_cast %30 : vector<4x8xf32> to vector<4x8x1xf32>
    %32 = vector.broadcast %31 : vector<4x8x1xf32> to vector<4x8x8xf32>
    %33 = arith.subf %29, %32 : vector<4x8x8xf32>
    %34 = math.exp %33 : vector<4x8x8xf32>
    %cst_23 = arith.constant dense<0.000000e+00> : vector<4x8xf32>
    %35 = vector.multi_reduction <add>, %34, %cst_23 [2] : vector<4x8x8xf32> to vector<4x8xf32>
    %36 = vector.shape_cast %35 : vector<4x8xf32> to vector<4x8x1xf32>
    %37 = tpu.reciprocal %36 {approx = true} : vector<4x8x1xf32> -> vector<4x8x1xf32>
    %38 = vector.broadcast %37 : vector<4x8x1xf32> to vector<4x8x8xf32>
    %39 = arith.mulf %34, %38 : vector<4x8x8xf32>
    "tpu.trace_start"() <{level = 10 : i32, message = "bqk,bkd->bqd"}> : () -> ()
    %cst_24 = arith.constant dense<0.000000e+00> : vector<4x8x8xf32>
    %40 = tpu.matmul %39, %24, %cst_24 {dimension_numbers = #tpu.dot_dimension_numbers<[2], [1], [1], [2], [0, 0, 0, 1, 1, 2], [0], [0]>} : vector<4x8x8xf32>, vector<4x8x8xf32>, vector<4x8x8xf32> -> vector<4x8x8xf32>
    "tpu.trace_stop"() : () -> ()
    %41 = vector.extract_strided_slice %21 {offsets = [0, 0, 8], sizes = [4, 8, 8], strides = [1, 1, 1]} : vector<4x8x96xf32> to vector<4x8x8xf32>
    %42 = vector.extract_strided_slice %21 {offsets = [0, 0, 40], sizes = [4, 8, 8], strides = [1, 1, 1]} : vector<4x8x96xf32> to vector<4x8x8xf32>
    %43 = vector.extract_strided_slice %21 {offsets = [0, 0, 72], sizes = [4, 8, 8], strides = [1, 1, 1]} : vector<4x8x96xf32> to vector<4x8x8xf32>
    "tpu.trace_start"() <{level = 10 : i32, message = "bqd,bkd->bqk"}> : () -> ()
    %cst_25 = arith.constant dense<0.000000e+00> : vector<4x8x8xf32>
    %44 = tpu.matmul %41, %42, %cst_25 {dimension_numbers = #tpu.dot_dimension_numbers<[2], [2], [1], [1], [0, 0, 0, 1, 1, 1], [0], [0]>} : vector<4x8x8xf32>, vector<4x8x8xf32>, vector<4x8x8xf32> -> vector<4x8x8xf32>
    "tpu.trace_stop"() : () -> ()
    %cst_26 = arith.constant 0.353553385 : f32
    %45 = vector.broadcast %cst_26 : f32 to vector<4x8x8xf32>
    %46 = arith.mulf %44, %45 : vector<4x8x8xf32>
    %47 = vector.broadcast %13 : vector<4x1x8xf32> to vector<4x8x8xf32>
    %48 = arith.addf %46, %47 : vector<4x8x8xf32>
    %cst_27 = arith.constant dense<0xFF800000> : vector<4x8xf32>
    %49 = vector.multi_reduction <maximumf>, %48, %cst_27 [2] : vector<4x8x8xf32> to vector<4x8xf32>
    %50 = vector.shape_cast %49 : vector<4x8xf32> to vector<4x8x1xf32>
    %51 = vector.broadcast %50 : vector<4x8x1xf32> to vector<4x8x8xf32>
    %52 = arith.subf %48, %51 : vector<4x8x8xf32>
    %53 = math.exp %52 : vector<4x8x8xf32>
    %cst_28 = arith.constant dense<0.000000e+00> : vector<4x8xf32>
    %54 = vector.multi_reduction <add>, %53, %cst_28 [2] : vector<4x8x8xf32> to vector<4x8xf32>
    %55 = vector.shape_cast %54 : vector<4x8xf32> to vector<4x8x1xf32>
    %56 = tpu.reciprocal %55 {approx = true} : vector<4x8x1xf32> -> vector<4x8x1xf32>
    %57 = vector.broadcast %56 : vector<4x8x1xf32> to vector<4x8x8xf32>
    %58 = arith.mulf %53, %57 : vector<4x8x8xf32>
    "tpu.trace_start"() <{level = 10 : i32, message = "bqk,bkd->bqd"}> : () -> ()
    %cst_29 = arith.constant dense<0.000000e+00> : vector<4x8x8xf32>
    %59 = tpu.matmul %58, %43, %cst_29 {dimension_numbers = #tpu.dot_dimension_numbers<[2], [1], [1], [2], [0, 0, 0, 1, 1, 2], [0], [0]>} : vector<4x8x8xf32>, vector<4x8x8xf32>, vector<4x8x8xf32> -> vector<4x8x8xf32>
    "tpu.trace_stop"() : () -> ()
    %60 = vector.extract_strided_slice %21 {offsets = [0, 0, 16], sizes = [4, 8, 8], strides = [1, 1, 1]} : vector<4x8x96xf32> to vector<4x8x8xf32>
    %61 = vector.extract_strided_slice %21 {offsets = [0, 0, 48], sizes = [4, 8, 8], strides = [1, 1, 1]} : vector<4x8x96xf32> to vector<4x8x8xf32>
    %62 = vector.extract_strided_slice %21 {offsets = [0, 0, 80], sizes = [4, 8, 8], strides = [1, 1, 1]} : vector<4x8x96xf32> to vector<4x8x8xf32>
    "tpu.trace_start"() <{level = 10 : i32, message = "bqd,bkd->bqk"}> : () -> ()
    %cst_30 = arith.constant dense<0.000000e+00> : vector<4x8x8xf32>
    %63 = tpu.matmul %60, %61, %cst_30 {dimension_numbers = #tpu.dot_dimension_numbers<[2], [2], [1], [1], [0, 0, 0, 1, 1, 1], [0], [0]>} : vector<4x8x8xf32>, vector<4x8x8xf32>, vector<4x8x8xf32> -> vector<4x8x8xf32>
    "tpu.trace_stop"() : () -> ()
    %cst_31 = arith.constant 0.353553385 : f32
    %64 = vector.broadcast %cst_31 : f32 to vector<4x8x8xf32>
    %65 = arith.mulf %63, %64 : vector<4x8x8xf32>
    %66 = vector.broadcast %13 : vector<4x1x8xf32> to vector<4x8x8xf32>
    %67 = arith.addf %65, %66 : vector<4x8x8xf32>
    %cst_32 = arith.constant dense<0xFF800000> : vector<4x8xf32>
    %68 = vector.multi_reduction <maximumf>, %67, %cst_32 [2] : vector<4x8x8xf32> to vector<4x8xf32>
    %69 = vector.shape_cast %68 : vector<4x8xf32> to vector<4x8x1xf32>
    %70 = vector.broadcast %69 : vector<4x8x1xf32> to vector<4x8x8xf32>
    %71 = arith.subf %67, %70 : vector<4x8x8xf32>
    %72 = math.exp %71 : vector<4x8x8xf32>
    %cst_33 = arith.constant dense<0.000000e+00> : vector<4x8xf32>
    %73 = vector.multi_reduction <add>, %72, %cst_33 [2] : vector<4x8x8xf32> to vector<4x8xf32>
    %74 = vector.shape_cast %73 : vector<4x8xf32> to vector<4x8x1xf32>
    %75 = tpu.reciprocal %74 {approx = true} : vector<4x8x1xf32> -> vector<4x8x1xf32>
    %76 = vector.broadcast %75 : vector<4x8x1xf32> to vector<4x8x8xf32>
    %77 = arith.mulf %72, %76 : vector<4x8x8xf32>
    "tpu.trace_start"() <{level = 10 : i32, message = "bqk,bkd->bqd"}> : () -> ()
    %cst_34 = arith.constant dense<0.000000e+00> : vector<4x8x8xf32>
    %78 = tpu.matmul %77, %62, %cst_34 {dimension_numbers = #tpu.dot_dimension_numbers<[2], [1], [1], [2], [0, 0, 0, 1, 1, 2], [0], [0]>} : vector<4x8x8xf32>, vector<4x8x8xf32>, vector<4x8x8xf32> -> vector<4x8x8xf32>
    "tpu.trace_stop"() : () -> ()
    %79 = vector.extract_strided_slice %21 {offsets = [0, 0, 24], sizes = [4, 8, 8], strides = [1, 1, 1]} : vector<4x8x96xf32> to vector<4x8x8xf32>
    %80 = vector.extract_strided_slice %21 {offsets = [0, 0, 56], sizes = [4, 8, 8], strides = [1, 1, 1]} : vector<4x8x96xf32> to vector<4x8x8xf32>
    %81 = vector.extract_strided_slice %21 {offsets = [0, 0, 88], sizes = [4, 8, 8], strides = [1, 1, 1]} : vector<4x8x96xf32> to vector<4x8x8xf32>
    "tpu.trace_start"() <{level = 10 : i32, message = "bqd,bkd->bqk"}> : () -> ()
    %cst_35 = arith.constant dense<0.000000e+00> : vector<4x8x8xf32>
    %82 = tpu.matmul %79, %80, %cst_35 {dimension_numbers = #tpu.dot_dimension_numbers<[2], [2], [1], [1], [0, 0, 0, 1, 1, 1], [0], [0]>} : vector<4x8x8xf32>, vector<4x8x8xf32>, vector<4x8x8xf32> -> vector<4x8x8xf32>
    "tpu.trace_stop"() : () -> ()
    %cst_36 = arith.constant 0.353553385 : f32
    %83 = vector.broadcast %cst_36 : f32 to vector<4x8x8xf32>
    %84 = arith.mulf %82, %83 : vector<4x8x8xf32>
    %85 = vector.broadcast %13 : vector<4x1x8xf32> to vector<4x8x8xf32>
    %86 = arith.addf %84, %85 : vector<4x8x8xf32>
    %cst_37 = arith.constant dense<0xFF800000> : vector<4x8xf32>
    %87 = vector.multi_reduction <maximumf>, %86, %cst_37 [2] : vector<4x8x8xf32> to vector<4x8xf32>
    %88 = vector.shape_cast %87 : vector<4x8xf32> to vector<4x8x1xf32>
    %89 = vector.broadcast %88 : vector<4x8x1xf32> to vector<4x8x8xf32>
    %90 = arith.subf %86, %89 : vector<4x8x8xf32>
    %91 = math.exp %90 : vector<4x8x8xf32>
    %cst_38 = arith.constant dense<0.000000e+00> : vector<4x8xf32>
    %92 = vector.multi_reduction <add>, %91, %cst_38 [2] : vector<4x8x8xf32> to vector<4x8xf32>
    %93 = vector.shape_cast %92 : vector<4x8xf32> to vector<4x8x1xf32>
    %94 = tpu.reciprocal %93 {approx = true} : vector<4x8x1xf32> -> vector<4x8x1xf32>
    %95 = vector.broadcast %94 : vector<4x8x1xf32> to vector<4x8x8xf32>
    %96 = arith.mulf %91, %95 : vector<4x8x8xf32>
    "tpu.trace_start"() <{level = 10 : i32, message = "bqk,bkd->bqd"}> : () -> ()
    %cst_39 = arith.constant dense<0.000000e+00> : vector<4x8x8xf32>
    %97 = tpu.matmul %96, %81, %cst_39 {dimension_numbers = #tpu.dot_dimension_numbers<[2], [1], [1], [2], [0, 0, 0, 1, 1, 2], [0], [0]>} : vector<4x8x8xf32>, vector<4x8x8xf32>, vector<4x8x8xf32> -> vector<4x8x8xf32>
    "tpu.trace_stop"() : () -> ()
    %98 = tpu.concatenate %40, %59, %78, %97 in 2 : vector<4x8x8xf32>, vector<4x8x8xf32>, vector<4x8x8xf32>, vector<4x8x8xf32> -> vector<4x8x32xf32>
    %99 = vector.shape_cast %98 : vector<4x8x32xf32> to vector<32x32xf32>
    %c0_40 = arith.constant 0 : index
    %c0_41 = arith.constant 0 : index
    %c0_42 = arith.constant 0 : index
    %100 = vector.load %arg8[%c0_40, %c0_41, %c0_42] : memref<2x32x32xf32, #tpu.memory_space<vmem>>, vector<1x32x32xf32>
    %101 = vector.shape_cast %100 : vector<1x32x32xf32> to vector<32x32xf32>
    %cst_43 = arith.constant dense<0.000000e+00> : vector<32x32xf32>
    %102 = tpu.matmul %99, %101, %cst_43 {dimension_numbers = #tpu.dot_dimension_numbers<[1], [0], [0], [1], [0, 0, 1, 1], [], []>} : vector<32x32xf32>, vector<32x32xf32>, vector<32x32xf32> -> vector<32x32xf32>
    %c0_44 = arith.constant 0 : index
    %c0_45 = arith.constant 0 : index
    %c0_46 = arith.constant 0 : index
    %103 = vector.load %arg9[%c0_44, %c0_45, %c0_46] : memref<2x1x32xf32, #tpu.memory_space<vmem>>, vector<1x1x32xf32>
    %104 = vector.shape_cast %103 : vector<1x1x32xf32> to vector<1x32xf32>
    %105 = vector.broadcast %104 : vector<1x32xf32> to vector<32x32xf32>
    %106 = arith.addf %102, %105 : vector<32x32xf32>
    %107 = arith.addf %8, %106 : vector<32x32xf32>
    %c0_47 = arith.constant 0 : index
    %c0_48 = arith.constant 0 : index
    %c0_49 = arith.constant 0 : index
    %108 = vector.load %arg10[%c0_47, %c0_48, %c0_49] : memref<2x1x32xf32, #tpu.memory_space<vmem>>, vector<1x1x32xf32>
    %109 = vector.shape_cast %108 : vector<1x1x32xf32> to vector<1x32xf32>
    %c0_50 = arith.constant 0 : index
    %c0_51 = arith.constant 0 : index
    %c0_52 = arith.constant 0 : index
    %110 = vector.load %arg11[%c0_50, %c0_51, %c0_52] : memref<2x1x32xf32, #tpu.memory_space<vmem>>, vector<1x1x32xf32>
    %111 = vector.shape_cast %110 : vector<1x1x32xf32> to vector<1x32xf32>
    %cst_53 = arith.constant dense<0.000000e+00> : vector<32xf32>
    %112 = vector.multi_reduction <add>, %107, %cst_53 [1] : vector<32x32xf32> to vector<32xf32>
    %113 = vector.shape_cast %112 : vector<32xf32> to vector<32x1xf32>
    %cst_54 = arith.constant 3.200000e+01 : f32
    %114 = vector.broadcast %cst_54 : f32 to vector<32x1xf32>
    %115 = arith.divf %113, %114 : vector<32x1xf32>
    %116 = vector.broadcast %115 : vector<32x1xf32> to vector<32x32xf32>
    %117 = arith.subf %107, %116 : vector<32x32xf32>
    %118 = arith.mulf %117, %117 : vector<32x32xf32>
    %cst_55 = arith.constant dense<0.000000e+00> : vector<32xf32>
    %119 = vector.multi_reduction <add>, %118, %cst_55 [1] : vector<32x32xf32> to vector<32xf32>
    %120 = vector.shape_cast %119 : vector<32xf32> to vector<32x1xf32>
    %cst_56 = arith.constant 3.200000e+01 : f32
    %121 = vector.broadcast %cst_56 : f32 to vector<32x1xf32>
    %122 = arith.divf %120, %121 : vector<32x1xf32>
    %cst_57 = arith.constant 9.99999974E-6 : f32
    %123 = vector.broadcast %cst_57 : f32 to vector<32x1xf32>
    %124 = arith.addf %122, %123 : vector<32x1xf32>
    %125 = math.rsqrt %124 : vector<32x1xf32>
    %126 = vector.broadcast %125 : vector<32x1xf32> to vector<32x32xf32>
    %127 = arith.mulf %117, %126 : vector<32x32xf32>
    %128 = vector.broadcast %109 : vector<1x32xf32> to vector<32x32xf32>
    %129 = arith.mulf %127, %128 : vector<32x32xf32>
    %130 = vector.broadcast %111 : vector<1x32xf32> to vector<32x32xf32>
    %131 = arith.addf %129, %130 : vector<32x32xf32>
    %c0_58 = arith.constant 0 : index
    %c0_59 = arith.constant 0 : index
    %c0_60 = arith.constant 0 : index
    %132 = vector.load %arg12[%c0_58, %c0_59, %c0_60] : memref<2x32x128xf32, #tpu.memory_space<vmem>>, vector<1x32x128xf32>
    %133 = vector.shape_cast %132 : vector<1x32x128xf32> to vector<32x128xf32>
    %cst_61 = arith.constant dense<0.000000e+00> : vector<32x128xf32>
    %134 = tpu.matmul %131, %133, %cst_61 {dimension_numbers = #tpu.dot_dimension_numbers<[1], [0], [0], [1], [0, 0, 1, 1], [], []>} : vector<32x32xf32>, vector<32x128xf32>, vector<32x128xf32> -> vector<32x128xf32>
    %c0_62 = arith.constant 0 : index
    %c0_63 = arith.constant 0 : index
    %c0_64 = arith.constant 0 : index
    %135 = vector.load %arg13[%c0_62, %c0_63, %c0_64] : memref<2x1x128xf32, #tpu.memory_space<vmem>>, vector<1x1x128xf32>
    %136 = vector.shape_cast %135 : vector<1x1x128xf32> to vector<1x128xf32>
    %137 = vector.broadcast %136 : vector<1x128xf32> to vector<32x128xf32>
    %138 = arith.addf %134, %137 : vector<32x128xf32>
    %cst_65 = arith.constant 0.000000e+00 : f32
    %139 = vector.broadcast %cst_65 : f32 to vector<32x128xf32>
    %140 = arith.maximumf %138, %139 : vector<32x128xf32>
    %c0_66 = arith.constant 0 : index
    %c0_67 = arith.constant 0 : index
    %c0_68 = arith.constant 0 : index
    %141 = vector.load %arg14[%c0_66, %c0_67, %c0_68] : memref<2x128x32xf32, #tpu.memory_space<vmem>>, vector<1x128x32xf32>
    %142 = vector.shape_cast %141 : vector<1x128x32xf32> to vector<128x32xf32>
    %cst_69 = arith.constant dense<0.000000e+00> : vector<32x32xf32>
    %143 = tpu.matmul %140, %142, %cst_69 {dimension_numbers = #tpu.dot_dimension_numbers<[1], [0], [0], [1], [0, 0, 1, 1], [], []>} : vector<32x128xf32>, vector<128x32xf32>, vector<32x32xf32> -> vector<32x32xf32>
    %c0_70 = arith.constant 0 : index
    %c0_71 = arith.constant 0 : index
    %c0_72 = arith.constant 0 : index
    %144 = vector.load %arg15[%c0_70, %c0_71, %c0_72] : memref<2x1x32xf32, #tpu.memory_space<vmem>>, vector<1x1x32xf32>
    %145 = vector.shape_cast %144 : vector<1x1x32xf32> to vector<1x32xf32>
    %146 = vector.broadcast %145 : vector<1x32xf32> to vector<32x32xf32>
    %147 = arith.addf %143, %146 : vector<32x32xf32>
    %148 = arith.addf %131, %147 : vector<32x32xf32>
    %c0_73 = arith.constant 0 : index
    %c0_74 = arith.constant 0 : index
    %c0_75 = arith.constant 0 : index
    %149 = vector.load %arg16[%c0_73, %c0_74, %c0_75] : memref<2x1x32xf32, #tpu.memory_space<vmem>>, vector<1x1x32xf32>
    %150 = vector.shape_cast %149 : vector<1x1x32xf32> to vector<1x32xf32>
    %c0_76 = arith.constant 0 : index
    %c0_77 = arith.constant 0 : index
    %c0_78 = arith.constant 0 : index
    %151 = vector.load %arg17[%c0_76, %c0_77, %c0_78] : memref<2x1x32xf32, #tpu.memory_space<vmem>>, vector<1x1x32xf32>
    %152 = vector.shape_cast %151 : vector<1x1x32xf32> to vector<1x32xf32>
    %cst_79 = arith.constant dense<0.000000e+00> : vector<32xf32>
    %153 = vector.multi_reduction <add>, %148, %cst_79 [1] : vector<32x32xf32> to vector<32xf32>
    %154 = vector.shape_cast %153 : vector<32xf32> to vector<32x1xf32>
    %cst_80 = arith.constant 3.200000e+01 : f32
    %155 = vector.broadcast %cst_80 : f32 to vector<32x1xf32>
    %156 = arith.divf %154, %155 : vector<32x1xf32>
    %157 = vector.broadcast %156 : vector<32x1xf32> to vector<32x32xf32>
    %158 = arith.subf %148, %157 : vector<32x32xf32>
    %159 = arith.mulf %158, %158 : vector<32x32xf32>
    %cst_81 = arith.constant dense<0.000000e+00> : vector<32xf32>
    %160 = vector.multi_reduction <add>, %159, %cst_81 [1] : vector<32x32xf32> to vector<32xf32>
    %161 = vector.shape_cast %160 : vector<32xf32> to vector<32x1xf32>
    %cst_82 = arith.constant 3.200000e+01 : f32
    %162 = vector.broadcast %cst_82 : f32 to vector<32x1xf32>
    %163 = arith.divf %161, %162 : vector<32x1xf32>
    %cst_83 = arith.constant 9.99999974E-6 : f32
    %164 = vector.broadcast %cst_83 : f32 to vector<32x1xf32>
    %165 = arith.addf %163, %164 : vector<32x1xf32>
    %166 = math.rsqrt %165 : vector<32x1xf32>
    %167 = vector.broadcast %166 : vector<32x1xf32> to vector<32x32xf32>
    %168 = arith.mulf %158, %167 : vector<32x32xf32>
    %169 = vector.broadcast %150 : vector<1x32xf32> to vector<32x32xf32>
    %170 = arith.mulf %168, %169 : vector<32x32xf32>
    %171 = vector.broadcast %152 : vector<1x32xf32> to vector<32x32xf32>
    %172 = arith.addf %170, %171 : vector<32x32xf32>
    %c1 = arith.constant 1 : index
    %c0_84 = arith.constant 0 : index
    %c0_85 = arith.constant 0 : index
    %173 = vector.load %arg6[%c1, %c0_84, %c0_85] : memref<2x32x96xf32, #tpu.memory_space<vmem>>, vector<1x32x96xf32>
    %174 = vector.shape_cast %173 : vector<1x32x96xf32> to vector<32x96xf32>
    %cst_86 = arith.constant dense<0.000000e+00> : vector<32x96xf32>
    %175 = tpu.matmul %172, %174, %cst_86 {dimension_numbers = #tpu.dot_dimension_numbers<[1], [0], [0], [1], [0, 0, 1, 1], [], []>} : vector<32x32xf32>, vector<32x96xf32>, vector<32x96xf32> -> vector<32x96xf32>
    %c1_87 = arith.constant 1 : index
    %c0_88 = arith.constant 0 : index
    %c0_89 = arith.constant 0 : index
    %176 = vector.load %arg7[%c1_87, %c0_88, %c0_89] : memref<2x1x96xf32, #tpu.memory_space<vmem>>, vector<1x1x96xf32>
    %177 = vector.shape_cast %176 : vector<1x1x96xf32> to vector<1x96xf32>
    %178 = vector.broadcast %177 : vector<1x96xf32> to vector<32x96xf32>
    %179 = arith.addf %175, %178 : vector<32x96xf32>
    %180 = vector.shape_cast %179 : vector<32x96xf32> to vector<4x8x96xf32>
    %181 = vector.extract_strided_slice %180 {offsets = [0, 0, 0], sizes = [4, 8, 8], strides = [1, 1, 1]} : vector<4x8x96xf32> to vector<4x8x8xf32>
    %182 = vector.extract_strided_slice %180 {offsets = [0, 0, 32], sizes = [4, 8, 8], strides = [1, 1, 1]} : vector<4x8x96xf32> to vector<4x8x8xf32>
    %183 = vector.extract_strided_slice %180 {offsets = [0, 0, 64], sizes = [4, 8, 8], strides = [1, 1, 1]} : vector<4x8x96xf32> to vector<4x8x8xf32>
    "tpu.trace_start"() <{level = 10 : i32, message = "bqd,bkd->bqk"}> : () -> ()
    %cst_90 = arith.constant dense<0.000000e+00> : vector<4x8x8xf32>
    %184 = tpu.matmul %181, %182, %cst_90 {dimension_numbers = #tpu.dot_dimension_numbers<[2], [2], [1], [1], [0, 0, 0, 1, 1, 1], [0], [0]>} : vector<4x8x8xf32>, vector<4x8x8xf32>, vector<4x8x8xf32> -> vector<4x8x8xf32>
    "tpu.trace_stop"() : () -> ()
    %cst_91 = arith.constant 0.353553385 : f32
    %185 = vector.broadcast %cst_91 : f32 to vector<4x8x8xf32>
    %186 = arith.mulf %184, %185 : vector<4x8x8xf32>
    %187 = vector.broadcast %13 : vector<4x1x8xf32> to vector<4x8x8xf32>
    %188 = arith.addf %186, %187 : vector<4x8x8xf32>
    %cst_92 = arith.constant dense<0xFF800000> : vector<4x8xf32>
    %189 = vector.multi_reduction <maximumf>, %188, %cst_92 [2] : vector<4x8x8xf32> to vector<4x8xf32>
    %190 = vector.shape_cast %189 : vector<4x8xf32> to vector<4x8x1xf32>
    %191 = vector.broadcast %190 : vector<4x8x1xf32> to vector<4x8x8xf32>
    %192 = arith.subf %188, %191 : vector<4x8x8xf32>
    %193 = math.exp %192 : vector<4x8x8xf32>
    %cst_93 = arith.constant dense<0.000000e+00> : vector<4x8xf32>
    %194 = vector.multi_reduction <add>, %193, %cst_93 [2] : vector<4x8x8xf32> to vector<4x8xf32>
    %195 = vector.shape_cast %194 : vector<4x8xf32> to vector<4x8x1xf32>
    %196 = tpu.reciprocal %195 {approx = true} : vector<4x8x1xf32> -> vector<4x8x1xf32>
    %197 = vector.broadcast %196 : vector<4x8x1xf32> to vector<4x8x8xf32>
    %198 = arith.mulf %193, %197 : vector<4x8x8xf32>
    "tpu.trace_start"() <{level = 10 : i32, message = "bqk,bkd->bqd"}> : () -> ()
    %cst_94 = arith.constant dense<0.000000e+00> : vector<4x8x8xf32>
    %199 = tpu.matmul %198, %183, %cst_94 {dimension_numbers = #tpu.dot_dimension_numbers<[2], [1], [1], [2], [0, 0, 0, 1, 1, 2], [0], [0]>} : vector<4x8x8xf32>, vector<4x8x8xf32>, vector<4x8x8xf32> -> vector<4x8x8xf32>
    "tpu.trace_stop"() : () -> ()
    %200 = vector.extract_strided_slice %180 {offsets = [0, 0, 8], sizes = [4, 8, 8], strides = [1, 1, 1]} : vector<4x8x96xf32> to vector<4x8x8xf32>
    %201 = vector.extract_strided_slice %180 {offsets = [0, 0, 40], sizes = [4, 8, 8], strides = [1, 1, 1]} : vector<4x8x96xf32> to vector<4x8x8xf32>
    %202 = vector.extract_strided_slice %180 {offsets = [0, 0, 72], sizes = [4, 8, 8], strides = [1, 1, 1]} : vector<4x8x96xf32> to vector<4x8x8xf32>
    "tpu.trace_start"() <{level = 10 : i32, message = "bqd,bkd->bqk"}> : () -> ()
    %cst_95 = arith.constant dense<0.000000e+00> : vector<4x8x8xf32>
    %203 = tpu.matmul %200, %201, %cst_95 {dimension_numbers = #tpu.dot_dimension_numbers<[2], [2], [1], [1], [0, 0, 0, 1, 1, 1], [0], [0]>} : vector<4x8x8xf32>, vector<4x8x8xf32>, vector<4x8x8xf32> -> vector<4x8x8xf32>
    "tpu.trace_stop"() : () -> ()
    %cst_96 = arith.constant 0.353553385 : f32
    %204 = vector.broadcast %cst_96 : f32 to vector<4x8x8xf32>
    %205 = arith.mulf %203, %204 : vector<4x8x8xf32>
    %206 = vector.broadcast %13 : vector<4x1x8xf32> to vector<4x8x8xf32>
    %207 = arith.addf %205, %206 : vector<4x8x8xf32>
    %cst_97 = arith.constant dense<0xFF800000> : vector<4x8xf32>
    %208 = vector.multi_reduction <maximumf>, %207, %cst_97 [2] : vector<4x8x8xf32> to vector<4x8xf32>
    %209 = vector.shape_cast %208 : vector<4x8xf32> to vector<4x8x1xf32>
    %210 = vector.broadcast %209 : vector<4x8x1xf32> to vector<4x8x8xf32>
    %211 = arith.subf %207, %210 : vector<4x8x8xf32>
    %212 = math.exp %211 : vector<4x8x8xf32>
    %cst_98 = arith.constant dense<0.000000e+00> : vector<4x8xf32>
    %213 = vector.multi_reduction <add>, %212, %cst_98 [2] : vector<4x8x8xf32> to vector<4x8xf32>
    %214 = vector.shape_cast %213 : vector<4x8xf32> to vector<4x8x1xf32>
    %215 = tpu.reciprocal %214 {approx = true} : vector<4x8x1xf32> -> vector<4x8x1xf32>
    %216 = vector.broadcast %215 : vector<4x8x1xf32> to vector<4x8x8xf32>
    %217 = arith.mulf %212, %216 : vector<4x8x8xf32>
    "tpu.trace_start"() <{level = 10 : i32, message = "bqk,bkd->bqd"}> : () -> ()
    %cst_99 = arith.constant dense<0.000000e+00> : vector<4x8x8xf32>
    %218 = tpu.matmul %217, %202, %cst_99 {dimension_numbers = #tpu.dot_dimension_numbers<[2], [1], [1], [2], [0, 0, 0, 1, 1, 2], [0], [0]>} : vector<4x8x8xf32>, vector<4x8x8xf32>, vector<4x8x8xf32> -> vector<4x8x8xf32>
    "tpu.trace_stop"() : () -> ()
    %219 = vector.extract_strided_slice %180 {offsets = [0, 0, 16], sizes = [4, 8, 8], strides = [1, 1, 1]} : vector<4x8x96xf32> to vector<4x8x8xf32>
    %220 = vector.extract_strided_slice %180 {offsets = [0, 0, 48], sizes = [4, 8, 8], strides = [1, 1, 1]} : vector<4x8x96xf32> to vector<4x8x8xf32>
    %221 = vector.extract_strided_slice %180 {offsets = [0, 0, 80], sizes = [4, 8, 8], strides = [1, 1, 1]} : vector<4x8x96xf32> to vector<4x8x8xf32>
    "tpu.trace_start"() <{level = 10 : i32, message = "bqd,bkd->bqk"}> : () -> ()
    %cst_100 = arith.constant dense<0.000000e+00> : vector<4x8x8xf32>
    %222 = tpu.matmul %219, %220, %cst_100 {dimension_numbers = #tpu.dot_dimension_numbers<[2], [2], [1], [1], [0, 0, 0, 1, 1, 1], [0], [0]>} : vector<4x8x8xf32>, vector<4x8x8xf32>, vector<4x8x8xf32> -> vector<4x8x8xf32>
    "tpu.trace_stop"() : () -> ()
    %cst_101 = arith.constant 0.353553385 : f32
    %223 = vector.broadcast %cst_101 : f32 to vector<4x8x8xf32>
    %224 = arith.mulf %222, %223 : vector<4x8x8xf32>
    %225 = vector.broadcast %13 : vector<4x1x8xf32> to vector<4x8x8xf32>
    %226 = arith.addf %224, %225 : vector<4x8x8xf32>
    %cst_102 = arith.constant dense<0xFF800000> : vector<4x8xf32>
    %227 = vector.multi_reduction <maximumf>, %226, %cst_102 [2] : vector<4x8x8xf32> to vector<4x8xf32>
    %228 = vector.shape_cast %227 : vector<4x8xf32> to vector<4x8x1xf32>
    %229 = vector.broadcast %228 : vector<4x8x1xf32> to vector<4x8x8xf32>
    %230 = arith.subf %226, %229 : vector<4x8x8xf32>
    %231 = math.exp %230 : vector<4x8x8xf32>
    %cst_103 = arith.constant dense<0.000000e+00> : vector<4x8xf32>
    %232 = vector.multi_reduction <add>, %231, %cst_103 [2] : vector<4x8x8xf32> to vector<4x8xf32>
    %233 = vector.shape_cast %232 : vector<4x8xf32> to vector<4x8x1xf32>
    %234 = tpu.reciprocal %233 {approx = true} : vector<4x8x1xf32> -> vector<4x8x1xf32>
    %235 = vector.broadcast %234 : vector<4x8x1xf32> to vector<4x8x8xf32>
    %236 = arith.mulf %231, %235 : vector<4x8x8xf32>
    "tpu.trace_start"() <{level = 10 : i32, message = "bqk,bkd->bqd"}> : () -> ()
    %cst_104 = arith.constant dense<0.000000e+00> : vector<4x8x8xf32>
    %237 = tpu.matmul %236, %221, %cst_104 {dimension_numbers = #tpu.dot_dimension_numbers<[2], [1], [1], [2], [0, 0, 0, 1, 1, 2], [0], [0]>} : vector<4x8x8xf32>, vector<4x8x8xf32>, vector<4x8x8xf32> -> vector<4x8x8xf32>
    "tpu.trace_stop"() : () -> ()
    %238 = vector.extract_strided_slice %180 {offsets = [0, 0, 24], sizes = [4, 8, 8], strides = [1, 1, 1]} : vector<4x8x96xf32> to vector<4x8x8xf32>
    %239 = vector.extract_strided_slice %180 {offsets = [0, 0, 56], sizes = [4, 8, 8], strides = [1, 1, 1]} : vector<4x8x96xf32> to vector<4x8x8xf32>
    %240 = vector.extract_strided_slice %180 {offsets = [0, 0, 88], sizes = [4, 8, 8], strides = [1, 1, 1]} : vector<4x8x96xf32> to vector<4x8x8xf32>
    "tpu.trace_start"() <{level = 10 : i32, message = "bqd,bkd->bqk"}> : () -> ()
    %cst_105 = arith.constant dense<0.000000e+00> : vector<4x8x8xf32>
    %241 = tpu.matmul %238, %239, %cst_105 {dimension_numbers = #tpu.dot_dimension_numbers<[2], [2], [1], [1], [0, 0, 0, 1, 1, 1], [0], [0]>} : vector<4x8x8xf32>, vector<4x8x8xf32>, vector<4x8x8xf32> -> vector<4x8x8xf32>
    "tpu.trace_stop"() : () -> ()
    %cst_106 = arith.constant 0.353553385 : f32
    %242 = vector.broadcast %cst_106 : f32 to vector<4x8x8xf32>
    %243 = arith.mulf %241, %242 : vector<4x8x8xf32>
    %244 = vector.broadcast %13 : vector<4x1x8xf32> to vector<4x8x8xf32>
    %245 = arith.addf %243, %244 : vector<4x8x8xf32>
    %cst_107 = arith.constant dense<0xFF800000> : vector<4x8xf32>
    %246 = vector.multi_reduction <maximumf>, %245, %cst_107 [2] : vector<4x8x8xf32> to vector<4x8xf32>
    %247 = vector.shape_cast %246 : vector<4x8xf32> to vector<4x8x1xf32>
    %248 = vector.broadcast %247 : vector<4x8x1xf32> to vector<4x8x8xf32>
    %249 = arith.subf %245, %248 : vector<4x8x8xf32>
    %250 = math.exp %249 : vector<4x8x8xf32>
    %cst_108 = arith.constant dense<0.000000e+00> : vector<4x8xf32>
    %251 = vector.multi_reduction <add>, %250, %cst_108 [2] : vector<4x8x8xf32> to vector<4x8xf32>
    %252 = vector.shape_cast %251 : vector<4x8xf32> to vector<4x8x1xf32>
    %253 = tpu.reciprocal %252 {approx = true} : vector<4x8x1xf32> -> vector<4x8x1xf32>
    %254 = vector.broadcast %253 : vector<4x8x1xf32> to vector<4x8x8xf32>
    %255 = arith.mulf %250, %254 : vector<4x8x8xf32>
    "tpu.trace_start"() <{level = 10 : i32, message = "bqk,bkd->bqd"}> : () -> ()
    %cst_109 = arith.constant dense<0.000000e+00> : vector<4x8x8xf32>
    %256 = tpu.matmul %255, %240, %cst_109 {dimension_numbers = #tpu.dot_dimension_numbers<[2], [1], [1], [2], [0, 0, 0, 1, 1, 2], [0], [0]>} : vector<4x8x8xf32>, vector<4x8x8xf32>, vector<4x8x8xf32> -> vector<4x8x8xf32>
    "tpu.trace_stop"() : () -> ()
    %257 = tpu.concatenate %199, %218, %237, %256 in 2 : vector<4x8x8xf32>, vector<4x8x8xf32>, vector<4x8x8xf32>, vector<4x8x8xf32> -> vector<4x8x32xf32>
    %258 = vector.shape_cast %257 : vector<4x8x32xf32> to vector<32x32xf32>
    %c1_110 = arith.constant 1 : index
    %c0_111 = arith.constant 0 : index
    %c0_112 = arith.constant 0 : index
    %259 = vector.load %arg8[%c1_110, %c0_111, %c0_112] : memref<2x32x32xf32, #tpu.memory_space<vmem>>, vector<1x32x32xf32>
    %260 = vector.shape_cast %259 : vector<1x32x32xf32> to vector<32x32xf32>
    %cst_113 = arith.constant dense<0.000000e+00> : vector<32x32xf32>
    %261 = tpu.matmul %258, %260, %cst_113 {dimension_numbers = #tpu.dot_dimension_numbers<[1], [0], [0], [1], [0, 0, 1, 1], [], []>} : vector<32x32xf32>, vector<32x32xf32>, vector<32x32xf32> -> vector<32x32xf32>
    %c1_114 = arith.constant 1 : index
    %c0_115 = arith.constant 0 : index
    %c0_116 = arith.constant 0 : index
    %262 = vector.load %arg9[%c1_114, %c0_115, %c0_116] : memref<2x1x32xf32, #tpu.memory_space<vmem>>, vector<1x1x32xf32>
    %263 = vector.shape_cast %262 : vector<1x1x32xf32> to vector<1x32xf32>
    %264 = vector.broadcast %263 : vector<1x32xf32> to vector<32x32xf32>
    %265 = arith.addf %261, %264 : vector<32x32xf32>
    %266 = arith.addf %172, %265 : vector<32x32xf32>
    %c1_117 = arith.constant 1 : index
    %c0_118 = arith.constant 0 : index
    %c0_119 = arith.constant 0 : index
    %267 = vector.load %arg10[%c1_117, %c0_118, %c0_119] : memref<2x1x32xf32, #tpu.memory_space<vmem>>, vector<1x1x32xf32>
    %268 = vector.shape_cast %267 : vector<1x1x32xf32> to vector<1x32xf32>
    %c1_120 = arith.constant 1 : index
    %c0_121 = arith.constant 0 : index
    %c0_122 = arith.constant 0 : index
    %269 = vector.load %arg11[%c1_120, %c0_121, %c0_122] : memref<2x1x32xf32, #tpu.memory_space<vmem>>, vector<1x1x32xf32>
    %270 = vector.shape_cast %269 : vector<1x1x32xf32> to vector<1x32xf32>
    %cst_123 = arith.constant dense<0.000000e+00> : vector<32xf32>
    %271 = vector.multi_reduction <add>, %266, %cst_123 [1] : vector<32x32xf32> to vector<32xf32>
    %272 = vector.shape_cast %271 : vector<32xf32> to vector<32x1xf32>
    %cst_124 = arith.constant 3.200000e+01 : f32
    %273 = vector.broadcast %cst_124 : f32 to vector<32x1xf32>
    %274 = arith.divf %272, %273 : vector<32x1xf32>
    %275 = vector.broadcast %274 : vector<32x1xf32> to vector<32x32xf32>
    %276 = arith.subf %266, %275 : vector<32x32xf32>
    %277 = arith.mulf %276, %276 : vector<32x32xf32>
    %cst_125 = arith.constant dense<0.000000e+00> : vector<32xf32>
    %278 = vector.multi_reduction <add>, %277, %cst_125 [1] : vector<32x32xf32> to vector<32xf32>
    %279 = vector.shape_cast %278 : vector<32xf32> to vector<32x1xf32>
    %cst_126 = arith.constant 3.200000e+01 : f32
    %280 = vector.broadcast %cst_126 : f32 to vector<32x1xf32>
    %281 = arith.divf %279, %280 : vector<32x1xf32>
    %cst_127 = arith.constant 9.99999974E-6 : f32
    %282 = vector.broadcast %cst_127 : f32 to vector<32x1xf32>
    %283 = arith.addf %281, %282 : vector<32x1xf32>
    %284 = math.rsqrt %283 : vector<32x1xf32>
    %285 = vector.broadcast %284 : vector<32x1xf32> to vector<32x32xf32>
    %286 = arith.mulf %276, %285 : vector<32x32xf32>
    %287 = vector.broadcast %268 : vector<1x32xf32> to vector<32x32xf32>
    %288 = arith.mulf %286, %287 : vector<32x32xf32>
    %289 = vector.broadcast %270 : vector<1x32xf32> to vector<32x32xf32>
    %290 = arith.addf %288, %289 : vector<32x32xf32>
    %c1_128 = arith.constant 1 : index
    %c0_129 = arith.constant 0 : index
    %c0_130 = arith.constant 0 : index
    %291 = vector.load %arg12[%c1_128, %c0_129, %c0_130] : memref<2x32x128xf32, #tpu.memory_space<vmem>>, vector<1x32x128xf32>
    %292 = vector.shape_cast %291 : vector<1x32x128xf32> to vector<32x128xf32>
    %cst_131 = arith.constant dense<0.000000e+00> : vector<32x128xf32>
    %293 = tpu.matmul %290, %292, %cst_131 {dimension_numbers = #tpu.dot_dimension_numbers<[1], [0], [0], [1], [0, 0, 1, 1], [], []>} : vector<32x32xf32>, vector<32x128xf32>, vector<32x128xf32> -> vector<32x128xf32>
    %c1_132 = arith.constant 1 : index
    %c0_133 = arith.constant 0 : index
    %c0_134 = arith.constant 0 : index
    %294 = vector.load %arg13[%c1_132, %c0_133, %c0_134] : memref<2x1x128xf32, #tpu.memory_space<vmem>>, vector<1x1x128xf32>
    %295 = vector.shape_cast %294 : vector<1x1x128xf32> to vector<1x128xf32>
    %296 = vector.broadcast %295 : vector<1x128xf32> to vector<32x128xf32>
    %297 = arith.addf %293, %296 : vector<32x128xf32>
    %cst_135 = arith.constant 0.000000e+00 : f32
    %298 = vector.broadcast %cst_135 : f32 to vector<32x128xf32>
    %299 = arith.maximumf %297, %298 : vector<32x128xf32>
    %c1_136 = arith.constant 1 : index
    %c0_137 = arith.constant 0 : index
    %c0_138 = arith.constant 0 : index
    %300 = vector.load %arg14[%c1_136, %c0_137, %c0_138] : memref<2x128x32xf32, #tpu.memory_space<vmem>>, vector<1x128x32xf32>
    %301 = vector.shape_cast %300 : vector<1x128x32xf32> to vector<128x32xf32>
    %cst_139 = arith.constant dense<0.000000e+00> : vector<32x32xf32>
    %302 = tpu.matmul %299, %301, %cst_139 {dimension_numbers = #tpu.dot_dimension_numbers<[1], [0], [0], [1], [0, 0, 1, 1], [], []>} : vector<32x128xf32>, vector<128x32xf32>, vector<32x32xf32> -> vector<32x32xf32>
    %c1_140 = arith.constant 1 : index
    %c0_141 = arith.constant 0 : index
    %c0_142 = arith.constant 0 : index
    %303 = vector.load %arg15[%c1_140, %c0_141, %c0_142] : memref<2x1x32xf32, #tpu.memory_space<vmem>>, vector<1x1x32xf32>
    %304 = vector.shape_cast %303 : vector<1x1x32xf32> to vector<1x32xf32>
    %305 = vector.broadcast %304 : vector<1x32xf32> to vector<32x32xf32>
    %306 = arith.addf %302, %305 : vector<32x32xf32>
    %307 = arith.addf %290, %306 : vector<32x32xf32>
    %c1_143 = arith.constant 1 : index
    %c0_144 = arith.constant 0 : index
    %c0_145 = arith.constant 0 : index
    %308 = vector.load %arg16[%c1_143, %c0_144, %c0_145] : memref<2x1x32xf32, #tpu.memory_space<vmem>>, vector<1x1x32xf32>
    %309 = vector.shape_cast %308 : vector<1x1x32xf32> to vector<1x32xf32>
    %c1_146 = arith.constant 1 : index
    %c0_147 = arith.constant 0 : index
    %c0_148 = arith.constant 0 : index
    %310 = vector.load %arg17[%c1_146, %c0_147, %c0_148] : memref<2x1x32xf32, #tpu.memory_space<vmem>>, vector<1x1x32xf32>
    %311 = vector.shape_cast %310 : vector<1x1x32xf32> to vector<1x32xf32>
    %cst_149 = arith.constant dense<0.000000e+00> : vector<32xf32>
    %312 = vector.multi_reduction <add>, %307, %cst_149 [1] : vector<32x32xf32> to vector<32xf32>
    %313 = vector.shape_cast %312 : vector<32xf32> to vector<32x1xf32>
    %cst_150 = arith.constant 3.200000e+01 : f32
    %314 = vector.broadcast %cst_150 : f32 to vector<32x1xf32>
    %315 = arith.divf %313, %314 : vector<32x1xf32>
    %316 = vector.broadcast %315 : vector<32x1xf32> to vector<32x32xf32>
    %317 = arith.subf %307, %316 : vector<32x32xf32>
    %318 = arith.mulf %317, %317 : vector<32x32xf32>
    %cst_151 = arith.constant dense<0.000000e+00> : vector<32xf32>
    %319 = vector.multi_reduction <add>, %318, %cst_151 [1] : vector<32x32xf32> to vector<32xf32>
    %320 = vector.shape_cast %319 : vector<32xf32> to vector<32x1xf32>
    %cst_152 = arith.constant 3.200000e+01 : f32
    %321 = vector.broadcast %cst_152 : f32 to vector<32x1xf32>
    %322 = arith.divf %320, %321 : vector<32x1xf32>
    %cst_153 = arith.constant 9.99999974E-6 : f32
    %323 = vector.broadcast %cst_153 : f32 to vector<32x1xf32>
    %324 = arith.addf %322, %323 : vector<32x1xf32>
    %325 = math.rsqrt %324 : vector<32x1xf32>
    %326 = vector.broadcast %325 : vector<32x1xf32> to vector<32x32xf32>
    %327 = arith.mulf %317, %326 : vector<32x32xf32>
    %328 = vector.broadcast %309 : vector<1x32xf32> to vector<32x32xf32>
    %329 = arith.mulf %327, %328 : vector<32x32xf32>
    %330 = vector.broadcast %311 : vector<1x32xf32> to vector<32x32xf32>
    %331 = arith.addf %329, %330 : vector<32x32xf32>
    %332 = vector.shape_cast %331 : vector<32x32xf32> to vector<4x8x32xf32>
    %cst_154 = arith.constant dense<0.000000e+00> : vector<4x1xf32>
    %333 = vector.multi_reduction <add>, %9, %cst_154 [2] : vector<4x1x8xf32> to vector<4x1xf32>
    %334 = vector.shape_cast %333 : vector<4x1xf32> to vector<4x1x1xf32>
    %cst_155 = arith.constant 1.000000e+00 : f32
    %335 = vector.broadcast %cst_155 : f32 to vector<4x1x1xf32>
    %336 = arith.maximumf %334, %335 : vector<4x1x1xf32>
    "tpu.trace_start"() <{level = 10 : i32, message = "bos,bsd->bod"}> : () -> ()
    %cst_156 = arith.constant dense<0.000000e+00> : vector<4x1x32xf32>
    %337 = tpu.matmul %9, %332, %cst_156 {dimension_numbers = #tpu.dot_dimension_numbers<[2], [1], [1], [2], [0, 0, 0, 1, 1, 2], [0], [0]>} : vector<4x1x8xf32>, vector<4x8x32xf32>, vector<4x1x32xf32> -> vector<4x1x32xf32>
    "tpu.trace_stop"() : () -> ()
    %338 = tpu.reciprocal %336 {approx = true} : vector<4x1x1xf32> -> vector<4x1x1xf32>
    %339 = vector.broadcast %338 : vector<4x1x1xf32> to vector<4x1x32xf32>
    %340 = arith.mulf %337, %339 : vector<4x1x32xf32>
    %341 = vector.shape_cast %340 : vector<4x1x32xf32> to vector<4x32xf32>
    %c0_157 = arith.constant 0 : index
    %c0_158 = arith.constant 0 : index
    %342 = vector.load %arg18[%c0_157, %c0_158] : memref<32x32xf32, #tpu.memory_space<vmem>>, vector<32x32xf32>
    %cst_159 = arith.constant dense<0.000000e+00> : vector<4x32xf32>
    %343 = tpu.matmul %341, %342, %cst_159 {dimension_numbers = #tpu.dot_dimension_numbers<[1], [0], [0], [1], [0, 0, 1, 1], [], []>} : vector<4x32xf32>, vector<32x32xf32>, vector<4x32xf32> -> vector<4x32xf32>
    %c0_160 = arith.constant 0 : index
    %c0_161 = arith.constant 0 : index
    %344 = vector.load %arg19[%c0_160, %c0_161] : memref<1x32xf32, #tpu.memory_space<vmem>>, vector<1x32xf32>
    %345 = vector.broadcast %344 : vector<1x32xf32> to vector<4x32xf32>
    %346 = arith.addf %343, %345 : vector<4x32xf32>
    %cst_162 = arith.constant 0.000000e+00 : f32
    %347 = vector.broadcast %cst_162 : f32 to vector<4x32xf32>
    %348 = arith.maximumf %346, %347 : vector<4x32xf32>
    %c0_163 = arith.constant 0 : index
    %c0_164 = arith.constant 0 : index
    %349 = vector.load %arg20[%c0_163, %c0_164] : memref<32x2xf32, #tpu.memory_space<vmem>>, vector<32x2xf32>
    %cst_165 = arith.constant dense<0.000000e+00> : vector<4x2xf32>
    %350 = tpu.matmul %348, %349, %cst_165 {dimension_numbers = #tpu.dot_dimension_numbers<[1], [0], [0], [1], [0, 0, 1, 1], [], []>} : vector<4x32xf32>, vector<32x2xf32>, vector<4x2xf32> -> vector<4x2xf32>
    %c0_166 = arith.constant 0 : index
    %c0_167 = arith.constant 0 : index
    %351 = vector.load %arg21[%c0_166, %c0_167] : memref<1x2xf32, #tpu.memory_space<vmem>>, vector<1x2xf32>
    %352 = vector.broadcast %351 : vector<1x2xf32> to vector<4x2xf32>
    %353 = arith.addf %350, %352 : vector<4x2xf32>
    %354 = vector.shape_cast %353 : vector<4x2xf32> to vector<4x1x2xf32>
    %c0_168 = arith.constant 0 : index
    %c0_169 = arith.constant 0 : index
    %c0_170 = arith.constant 0 : index
    %355 = vector.load %arg22[%c0_168, %c0_169, %c0_170] : memref<4x1x2xf32, #tpu.memory_space<vmem>>, vector<4x1x2xf32>
    tpu.vector_store %arg22[%c0_168, %c0_169, %c0_170], %354 {strides = array<i32>} : memref<4x1x2xf32, #tpu.memory_space<vmem>>, vector<4x1x2xf32>,
    return
  }
  func.func @transform_0(%arg0: i32) -> (i32, i32, i32) {
    %c0_i32 = arith.constant 0 : i32
    %c0_i32_0 = arith.constant 0 : i32
    %c0_i32_1 = arith.constant 0 : i32
    return %arg0, %c0_i32, %c0_i32_0 : i32, i32, i32
  }
  func.func @transform_1(%arg0: i32) -> (i32, i32, i32) {
    %c0_i32 = arith.constant 0 : i32
    %c0_i32_0 = arith.constant 0 : i32
    %c0_i32_1 = arith.constant 0 : i32
    return %arg0, %c0_i32, %c0_i32_0 : i32, i32, i32
  }
  func.func @transform_2(%arg0: i32) -> (i32, i32) {
    %c0_i32 = arith.constant 0 : i32
    %c0_i32_0 = arith.constant 0 : i32
    %c0_i32_1 = arith.constant 0 : i32
    return %c0_i32, %c0_i32_0 : i32, i32
  }
  func.func @transform_3(%arg0: i32) -> (i32, i32) {
    %c0_i32 = arith.constant 0 : i32
    %c0_i32_0 = arith.constant 0 : i32
    %c0_i32_1 = arith.constant 0 : i32
    return %c0_i32, %c0_i32_0 : i32, i32
  }
  func.func @transform_4(%arg0: i32) -> (i32, i32) {
    %c0_i32 = arith.constant 0 : i32
    %c0_i32_0 = arith.constant 0 : i32
    %c0_i32_1 = arith.constant 0 : i32
    return %c0_i32, %c0_i32_0 : i32, i32
  }
  func.func @transform_5(%arg0: i32) -> (i32, i32, i32) {
    %c0_i32 = arith.constant 0 : i32
    %c0_i32_0 = arith.constant 0 : i32
    %c0_i32_1 = arith.constant 0 : i32
    %c0_i32_2 = arith.constant 0 : i32
    return %c0_i32, %c0_i32_0, %c0_i32_1 : i32, i32, i32
  }
  func.func @transform_6(%arg0: i32) -> (i32, i32, i32) {
    %c0_i32 = arith.constant 0 : i32
    %c0_i32_0 = arith.constant 0 : i32
    %c0_i32_1 = arith.constant 0 : i32
    %c0_i32_2 = arith.constant 0 : i32
    return %c0_i32, %c0_i32_0, %c0_i32_1 : i32, i32, i32
  }
  func.func @transform_7(%arg0: i32) -> (i32, i32, i32) {
    %c0_i32 = arith.constant 0 : i32
    %c0_i32_0 = arith.constant 0 : i32
    %c0_i32_1 = arith.constant 0 : i32
    %c0_i32_2 = arith.constant 0 : i32
    return %c0_i32, %c0_i32_0, %c0_i32_1 : i32, i32, i32
  }
  func.func @transform_8(%arg0: i32) -> (i32, i32, i32) {
    %c0_i32 = arith.constant 0 : i32
    %c0_i32_0 = arith.constant 0 : i32
    %c0_i32_1 = arith.constant 0 : i32
    %c0_i32_2 = arith.constant 0 : i32
    return %c0_i32, %c0_i32_0, %c0_i32_1 : i32, i32, i32
  }
  func.func @transform_9(%arg0: i32) -> (i32, i32, i32) {
    %c0_i32 = arith.constant 0 : i32
    %c0_i32_0 = arith.constant 0 : i32
    %c0_i32_1 = arith.constant 0 : i32
    %c0_i32_2 = arith.constant 0 : i32
    return %c0_i32, %c0_i32_0, %c0_i32_1 : i32, i32, i32
  }
  func.func @transform_10(%arg0: i32) -> (i32, i32, i32) {
    %c0_i32 = arith.constant 0 : i32
    %c0_i32_0 = arith.constant 0 : i32
    %c0_i32_1 = arith.constant 0 : i32
    %c0_i32_2 = arith.constant 0 : i32
    return %c0_i32, %c0_i32_0, %c0_i32_1 : i32, i32, i32
  }
  func.func @transform_11(%arg0: i32) -> (i32, i32, i32) {
    %c0_i32 = arith.constant 0 : i32
    %c0_i32_0 = arith.constant 0 : i32
    %c0_i32_1 = arith.constant 0 : i32
    %c0_i32_2 = arith.constant 0 : i32
    return %c0_i32, %c0_i32_0, %c0_i32_1 : i32, i32, i32
  }
  func.func @transform_12(%arg0: i32) -> (i32, i32, i32) {
    %c0_i32 = arith.constant 0 : i32
    %c0_i32_0 = arith.constant 0 : i32
    %c0_i32_1 = arith.constant 0 : i32
    %c0_i32_2 = arith.constant 0 : i32
    return %c0_i32, %c0_i32_0, %c0_i32_1 : i32, i32, i32
  }
  func.func @transform_13(%arg0: i32) -> (i32, i32, i32) {
    %c0_i32 = arith.constant 0 : i32
    %c0_i32_0 = arith.constant 0 : i32
    %c0_i32_1 = arith.constant 0 : i32
    %c0_i32_2 = arith.constant 0 : i32
    return %c0_i32, %c0_i32_0, %c0_i32_1 : i32, i32, i32
  }
  func.func @transform_14(%arg0: i32) -> (i32, i32, i32) {
    %c0_i32 = arith.constant 0 : i32
    %c0_i32_0 = arith.constant 0 : i32
    %c0_i32_1 = arith.constant 0 : i32
    %c0_i32_2 = arith.constant 0 : i32
    return %c0_i32, %c0_i32_0, %c0_i32_1 : i32, i32, i32
  }
  func.func @transform_15(%arg0: i32) -> (i32, i32, i32) {
    %c0_i32 = arith.constant 0 : i32
    %c0_i32_0 = arith.constant 0 : i32
    %c0_i32_1 = arith.constant 0 : i32
    %c0_i32_2 = arith.constant 0 : i32
    return %c0_i32, %c0_i32_0, %c0_i32_1 : i32, i32, i32
  }
  func.func @transform_16(%arg0: i32) -> (i32, i32, i32) {
    %c0_i32 = arith.constant 0 : i32
    %c0_i32_0 = arith.constant 0 : i32
    %c0_i32_1 = arith.constant 0 : i32
    %c0_i32_2 = arith.constant 0 : i32
    return %c0_i32, %c0_i32_0, %c0_i32_1 : i32, i32, i32
  }
  func.func @transform_17(%arg0: i32) -> (i32, i32) {
    %c0_i32 = arith.constant 0 : i32
    %c0_i32_0 = arith.constant 0 : i32
    %c0_i32_1 = arith.constant 0 : i32
    return %c0_i32, %c0_i32_0 : i32, i32
  }
  func.func @transform_18(%arg0: i32) -> (i32, i32) {
    %c0_i32 = arith.constant 0 : i32
    %c0_i32_0 = arith.constant 0 : i32
    %c0_i32_1 = arith.constant 0 : i32
    return %c0_i32, %c0_i32_0 : i32, i32
  }
  func.func @transform_19(%arg0: i32) -> (i32, i32) {
    %c0_i32 = arith.constant 0 : i32
    %c0_i32_0 = arith.constant 0 : i32
    %c0_i32_1 = arith.constant 0 : i32
    return %c0_i32, %c0_i32_0 : i32, i32
  }
  func.func @transform_20(%arg0: i32) -> (i32, i32) {
    %c0_i32 = arith.constant 0 : i32
    %c0_i32_0 = arith.constant 0 : i32
    %c0_i32_1 = arith.constant 0 : i32
    return %c0_i32, %c0_i32_0 : i32, i32
  }
  func.func @transform_21(%arg0: i32) -> (i32, i32, i32) {
    %c0_i32 = arith.constant 0 : i32
    %c0_i32_0 = arith.constant 0 : i32
    %c0_i32_1 = arith.constant 0 : i32
    return %arg0, %c0_i32, %c0_i32_0 : i32, i32, i32
  }
}

</mosaic_0001>

<bundles_post_ra>
// kernel: tpu_custom_call.1
= control target key start
LH: loop header
LB: loop body
LE: loop exit
PB: predicated region body
PF: predicated region fallthrough
CT: control target
= control target key end

     0   :  { %s10554_s0 = inlined_call_operand.vmem [shape: f32[8,8,4], index: 0, kind: input, shape index: {}]   ;;  %s10555_s1 = inlined_call_operand.vmem [shape: f32[8,1,8], index: 1, kind: input, shape index: {}]   ;;  %s10556_s2 = inlined_call_operand.vmem [shape: f32[32,32], index: 2, kind: input, shape index: {}]   ;;  %s10557_s3 = inlined_call_operand.vmem [shape: f32[4,32], index: 3, kind: input, shape index: {}]   ;;  %s10558_s4 = inlined_call_operand.vmem [shape: f32[1,32], index: 4, kind: input, shape index: {}]   ;;  %s10559_s5 = inlined_call_operand.vmem [shape: f32[2,32,96], index: 5, kind: input, shape index: {}]   ;;  %s10560_s6 = inlined_call_operand.vmem [shape: f32[2,1,96], index: 6, kind: input, shape index: {}]   ;;  %s10561_s7 = inlined_call_operand.vmem [shape: f32[2,32,32], index: 7, kind: input, shape index: {}]   ;;  %s10562_s8 = inlined_call_operand.vmem [shape: f32[2,1,32], index: 8, kind: input, shape index: {}]   ;;  %s10563_s9 = inlined_call_operand.vmem [shape: f32[2,1,32], index: 9, kind: input, shape index: {}]   ;;  %s10564_s10 = inlined_call_operand.vmem [shape: f32[2,1,32], index: 10, kind: input, shape index: {}]   ;;  %s10565_s11 = inlined_call_operand.vmem [shape: f32[2,32,128], index: 11, kind: input, shape index: {}]   ;;  %s10566_s12 = inlined_call_operand.vmem [shape: f32[2,1,128], index: 12, kind: input, shape index: {}]   ;;  %s10567_s13 = inlined_call_operand.vmem [shape: f32[2,128,32], index: 13, kind: input, shape index: {}]   ;;  %s10568_s14 = inlined_call_operand.vmem [shape: f32[2,1,32], index: 14, kind: input, shape index: {}]   ;;  %s10569_s15 = inlined_call_operand.vmem [shape: f32[2,1,32], index: 15, kind: input, shape index: {}]   ;;  %s10570_s16 = inlined_call_operand.vmem [shape: f32[2,1,32], index: 16, kind: input, shape index: {}]   ;;  %s10571_s17 = inlined_call_operand.vmem [shape: f32[32,32], index: 17, kind: input, shape index: {}]   ;;  %s10572_s18 = inlined_call_operand.vmem [shape: f32[1,32], index: 18, kind: input, shape index: {}]   ;;  %s10573_s19 = inlined_call_operand.vmem [shape: f32[32,2], index: 19, kind: input, shape index: {}]   ;;  %s10574_s20 = inlined_call_operand.vmem [shape: f32[1,2], index: 20, kind: input, shape index: {}]   ;;  %s10575_s21 = inlined_call_operand.vmem [shape: f32[8,1,2], index: 21, kind: output, shape index: {}]  }
   0x1   :  { %10602 = sst [smem:[#allocation2_spill]] %s10554_s0 }
   0x2   :  { %10603 = sst [smem:[#allocation3_spill]] %s10555_s1 }
   0x3   :  { %10604 = sst [smem:[#allocation4_spill]] %s10556_s2  ;;  %s9381_s2 = smov 0  }
   0x4   :  { %10605 = sst [smem:[#allocation5_spill]] %s10557_s3 }
   0x5   :  { %10606 = sst [smem:[#allocation6_spill]] %s10558_s4 }
   0x6   :  { %10607 = sst [smem:[#allocation7_spill]] %s10559_s5 }
   0x7 LB: > { %s8083_s25 = sadd.s32 4294967295, %s9252_s2   ;;  %p8087_p0 = scmp.ge.s32.totalorder %s9252_s2, 1  ;;  %s9252_s2 = sphi %s9381_s2, %s31_s2  }
   0x8   : > { %p598_p1 = scmp.lt.s32.totalorder %s9252_s2, 3 }
   0xa   : > { %p599_p2 = pnand %p8087_p0, %p598_p1 }
   0xb   : > { %s10608_s3 = sld [smem:[#allocation5_spill]] (!%p599_p2)  ;;  %s8088_s28 = sshll.u32 (!%p599_p2), %s8083_s25, 2 }
   0xc   : > { %602 = sbr.rel (%p599_p2) target bundleno = 8653 (0x21cd), region = 104  ;;  %p662_p3 = scmp.lt.s32.totalorder (!%p599_p2), %s8088_s28, 7 }
   0xd   : > { %s10609_s30 = sld [smem:[#allocation2_spill]] (!%p599_p2)  ;;  %s10598_s26 = smov (!%p599_p2), 64  }
   0xe   : > { %s10610_s1 = sld [smem:[#allocation7_spill]] (!%p599_p2)  ;;  %s10596_s27 = smov (!%p599_p2), 88  }
   0xf   : > { %s10612_s23 = sld [smem:[#allocation4_spill]] (!%p599_p2)  ;;  %s10590_s0 = smov (!%p599_p2), 80  }
  0x10   : > { %s10613_s24 = sld [smem:[#allocation3_spill]] (!%p599_p2)  ;;  %s10588_s4 = smov (!%p599_p2), 112  }
  0x11   : > { %v681_v0 = vld [vmem:[%s10608_s3] sm:$0xf]  ;;  %vm702_vm0 = vcmask 1043456   ;;  %s10627_s28 = smov (!%p662_p3, %s8088_s28), 7  ;;  %vm689_vm1 = vcmask 31744   ;;  %vm822_vm2 = vcmask 261120   ;;  %v1237_v40 = vlaneseq }
  0x12   : > { %8519 = vmatprep.subr.msk.mxu0 %vm702_vm0, %v681_v0  ;;  %s8089_s29 = sshll.u32 %s10627_s28, 3  ;;  %v9254_v26 = vmov 0.0   ;;  %vm9255_vm3 = vmmov 0   ;;  %v8098_v28 = vld [vmem:[%s10560_s6] ss:$0 sm:$0xff]  ;;  %vm923_vm4 = vcmask 64512  }
  0x13   : > { %8520 = vmatpush3.msk.msra.mxu0 %vm702_vm0, %v681_v0  ;;  %s665_s5 = scalar_lea.vmem %s10609_s30, %s8089_s29  ;;  %s10611_s30 = sld [smem:[#allocation6_spill]]  ;;  %v9497_v43 = vshrl.u32 %v1237_v40, 7  ;;  %vm3665_vm5 = vcmask 130048   ;;  %vm3670_vm6 = vcmask 195584   ;;  %vm7492_vm7 = vcmask 57344  }
  0x14   : > { %v677_v1 = vld [vmem:[%s665_s5] sm:$0xff]  ;;  %v678_v2 = vld [vmem:[%s665_s5 + $0x8] sm:$0xff]  ;;  %v679_v3 = vld [vmem:[%s665_s5 + $0x10] sm:$0xff]  ;;  %8541 = vmatprep.subr.mxu0 %v9254_v26  ;;  %s10594_s3 = smov 120   ;;  %s10592_s29 = smov 56   ;;  %vm7825_vm8 = vcmask 1041409  }
  0x15   : > { %8521 = vmatprep.mubr.msk.f32.mxu0 %vm689_vm1, %v677_v1  ;;  %v680_v4 = vld [vmem:[%s665_s5 + $0x18] sm:$0xff]  ;;  %v813_v6 = vld [vmem:[%s10610_s1 + $0x10] sm:$0xff]  ;;  %v812_v7 = vld [vmem:[%s10610_s1 + $0x8] sm:$0xff]  ;;  %v1239_v49 = vsub.s32 0, %v9497_v43  ;;  %s10582_s5 = smov 48   ;;  %s10580_s22 = smov 72  }
  0x16   : > { %8522 = vmatmul.mubr.msk.f32.vlgmr.msra.gmra.mxu0 %vm689_vm1, %v678_v2  ;;  %v814_v5 = vld [vmem:[%s10610_s1 + $0x18] sm:$0xff]  ;;  %v811_v8 = vld [vmem:[%s10610_s1] sm:$0xff]  ;;  %v792_v14 = vld [vmem:[%s10612_s23 + $0x8] sm:$0xff]  ;;  %s9494_s25 = scalar_lea.vmem %s10613_s24, %s10627_s28  ;;  %s10578_s24 = smov 104   ;;  %vm7828_vm9 = vcmask 1042434   ;;  %vm7831_vm10 = vcmask 1043459  }
  0x17   : > { %8524 = vmatprep.mubr.msk.f32.mxu0 %vm689_vm1, %v679_v3  ;;  %8527 = vmatprep.subr.mxu1 %v814_v5  ;;  %v791_v13 = vld [vmem:[%s10612_s23] sm:$0xff]  ;;  %v793_v21 = vld [vmem:[%s10612_s23 + $0x10] sm:$0xff]  ;;  %v794_v22 = vld [vmem:[%s10612_s23 + $0x18] sm:$0xff]  ;;  %vm8019_vm11 = vcmask 8192  }
  0x18   : > { %8528 = vmatpush3.msra.mxu1 %v814_v5  ;;  %v799_v41 = vld [vmem:[%s9494_s25] sm:$0x1]  ;;  %v800_v44 = vld [vmem:[%s9494_s25 + $0x1] sm:$0x1]  ;;  %v801_v45 = vld [vmem:[%s9494_s25 + $0x2] sm:$0x1] }
  0x19   : > { %8529 = vmatprep.subr.mxu1 %v813_v6  ;;  %v8092_v9 = vld [vmem:[%s10611_s30] ss:$0 sm:$0xff]  ;;  %s9256_s30 = smov 96   ;;  %v803_v42 = vsub.f32 1.0, %v799_v41  ;;  %v804_v46 = vsub.f32 1.0, %v800_v44  ;;  %v805_v47 = vsub.f32 1.0, %v801_v45 }
  0x1a   : > { %8525 = vmatmul.mubr.msk.f32.gmra.mxu0 %vm689_vm1, %v680_v4  ;;  %8530 = vmatpush3.msra.mxu1 %v813_v6  ;;  %v802_v50 = vld [vmem:[%s9494_s25 + $0x3] sm:$0x1] }
  0x1b   : > { %8531 = vmatprep.subr.mxu1 %v812_v7  ;;  %8543 = vmatprep.mubr.msk.f32.mxu0 %vm9255_vm3, %v9254_v26  ;;  %v807_v48 = vmul.f32 -1e+09, %v803_v42  ;;  %v806_v51 = vsub.f32 1.0, %v802_v50  ;;  %v808_v52 = vmul.f32 -1e+09, %v804_v46 }
  0x1c   : > { %8532 = vmatpush3.msra.mxu1 %v812_v7  ;;  %v809_v53 = vmul.f32 -1e+09, %v805_v47 }
  0x1d   : > { %8533 = vmatprep.subr.mxu1 %v811_v8  ;;  %v9503_v54 = vrot.slane %v807_v48, %v1239_v49  ;;  %v810_v58 = vmul.f32 -1e+09, %v806_v51  ;;  %v9505_v59 = vrot.slane %v808_v52, %v1239_v49 }
  0x1e   : > { %8534 = vmatpush3.msra.mxu1 %v811_v8  ;;  %v9507_v60 = vrot.slane %v809_v53, %v1239_v49 }
  0x1f   : > { %8551 = vmatprep.subr.mxu1 %v9254_v26  ;;  %v9511_v5 = vrot.slane %v810_v58, %v1239_v49 }
  0xd6   : > { %v8523_v10 = vpop.f32.mrf.mxu0 }
  0xd7   : > { %v778_v11 = vadd.f32 %v8523_v10, %v8092_v9 }
  0xd8   : > { %v772_v12 = vpop.f32.mrf.mxu0 }
  0xd9   : > { %v773_v15 = vadd.f32 %v8092_v9, %v772_v12  ;;  %v9421_v18 = vadd.f32 %v792_v14, %v778_v11 }
  0xda   : > { %v8526_v16 = vpop.f32.mrf.mxu0 }
  0xdb   : > { %v9419_v17 = vadd.f32 %v791_v13, %v773_v15  ;;  %v788_v19 = vadd.f32 %v8526_v16, %v8092_v9 }
  0xdc   : > { %v782_v20 = vpop.f32.mrf.mxu0 }
  0xdd   : > { %v783_v23 = vadd.f32 %v8092_v9, %v782_v20  ;;  %8535 = vmatprep.mubr.msk.f32.mxu1 %vm822_vm2, %v9419_v17  ;;  %v9435_v25 = vadd.f32 %v794_v22, %v788_v19 }
  0xde   : > { %8536 = vmatmul.mubr.msk.f32.vlgmr.msra.gmra.mxu1 %vm822_vm2, %v9421_v18 }
  0xdf   : > { %v9433_v24 = vadd.f32 %v793_v21, %v783_v23 }
  0xe1   : > { %8538 = vmatprep.mubr.msk.f32.mxu1 %vm822_vm2, %v9433_v24 }
  0xe2   : > { %8539 = vmatmul.mubr.msk.f32.gmra.mxu1 %vm822_vm2, %v9435_v25 }
  0xe3   : > { %8553 = vmatprep.mubr.msk.f32.mxu1 %vm9255_vm3, %v9254_v26 }
 0x19e   : > { %v8537_v27 = vpop.f32.mrf.mxu1 }
 0x19f   : > { %v9454_v33 = vadd.f32 %v8537_v27, %v8098_v28 }
 0x1a0   : > { %v901_v29 = vpop.f32.mrf.mxu1 }
 0x1a1   : > { %v9450_v30 = vadd.f32 %v8098_v28, %v901_v29 }
 0x1a2   : > { %v8540_v31 = vpop.f32.mrf.mxu1 }
 0x1a3   : > { %921 = vrot.lane.b32.xlu0 %v9450_v30, %s9256_s30  ;;  %v9462_v35 = vadd.f32 %v8540_v31, %v8098_v28 }
 0x1a4   : > { %v911_v32 = vpop.f32.mrf.mxu1 }
 0x1a5   : > { %v9456_v34 = vadd.f32 %v8098_v28, %v911_v32 }
 0x1a7   : > { %1076 = vrot.lane.b32.xlu1 %v9456_v34, %s9256_s30  ;;  %999 = vrot.lane.b32.xlu0 %v9454_v33, %s9256_s30 }
 0x1ab   : > { %1153 = vrot.lane.b32.xlu1 %v9462_v35, %s9256_s30 }
 0x215   : > { %v922_v36 = vpop.permute.xlu0 %921 }
 0x216   : > { %8542 = vmatpush3.xpose.msk.msra.mxu0 %vm923_vm4, %v922_v36 }
 0x217   : > { %8546 = vmatprep.subr.mxu0 %v9254_v26 }
 0x219   : > { %v1077_v37 = vpop.permute.xlu1 %1076  ;;  %8544 = vmatmul.mubr.msk.f32.vlgmr.msra.gmra.mxu0 %vm923_vm4, %v9450_v30  ;;  %v1000_v38 = vpop.permute.xlu0 %999 }
 0x21a   : > { %8547 = vmatpush3.xpose.msk.msra.mxu0 %vm923_vm4, %v1000_v38  ;;  %8552 = vmatpush3.xpose.msk.msra.mxu1 %vm923_vm4, %v1077_v37 }
 0x21b   : > { %8548 = vmatprep.mubr.msk.f32.mxu0 %vm9255_vm3, %v9254_v26  ;;  %8556 = vmatprep.subr.mxu0 %v9254_v26 }
 0x21c   : > { %8561 = vmatprep.subr.mxu1 %v9254_v26 }
 0x21d   : > { %8554 = vmatmul.mubr.msk.f32.vlgmr.msra.gmra.mxu1 %vm923_vm4, %v9456_v34  ;;  %v1154_v39 = vpop.permute.xlu1 %1153  ;;  %8549 = vmatmul.mubr.msk.f32.vlgmr.msra.gmra.mxu0 %vm923_vm4, %v9454_v33 }
 0x21e   : > { %8557 = vmatpush3.xpose.msk.msra.mxu0 %vm923_vm4, %v1154_v39  ;;  %8558 = vmatprep.mubr.msk.f32.mxu0 %vm9255_vm3, %v9254_v26 }
 0x21f   : > { %8566 = vmatprep.subr.mxu0 %v9254_v26  ;;  %8563 = vmatprep.mubr.msk.f32.mxu1 %vm9255_vm3, %v9254_v26 }
 0x221   : > { %8559 = vmatmul.mubr.msk.f32.vlgmr.msra.gmra.mxu0 %vm923_vm4, %v9462_v35 }
 0x222   : > { %8568 = vmatprep.mubr.msk.f32.mxu0 %vm9255_vm3, %v9254_v26 }
 0x2d9   : > { %v994_v55 = vpop.f32.mrf.mxu0 }
 0x2da   : > { %v1229_v56 = vmul.f32 0.35355338, %v994_v55 }
 0x2db   : > { %v8545_v57 = vpop.f32.mrf.mxu0 }
 0x2dc   : > { %v1257_v61 = vadd.f32 %v9503_v54, %v1229_v56 }
 0x2dd   : > { %v1071_v62 = vpop.f32.mrf.mxu0  ;;  %v1148_v63 = vpop.f32.mrf.mxu1 }
 0x2de   : > { %v1230_v0 = vmul.f32 0.35355338, %v1071_v62  ;;  %v1231_v1 = vmul.f32 0.35355338, %v1148_v63  ;;  %v1261_v2 = vsel %vm923_vm4, %v1257_v61, -inf }
 0x2df   : > { %v8555_v3 = vpop.f32.mrf.mxu1  ;;  %1262 = vmax.xlane.f32.xlu0 %v1261_v2  ;;  %v8550_v4 = vpop.f32.mrf.mxu0 }
 0x2e0   : > { %v1259_v6 = vadd.f32 %v9507_v60, %v1231_v1  ;;  %v1258_v7 = vadd.f32 %v9505_v59, %v1230_v0 }
 0x2e1   : > { %v1225_v8 = vpop.f32.mrf.mxu0 }
 0x2e2   : > { %v1232_v9 = vmul.f32 0.35355338, %v1225_v8  ;;  %v1267_v10 = vsel %vm923_vm4, %v1259_v6, -inf  ;;  %v1264_v11 = vsel %vm923_vm4, %v1258_v7, -inf }
 0x2e3   : > { %1268 = vmax.xlane.f32.xlu0 %v1267_v10  ;;  %1265 = vmax.xlane.f32.xlu1 %v1264_v11  ;;  %v8560_v12 = vpop.f32.mrf.mxu0 }
 0x2e4   : > { %v1260_v13 = vadd.f32 %v9511_v5, %v1232_v9 }
 0x2e6   : > { %v1270_v14 = vsel %vm923_vm4, %v1260_v13, -inf }
 0x2e7   : > { %1271 = vmax.xlane.f32.xlu0 %v1270_v14 }
 0x2f4   : > { %1305 = vrot.lane.b32.xlu1 %v9450_v30, %s10598_s26 }
 0x2f8   : > { %1457 = vrot.lane.b32.xlu1 %v9456_v34, %s10598_s26 }
 0x2fc   : > { %1533 = vrot.lane.b32.xlu1 %v9462_v35, %s10598_s26 }
 0x2fd   : > { %1381 = vrot.lane.b32.xlu0 %v9454_v33, %s10598_s26  ;;  %s10622_s26 = smov 104  }
 0x300   : > { %1689 = vrot.lane.b32.xlu1 %v9454_v33, %s10596_s27 }
 0x301   : > { %1611 = vrot.lane.b32.xlu0 %v9450_v30, %s10596_s27 }
 0x304   : > { %1687 = vrot.lane.b32.xlu1 %v9454_v33, %s10594_s3 }
 0x305   : > { %1609 = vrot.lane.b32.xlu0 %v9450_v30, %s10594_s3 }
 0x368   : > { %v1263_v15 = vpop.xlane.xlu0 %1262 }
 0x369   : > { %v1273_v16 = vsub.f32 %v1257_v61, %v1263_v15 }
 0x36b   : > { %v1277_v19 = vmul.f32 1.442695, %v1273_v16 }
 0x36c   : > { %v1266_v20 = vpop.xlane.xlu1 %1265  ;;  %v1269_v21 = vpop.xlane.xlu0 %1268 }
 0x36d   : > { %9074 = vpow2.f32 %v1277_v19  ;;  %v1274_v22 = vsub.f32 %v1258_v7, %v1266_v20  ;;  %v1275_v23 = vsub.f32 %v1259_v6, %v1269_v21 }
 0x36f   : > { %v1279_v27 = vmul.f32 1.442695, %v1274_v22  ;;  %v1281_v28 = vmul.f32 1.442695, %v1275_v23 }
 0x370   : > { %v1306_v29 = vpop.permute.xlu1 %1305  ;;  %v1272_v31 = vpop.xlane.xlu0 %1271 }
 0x371   : > { %9076 = vpow2.f32 %v1279_v27  ;;  %v1276_v32 = vsub.f32 %v1260_v13, %v1272_v31  ;;  %8562 = vmatpush3.msra.mxu1 %v1306_v29 }
 0x372   : > { %9078 = vpow2.f32 %v1281_v28  ;;  %8571 = vmatprep.subr.mxu1 %v9254_v26 }
 0x373   : > { %v1283_v36 = vmul.f32 1.442695, %v1276_v32 }
 0x374   : > { %v1382_v37 = vpop.permute.xlu0 %1381  ;;  %v1458_v47 = vpop.permute.xlu1 %1457 }
 0x375   : > { %9080 = vpow2.f32 %v1283_v36  ;;  %8567 = vmatpush3.msra.mxu0 %v1382_v37 }
 0x376   : > { %8576 = vmatprep.subr.mxu0 %v9254_v26 }
 0x378   : > { %v1534_v48 = vpop.permute.xlu1 %1533  ;;  %v1612_v50 = vpop.permute.xlu0 %1611 }
 0x37a   : > { %v9075_v38 = vpop.eup %9074 }
 0x37b   : > { %v1285_v39 = vsel %vm923_vm4, %v9075_v38, 0.0 }
 0x37c   : > { %1286 = vadd.xlane.f32.xlu1 %v1285_v39  ;;  %v1690_v49 = vpop.permute.xlu1 %1689  ;;  %v1610_v52 = vpop.permute.xlu0 %1609 }
 0x37e   : > { %v9077_v40 = vpop.eup %9076 }
 0x37f   : > { %v9079_v41 = vpop.eup %9078  ;;  %v1288_v42 = vsel %vm923_vm4, %v9077_v40, 0.0 }
 0x380   : > { %1289 = vadd.xlane.f32.xlu0 %v1288_v42  ;;  %v1291_v44 = vsel %vm923_vm4, %v9079_v41, 0.0  ;;  %v1688_v51 = vpop.permute.xlu1 %1687 }
 0x381   : > { %1292 = vadd.xlane.f32.xlu1 %v1291_v44 }
 0x382   : > { %v9081_v45 = vpop.eup %9080 }
 0x383   : > { %v1294_v46 = vsel %vm923_vm4, %v9081_v45, 0.0 }
 0x384   : > { %1295 = vadd.xlane.f32.xlu0 %v1294_v46 }
 0x392   : > { %1845 = vrot.lane.b32.xlu1 %v9462_v35, %s10596_s27 }
 0x396   : > { %1843 = vrot.lane.b32.xlu1 %v9462_v35, %s10594_s3 }
 0x39a   : > { %1767 = vrot.lane.b32.xlu0 %v9456_v34, %s10596_s27  ;;  %s10616_s27 = smov 120  }
 0x39e   : > { %1765 = vrot.lane.b32.xlu0 %v9456_v34, %s10594_s3  ;;  %s10617_s3 = smov 56  }
 0x405   : > { %v1287_v53 = vpop.xlane.xlu1 %1286 }
 0x406   : > { %9082 = vrcp.f32 %v1287_v53 }
 0x409   : > { %v1290_v55 = vpop.xlane.xlu0 %1289 }
 0x40a   : > { %v1293_v56 = vpop.xlane.xlu1 %1292  ;;  %9084 = vrcp.f32 %v1290_v55 }
 0x40b   : > { %9086 = vrcp.f32 %v1293_v56 }
 0x40d   : > { %v1296_v57 = vpop.xlane.xlu0 %1295 }
 0x40e   : > { %9088 = vrcp.f32 %v1296_v57  ;;  %v1846_v6 = vpop.permute.xlu1 %1845 }
 0x411   : > { %v1768_v3 = vpop.permute.xlu0 %1767 }
 0x412   : > { %v1844_v8 = vpop.permute.xlu1 %1843 }
 0x413   : > { %v9083_v58 = vpop.eup %9082 }
 0x414   : > { %v1301_v61 = vmul.f32 %v9083_v58, %v9075_v38 }
 0x415   : > { %v1766_v7 = vpop.permute.xlu0 %1765 }
 0x416   : > { %8564 = vmatmul.mubr.msk.f32.vlgmr.msra.gmra.mxu1 %vm923_vm4, %v1301_v61 }
 0x417   : > { %v9085_v62 = vpop.eup %9084  ;;  %8572 = vmatpush3.msra.mxu1 %v1458_v47  ;;  %8573 = vmatprep.mubr.msk.f32.mxu1 %vm9255_vm3, %v9254_v26 }
 0x418   : > { %v9087_v63 = vpop.eup %9086  ;;  %8581 = vmatprep.subr.mxu1 %v9254_v26  ;;  %v1302_v0 = vmul.f32 %v9085_v62, %v9077_v40 }
 0x419   : > { %v1303_v1 = vmul.f32 %v9087_v63, %v9079_v41 }
 0x41a   : > { %8569 = vmatmul.mubr.msk.f32.vlgmr.msra.gmra.mxu0 %vm923_vm4, %v1302_v0 }
 0x41b   : > { %v9089_v2 = vpop.eup %9088  ;;  %8574 = vmatmul.mubr.msk.f32.vlgmr.msra.gmra.mxu1 %vm923_vm4, %v1303_v1  ;;  %8577 = vmatpush3.msra.mxu0 %v1534_v48 }
 0x41c   : > { %8582 = vmatpush3.xpose.msk.msra.mxu1 %vm923_vm4, %v1612_v50  ;;  %8578 = vmatprep.mubr.msk.f32.mxu0 %vm9255_vm3, %v9254_v26  ;;  %v1304_v4 = vmul.f32 %v9089_v2, %v9081_v45 }
 0x41d   : > { %8583 = vmatprep.mubr.msk.f32.mxu1 %vm9255_vm3, %v9254_v26  ;;  %8586 = vmatprep.subr.mxu0 %v9254_v26 }
 0x41e   : > { %8591 = vmatprep.subr.mxu1 %v9254_v26  ;;  %8579 = vmatmul.mubr.msk.f32.vlgmr.msra.gmra.mxu0 %vm923_vm4, %v1304_v4 }
 0x41f   : > { %8584 = vmatmul.mubr.msk.f32.vlgmr.msra.gmra.mxu1 %vm923_vm4, %v1610_v52  ;;  %8587 = vmatpush3.xpose.msk.msra.mxu0 %vm923_vm4, %v1690_v49 }
 0x420   : > { %8592 = vmatpush3.xpose.msk.msra.mxu1 %vm923_vm4, %v1768_v3  ;;  %8588 = vmatprep.mubr.msk.f32.mxu0 %vm9255_vm3, %v9254_v26 }
 0x421   : > { %8593 = vmatprep.mubr.msk.f32.mxu1 %vm9255_vm3, %v9254_v26  ;;  %8596 = vmatprep.subr.mxu0 %v9254_v26 }
 0x422   : > { %8589 = vmatmul.mubr.msk.f32.vlgmr.msra.gmra.mxu0 %vm923_vm4, %v1688_v51  ;;  %8601 = vmatprep.subr.mxu1 %v9254_v26 }
 0x423   : > { %8594 = vmatmul.mubr.msk.f32.vlgmr.msra.gmra.mxu1 %vm923_vm4, %v1766_v7  ;;  %8597 = vmatpush3.xpose.msk.msra.mxu0 %vm923_vm4, %v1846_v6 }
 0x424   : > { %8598 = vmatprep.mubr.msk.f32.mxu0 %vm9255_vm3, %v9254_v26  ;;  %8606 = vmatprep.subr.mxu0 %v9254_v26 }
 0x425   : > { %8603 = vmatprep.mubr.msk.f32.mxu1 %vm9255_vm3, %v9254_v26 }
 0x426   : > { %8599 = vmatmul.mubr.msk.f32.vlgmr.msra.gmra.mxu0 %vm923_vm4, %v1844_v8 }
 0x427   : > { %8608 = vmatprep.mubr.msk.f32.mxu0 %vm9255_vm3, %v9254_v26 }
 0x4d6   : > { %v9583_v9 = vpop.f32.mrf.mxu1 }
 0x4d8   : > { %v8565_v10 = vpop.f32.mrf.mxu1 }
 0x4da   : > { %v9585_v11 = vpop.f32.mrf.mxu0 }
 0x4db   : > { %v9587_v12 = vpop.f32.mrf.mxu1 }
 0x4dc   : > { %v8570_v13 = vpop.f32.mrf.mxu0 }
 0x4dd   : > { %v8575_v14 = vpop.f32.mrf.mxu1 }
 0x4de   : > { %v9589_v15 = vpop.f32.mrf.mxu0 }
 0x4df   : > { %v1683_v16 = vpop.f32.mrf.mxu1 }
 0x4e0   : > { %v1921_v19 = vmul.f32 0.35355338, %v1683_v16  ;;  %v8580_v20 = vpop.f32.mrf.mxu0 }
 0x4e1   : > { %v8585_v21 = vpop.f32.mrf.mxu1 }
 0x4e2   : > { %v1761_v22 = vpop.f32.mrf.mxu0  ;;  %v1925_v23 = vadd.f32 %v1921_v19, %v9503_v54 }
 0x4e3   : > { %v1922_v27 = vmul.f32 0.35355338, %v1761_v22  ;;  %v1839_v28 = vpop.f32.mrf.mxu1 }
 0x4e4   : > { %v1923_v29 = vmul.f32 0.35355338, %v1839_v28  ;;  %v1929_v31 = vsel %vm923_vm4, %v1925_v23, -inf  ;;  %v8590_v32 = vpop.f32.mrf.mxu0 }
 0x4e5   : > { %1930 = vmax.xlane.f32.xlu0 %v1929_v31  ;;  %v8595_v36 = vpop.f32.mrf.mxu1  ;;  %v1926_v37 = vadd.f32 %v1922_v27, %v9505_v59 }
 0x4e6   : > { %v1917_v38 = vpop.f32.mrf.mxu0  ;;  %v1927_v39 = vadd.f32 %v1923_v29, %v9507_v60 }
 0x4e7   : > { %v1924_v40 = vmul.f32 0.35355338, %v1917_v38  ;;  %v1932_v41 = vsel %vm923_vm4, %v1926_v37, -inf }
 0x4e8   : > { %1933 = vmax.xlane.f32.xlu1 %v1932_v41  ;;  %v8600_v42 = vpop.f32.mrf.mxu0  ;;  %v1935_v44 = vsel %vm923_vm4, %v1927_v39, -inf }
 0x4e9   : > { %1936 = vmax.xlane.f32.xlu0 %v1935_v44  ;;  %v1928_v45 = vadd.f32 %v1924_v40, %v9511_v5 }
 0x4eb   : > { %v1938_v46 = vsel %vm923_vm4, %v1928_v45, -inf }
 0x4ed   : > { %1939 = vmax.xlane.f32.xlu0 %v1938_v46 }
 0x4f9   : > { %1973 = vrot.lane.b32.xlu1 %v9450_v30, %s10592_s29 }
 0x4fd   : > { %2125 = vrot.lane.b32.xlu1 %v9456_v34, %s10592_s29 }
 0x501   : > { %2201 = vrot.lane.b32.xlu1 %v9462_v35, %s10592_s29 }
 0x503   : > { %2049 = vrot.lane.b32.xlu0 %v9454_v33, %s10592_s29  ;;  %s10618_s29 = smov 80  }
 0x505   : > { %2357 = vrot.lane.b32.xlu1 %v9454_v33, %s10590_s0 }
 0x507   : > { %2279 = vrot.lane.b32.xlu0 %v9450_v30, %s10590_s0 }
 0x509   : > { %2355 = vrot.lane.b32.xlu1 %v9454_v33, %s10588_s4 }
 0x50b   : > { %2277 = vrot.lane.b32.xlu0 %v9450_v30, %s10588_s4 }
 0x56e   : > { %v1931_v47 = vpop.xlane.xlu0 %1930 }
 0x56f   : > { %v1941_v48 = vsub.f32 %v1925_v23, %v1931_v47 }
 0x571   : > { %v1945_v49 = vmul.f32 1.442695, %v1941_v48  ;;  %v1934_v50 = vpop.xlane.xlu1 %1933 }
 0x572   : > { %v1942_v51 = vsub.f32 %v1926_v37, %v1934_v50  ;;  %v1937_v52 = vpop.xlane.xlu0 %1936 }
 0x573   : > { %9090 = vpow2.f32 %v1945_v49  ;;  %v1943_v53 = vsub.f32 %v1927_v39, %v1937_v52 }
 0x574   : > { %v1947_v55 = vmul.f32 1.442695, %v1942_v51 }
 0x575   : > { %v1949_v56 = vmul.f32 1.442695, %v1943_v53  ;;  %v1974_v57 = vpop.permute.xlu1 %1973 }
 0x576   : > { %9092 = vpow2.f32 %v1947_v55  ;;  %v1940_v58 = vpop.xlane.xlu0 %1939  ;;  %8602 = vmatpush3.msra.mxu1 %v1974_v57 }
 0x577   : > { %9094 = vpow2.f32 %v1949_v56  ;;  %v1944_v61 = vsub.f32 %v1928_v45, %v1940_v58  ;;  %8611 = vmatprep.subr.mxu1 %v9254_v26 }
 0x579   : > { %v1951_v62 = vmul.f32 1.442695, %v1944_v61  ;;  %v2126_v10 = vpop.permute.xlu1 %2125 }
 0x57a   : > { %v2050_v63 = vpop.permute.xlu0 %2049 }
 0x57b   : > { %9096 = vpow2.f32 %v1951_v62  ;;  %8607 = vmatpush3.msra.mxu0 %v2050_v63 }
 0x57c   : > { %8616 = vmatprep.subr.mxu0 %v9254_v26 }
 0x57d   : > { %v2202_v13 = vpop.permute.xlu1 %2201 }
 0x57e   : > { %v2280_v16 = vpop.permute.xlu0 %2279 }
 0x580   : > { %v9091_v0 = vpop.eup %9090 }
 0x581   : > { %v1953_v1 = vsel %vm923_vm4, %v9091_v0, 0.0  ;;  %v2358_v14 = vpop.permute.xlu1 %2357 }
 0x582   : > { %1954 = vadd.xlane.f32.xlu1 %v1953_v1  ;;  %v2278_v20 = vpop.permute.xlu0 %2277 }
 0x583   : > { %v9093_v2 = vpop.eup %9092 }
 0x584   : > { %v9095_v3 = vpop.eup %9094  ;;  %v1956_v4 = vsel %vm923_vm4, %v9093_v2, 0.0 }
 0x585   : > { %1957 = vadd.xlane.f32.xlu0 %v1956_v4  ;;  %v1959_v6 = vsel %vm923_vm4, %v9095_v3, 0.0  ;;  %v2356_v19 = vpop.permute.xlu1 %2355 }
 0x586   : > { %1960 = vadd.xlane.f32.xlu1 %v1959_v6 }
 0x588   : > { %v9097_v7 = vpop.eup %9096 }
 0x589   : > { %v1962_v8 = vsel %vm923_vm4, %v9097_v7, 0.0 }
 0x58a   : > { %1963 = vadd.xlane.f32.xlu0 %v1962_v8 }
 0x597   : > { %2513 = vrot.lane.b32.xlu1 %v9462_v35, %s10590_s0 }
 0x59b   : > { %2511 = vrot.lane.b32.xlu1 %v9462_v35, %s10588_s4 }
 0x5a0   : > { %2435 = vrot.lane.b32.xlu0 %v9456_v34, %s10590_s0  ;;  %s10619_s0 = smov 112  }
 0x5a4   : > { %2433 = vrot.lane.b32.xlu0 %v9456_v34, %s10588_s4  ;;  %s10620_s4 = smov 48  }
 0x60b   : > { %v1955_v21 = vpop.xlane.xlu1 %1954 }
 0x60c   : > { %9098 = vrcp.f32 %v1955_v21 }
 0x60e   : > { %v1958_v22 = vpop.xlane.xlu0 %1957 }
 0x60f   : > { %v1961_v23 = vpop.xlane.xlu1 %1960  ;;  %9100 = vrcp.f32 %v1958_v22 }
 0x610   : > { %9102 = vrcp.f32 %v1961_v23 }
 0x613   : > { %v1964_v27 = vpop.xlane.xlu0 %1963  ;;  %v2514_v41 = vpop.permute.xlu1 %2513 }
 0x614   : > { %9104 = vrcp.f32 %v1964_v27 }
 0x617   : > { %v2436_v39 = vpop.permute.xlu0 %2435  ;;  %v2512_v44 = vpop.permute.xlu1 %2511 }
 0x619   : > { %v9099_v28 = vpop.eup %9098 }
 0x61a   : > { %v1969_v29 = vmul.f32 %v9099_v28, %v9091_v0 }
 0x61b   : > { %v2434_v42 = vpop.permute.xlu0 %2433 }
 0x61c   : > { %v9101_v31 = vpop.eup %9100  ;;  %8604 = vmatmul.mubr.msk.f32.vlgmr.msra.gmra.mxu1 %vm923_vm4, %v1969_v29 }
 0x61d   : > { %v9103_v32 = vpop.eup %9102  ;;  %8612 = vmatpush3.msra.mxu1 %v2126_v10  ;;  %8613 = vmatprep.mubr.msk.f32.mxu1 %vm9255_vm3, %v9254_v26  ;;  %v1970_v36 = vmul.f32 %v9101_v31, %v9093_v2 }
 0x61e   : > { %8621 = vmatprep.subr.mxu1 %v9254_v26  ;;  %v1971_v37 = vmul.f32 %v9103_v32, %v9095_v3 }
 0x61f   : > { %8609 = vmatmul.mubr.msk.f32.vlgmr.msra.gmra.mxu0 %vm923_vm4, %v1970_v36 }
 0x620   : > { %8614 = vmatmul.mubr.msk.f32.vlgmr.msra.gmra.mxu1 %vm923_vm4, %v1971_v37  ;;  %8617 = vmatpush3.msra.mxu0 %v2202_v13 }
 0x621   : > { %v9105_v38 = vpop.eup %9104  ;;  %8622 = vmatpush3.xpose.msk.msra.mxu1 %vm923_vm4, %v2280_v16  ;;  %8618 = vmatprep.mubr.msk.f32.mxu0 %vm9255_vm3, %v9254_v26 }
 0x622   : > { %8623 = vmatprep.mubr.msk.f32.mxu1 %vm9255_vm3, %v9254_v26  ;;  %8626 = vmatprep.subr.mxu0 %v9254_v26  ;;  %v1972_v40 = vmul.f32 %v9105_v38, %v9097_v7 }
 0x623   : > { %8631 = vmatprep.subr.mxu1 %v9254_v26 }
 0x624   : > { %8619 = vmatmul.mubr.msk.f32.vlgmr.msra.gmra.mxu0 %vm923_vm4, %v1972_v40  ;;  %8624 = vmatmul.mubr.msk.f32.vlgmr.msra.gmra.mxu1 %vm923_vm4, %v2278_v20 }
 0x625   : > { %8627 = vmatpush3.xpose.msk.msra.mxu0 %vm923_vm4, %v2358_v14  ;;  %8632 = vmatpush3.xpose.msk.msra.mxu1 %vm923_vm4, %v2436_v39 }
 0x626   : > { %8628 = vmatprep.mubr.msk.f32.mxu0 %vm9255_vm3, %v9254_v26  ;;  %8633 = vmatprep.mubr.msk.f32.mxu1 %vm9255_vm3, %v9254_v26 }
 0x627   : > { %8636 = vmatprep.subr.mxu0 %v9254_v26  ;;  %8641 = vmatprep.subr.mxu1 %v9254_v26 }
 0x628   : > { %8629 = vmatmul.mubr.msk.f32.vlgmr.msra.gmra.mxu0 %vm923_vm4, %v2356_v19  ;;  %8634 = vmatmul.mubr.msk.f32.vlgmr.msra.gmra.mxu1 %vm923_vm4, %v2434_v42 }
 0x629   : > { %8637 = vmatpush3.xpose.msk.msra.mxu0 %vm923_vm4, %v2514_v41  ;;  %8638 = vmatprep.mubr.msk.f32.mxu0 %vm9255_vm3, %v9254_v26 }
 0x62a   : > { %8646 = vmatprep.subr.mxu0 %v9254_v26  ;;  %8643 = vmatprep.mubr.msk.f32.mxu1 %vm9255_vm3, %v9254_v26 }
 0x62c   : > { %8639 = vmatmul.mubr.msk.f32.vlgmr.msra.gmra.mxu0 %vm923_vm4, %v2512_v44 }
 0x62d   : > { %8648 = vmatprep.mubr.msk.f32.mxu0 %vm9255_vm3, %v9254_v26 }
 0x6dc   : > { %v9663_v45 = vpop.f32.mrf.mxu1 }
 0x6de   : > { %v8605_v46 = vpop.f32.mrf.mxu1 }
 0x6df   : > { %v9665_v47 = vpop.f32.mrf.mxu0 }
 0x6e0   : > { %v9667_v48 = vpop.f32.mrf.mxu1 }
 0x6e1   : > { %v8610_v49 = vpop.f32.mrf.mxu0 }
 0x6e2   : > { %v8615_v50 = vpop.f32.mrf.mxu1 }
 0x6e4   : > { %v9669_v51 = vpop.f32.mrf.mxu0  ;;  %v2351_v52 = vpop.f32.mrf.mxu1 }
 0x6e5   : > { %v2589_v53 = vmul.f32 0.35355338, %v2351_v52 }
 0x6e6   : > { %v8620_v55 = vpop.f32.mrf.mxu0  ;;  %v8625_v56 = vpop.f32.mrf.mxu1 }
 0x6e7   : > { %v2593_v57 = vadd.f32 %v2589_v53, %v9503_v54 }
 0x6e8   : > { %v2429_v58 = vpop.f32.mrf.mxu0  ;;  %v2507_v61 = vpop.f32.mrf.mxu1 }
 0x6e9   : > { %v2590_v62 = vmul.f32 0.35355338, %v2429_v58  ;;  %v2591_v63 = vmul.f32 0.35355338, %v2507_v61  ;;  %v2597_v0 = vsel %vm923_vm4, %v2593_v57, -inf }
 0x6ea   : > { %2598 = vmax.xlane.f32.xlu0 %v2597_v0  ;;  %v8630_v1 = vpop.f32.mrf.mxu0  ;;  %v8635_v2 = vpop.f32.mrf.mxu1 }
 0x6eb   : > { %v2594_v3 = vadd.f32 %v2590_v62, %v9505_v59  ;;  %v2595_v4 = vadd.f32 %v2591_v63, %v9507_v60 }
 0x6ec   : > { %v2585_v6 = vpop.f32.mrf.mxu0 }
 0x6ed   : > { %v2592_v7 = vmul.f32 0.35355338, %v2585_v6  ;;  %v2600_v8 = vsel %vm923_vm4, %v2594_v3, -inf  ;;  %v2603_v10 = vsel %vm923_vm4, %v2595_v4, -inf }
 0x6ee   : > { %2601 = vmax.xlane.f32.xlu1 %v2600_v8  ;;  %v8640_v13 = vpop.f32.mrf.mxu0  ;;  %2604 = vmax.xlane.f32.xlu0 %v2603_v10 }
 0x6ef   : > { %v2596_v14 = vadd.f32 %v2592_v7, %v9511_v5 }
 0x6f1   : > { %v2606_v16 = vsel %vm923_vm4, %v2596_v14, -inf }
 0x6f2   : > { %2607 = vmax.xlane.f32.xlu0 %v2606_v16 }
 0x6ff   : > { %2641 = vrot.lane.b32.xlu1 %v9450_v30, %s10582_s5 }
 0x703   : > { %2793 = vrot.lane.b32.xlu1 %v9456_v34, %s10582_s5 }
 0x707   : > { %2869 = vrot.lane.b32.xlu1 %v9462_v35, %s10582_s5 }
 0x708   : > { %2717 = vrot.lane.b32.xlu0 %v9454_v33, %s10582_s5  ;;  %s9268_s5 = smov 16  }
 0x70b   : > { %3025 = vrot.lane.b32.xlu1 %v9454_v33, %s10580_s22 }
 0x70c   : > { %2947 = vrot.lane.b32.xlu0 %v9450_v30, %s10580_s22 }
 0x773   : > { %v2599_v19 = vpop.xlane.xlu0 %2598 }
 0x774   : > { %v2609_v20 = vsub.f32 %v2593_v57, %v2599_v19 }
 0x776   : > { %v2613_v21 = vmul.f32 1.442695, %v2609_v20 }
 0x777   : > { %v2602_v22 = vpop.xlane.xlu1 %2601  ;;  %v2605_v23 = vpop.xlane.xlu0 %2604 }
 0x778   : > { %9106 = vpow2.f32 %v2613_v21  ;;  %v2610_v27 = vsub.f32 %v2594_v3, %v2602_v22  ;;  %v2611_v28 = vsub.f32 %v2595_v4, %v2605_v23 }
 0x77a   : > { %v2615_v29 = vmul.f32 1.442695, %v2610_v27  ;;  %v2617_v31 = vmul.f32 1.442695, %v2611_v28 }
 0x77b   : > { %v2642_v32 = vpop.permute.xlu1 %2641  ;;  %v2608_v36 = vpop.xlane.xlu0 %2607 }
 0x77c   : > { %9108 = vpow2.f32 %v2615_v29  ;;  %v2612_v37 = vsub.f32 %v2596_v14, %v2608_v36  ;;  %8642 = vmatpush3.msra.mxu1 %v2642_v32 }
 0x77d   : > { %9110 = vpow2.f32 %v2617_v31  ;;  %8651 = vmatprep.subr.mxu1 %v9254_v26 }
 0x77e   : > { %v2619_v38 = vmul.f32 1.442695, %v2612_v37 }
 0x77f   : > { %v2718_v39 = vpop.permute.xlu0 %2717  ;;  %v2794_v53 = vpop.permute.xlu1 %2793 }
 0x780   : > { %9112 = vpow2.f32 %v2619_v38  ;;  %8647 = vmatpush3.msra.mxu0 %v2718_v39 }
 0x781   : > { %8656 = vmatprep.subr.mxu0 %v9254_v26 }
 0x783   : > { %v2870_v55 = vpop.permute.xlu1 %2869  ;;  %v2948_v57 = vpop.permute.xlu0 %2947 }
 0x785   : > { %v9107_v40 = vpop.eup %9106 }
 0x786   : > { %v2621_v41 = vsel %vm923_vm4, %v9107_v40, 0.0 }
 0x787   : > { %2622 = vadd.xlane.f32.xlu1 %v2621_v41  ;;  %v3026_v56 = vpop.permute.xlu1 %3025 }
 0x789   : > { %v9109_v42 = vpop.eup %9108 }
 0x78a   : > { %v9111_v44 = vpop.eup %9110  ;;  %v2624_v46 = vsel %vm923_vm4, %v9109_v42, 0.0 }
 0x78b   : > { %2625 = vadd.xlane.f32.xlu0 %v2624_v46  ;;  %v2627_v49 = vsel %vm923_vm4, %v9111_v44, 0.0 }
 0x78c   : > { %2628 = vadd.xlane.f32.xlu1 %v2627_v49 }
 0x78d   : > { %v9113_v50 = vpop.eup %9112 }
 0x78e   : > { %v2630_v52 = vsel %vm923_vm4, %v9113_v50, 0.0 }
 0x78f   : > { %2631 = vadd.xlane.f32.xlu0 %v2630_v52 }
 0x79d   : > { %3023 = vrot.lane.b32.xlu1 %v9454_v33, %s10578_s24 }
 0x7a1   : > { %3181 = vrot.lane.b32.xlu1 %v9462_v35, %s10580_s22 }
 0x7a5   : > { %3179 = vrot.lane.b32.xlu1 %v9462_v35, %s10578_s24  ;;  %2945 = vrot.lane.b32.xlu0 %v9450_v30, %s10578_s24 }
 0x7a9   : > { %3103 = vrot.lane.b32.xlu0 %v9456_v34, %s10580_s22  ;;  %s10584_s22 = smov 8  }
 0x7ad   : > { %3101 = vrot.lane.b32.xlu0 %v9456_v34, %s10578_s24  ;;  %s10586_s24 = smov 40  }
 0x810   : > { %v2623_v58 = vpop.xlane.xlu1 %2622 }
 0x811   : > { %9114 = vrcp.f32 %v2623_v58 }
 0x814   : > { %v2626_v61 = vpop.xlane.xlu0 %2625 }
 0x815   : > { %v2629_v62 = vpop.xlane.xlu1 %2628  ;;  %9116 = vrcp.f32 %v2626_v61 }
 0x816   : > { %9118 = vrcp.f32 %v2629_v62 }
 0x818   : > { %v2632_v63 = vpop.xlane.xlu0 %2631 }
 0x819   : > { %9120 = vrcp.f32 %v2632_v63  ;;  %v3024_v7 = vpop.permute.xlu1 %3023 }
 0x81c   : > { %v2946_v2 = vpop.permute.xlu0 %2945 }
 0x81d   : > { %v3182_v16 = vpop.permute.xlu1 %3181 }
 0x81e   : > { %v9115_v0 = vpop.eup %9114 }
 0x81f   : > { %v2637_v1 = vmul.f32 %v9115_v0, %v9107_v40 }
 0x820   : > { %v3104_v13 = vpop.permute.xlu0 %3103 }
 0x821   : > { %8644 = vmatmul.mubr.msk.f32.vlgmr.msra.gmra.mxu1 %vm923_vm4, %v2637_v1  ;;  %v3180_v20 = vpop.permute.xlu1 %3179 }
 0x822   : > { %v9117_v3 = vpop.eup %9116  ;;  %8652 = vmatpush3.msra.mxu1 %v2794_v53  ;;  %8653 = vmatprep.mubr.msk.f32.mxu1 %vm9255_vm3, %v9254_v26 }
 0x823   : > { %v9119_v4 = vpop.eup %9118  ;;  %8661 = vmatprep.subr.mxu1 %v9254_v26  ;;  %v2638_v6 = vmul.f32 %v9117_v3, %v9109_v42 }
 0x824   : > { %v2639_v8 = vmul.f32 %v9119_v4, %v9111_v44  ;;  %v3102_v19 = vpop.permute.xlu0 %3101 }
 0x825   : > { %8649 = vmatmul.mubr.msk.f32.vlgmr.msra.gmra.mxu0 %vm923_vm4, %v2638_v6 }
 0x826   : > { %v9121_v10 = vpop.eup %9120  ;;  %8654 = vmatmul.mubr.msk.f32.vlgmr.msra.gmra.mxu1 %vm923_vm4, %v2639_v8  ;;  %8657 = vmatpush3.msra.mxu0 %v2870_v55 }
 0x827   : > { %8662 = vmatpush3.xpose.msk.msra.mxu1 %vm923_vm4, %v2948_v57  ;;  %8658 = vmatprep.mubr.msk.f32.mxu0 %vm9255_vm3, %v9254_v26  ;;  %v2640_v14 = vmul.f32 %v9121_v10, %v9113_v50 }
 0x828   : > { %8663 = vmatprep.mubr.msk.f32.mxu1 %vm9255_vm3, %v9254_v26  ;;  %8666 = vmatprep.subr.mxu0 %v9254_v26 }
 0x829   : > { %8671 = vmatprep.subr.mxu1 %v9254_v26  ;;  %8659 = vmatmul.mubr.msk.f32.vlgmr.msra.gmra.mxu0 %vm923_vm4, %v2640_v14 }
 0x82a   : > { %8664 = vmatmul.mubr.msk.f32.vlgmr.msra.gmra.mxu1 %vm923_vm4, %v2946_v2  ;;  %8667 = vmatpush3.xpose.msk.msra.mxu0 %vm923_vm4, %v3026_v56 }
 0x82b   : > { %8672 = vmatpush3.xpose.msk.msra.mxu1 %vm923_vm4, %v3104_v13  ;;  %8668 = vmatprep.mubr.msk.f32.mxu0 %vm9255_vm3, %v9254_v26 }
 0x82c   : > { %8673 = vmatprep.mubr.msk.f32.mxu1 %vm9255_vm3, %v9254_v26  ;;  %8676 = vmatprep.subr.mxu0 %v9254_v26 }
 0x82d   : > { %8669 = vmatmul.mubr.msk.f32.vlgmr.msra.gmra.mxu0 %vm923_vm4, %v3024_v7  ;;  %8681 = vmatprep.subr.mxu1 %v9254_v26 }
 0x82e   : > { %8674 = vmatmul.mubr.msk.f32.vlgmr.msra.gmra.mxu1 %vm923_vm4, %v3102_v19  ;;  %8677 = vmatpush3.xpose.msk.msra.mxu0 %vm923_vm4, %v3182_v16 }
 0x82f   : > { %8678 = vmatprep.mubr.msk.f32.mxu0 %vm9255_vm3, %v9254_v26  ;;  %8686 = vmatprep.subr.mxu0 %v9254_v26 }
 0x830   : > { %8683 = vmatprep.mubr.msk.f32.mxu1 %vm9255_vm3, %v9254_v26 }
 0x831   : > { %8679 = vmatmul.mubr.msk.f32.vlgmr.msra.gmra.mxu0 %vm923_vm4, %v3180_v20 }
 0x832   : > { %8688 = vmatprep.mubr.msk.f32.mxu0 %vm9255_vm3, %v9254_v26 }
 0x8e1   : > { %v9743_v21 = vpop.f32.mrf.mxu1 }
 0x8e3   : > { %v8645_v22 = vpop.f32.mrf.mxu1 }
 0x8e5   : > { %v9745_v23 = vpop.f32.mrf.mxu0 }
 0x8e6   : > { %v9747_v27 = vpop.f32.mrf.mxu1 }
 0x8e7   : > { %v8650_v28 = vpop.f32.mrf.mxu0 }
 0x8e8   : > { %v8655_v29 = vpop.f32.mrf.mxu1 }
 0x8e9   : > { %v9749_v31 = vpop.f32.mrf.mxu0 }
 0x8ea   : > { %v3019_v32 = vpop.f32.mrf.mxu1 }
 0x8eb   : > { %v3257_v36 = vmul.f32 0.35355338, %v3019_v32  ;;  %v8660_v37 = vpop.f32.mrf.mxu0 }
 0x8ec   : > { %v8665_v38 = vpop.f32.mrf.mxu1 }
 0x8ed   : > { %v3097_v39 = vpop.f32.mrf.mxu0  ;;  %v3261_v40 = vadd.f32 %v3257_v36, %v9503_v54 }
 0x8ee   : > { %v3258_v41 = vmul.f32 0.35355338, %v3097_v39  ;;  %v3175_v42 = vpop.f32.mrf.mxu1 }
 0x8ef   : > { %v3259_v44 = vmul.f32 0.35355338, %v3175_v42  ;;  %v8670_v46 = vpop.f32.mrf.mxu0  ;;  %v3265_v49 = vsel %vm923_vm4, %v3261_v40, -inf }
 0x8f0   : > { %3266 = vmax.xlane.f32.xlu0 %v3265_v49  ;;  %v8675_v50 = vpop.f32.mrf.mxu1  ;;  %v3262_v52 = vadd.f32 %v3258_v41, %v9505_v59  ;;  %v3678_v46 = vld [vmem:[%s10561_s7 + $0x18] sm:$0xff]  ;;  %v3677_v49 = vld [vmem:[%s10561_s7 + $0x10] sm:$0xff] }
 0x8f1   : > { %v3253_v53 = vpop.f32.mrf.mxu0  ;;  %v3263_v55 = vadd.f32 %v3259_v44, %v9507_v60  ;;  %v3676_v50 = vld [vmem:[%s10561_s7 + $0x8] sm:$0xff] }
 0x8f2   : > { %v3260_v56 = vmul.f32 0.35355338, %v3253_v53  ;;  %v3268_v57 = vsel %vm923_vm4, %v3262_v52, -inf }
 0x8f3   : > { %3269 = vmax.xlane.f32.xlu1 %v3268_v57  ;;  %v8680_v58 = vpop.f32.mrf.mxu0  ;;  %v3271_v61 = vsel %vm923_vm4, %v3263_v55, -inf }
 0x8f4   : > { %3272 = vmax.xlane.f32.xlu0 %v3271_v61  ;;  %v3264_v62 = vadd.f32 %v3260_v56, %v9511_v5 }
 0x8f6   : > { %v3274_v63 = vsel %vm923_vm4, %v3264_v62, -inf }
 0x8f8   : > { %3275 = vmax.xlane.f32.xlu0 %v3274_v63 }
 0x904   : > { %3309 = vrot.lane.b32.xlu1 %v9450_v30, %s10586_s24 }
 0x979   : > { %v3267_v0 = vpop.xlane.xlu0 %3266 }
 0x97a   : > { %v3277_v1 = vsub.f32 %v3261_v40, %v3267_v0 }
 0x97c   : > { %v3281_v2 = vmul.f32 1.442695, %v3277_v1  ;;  %v3270_v3 = vpop.xlane.xlu1 %3269 }
 0x97d   : > { %v3278_v4 = vsub.f32 %v3262_v52, %v3270_v3  ;;  %v3273_v6 = vpop.xlane.xlu0 %3272  ;;  %v3675_v52 = vld [vmem:[%s10561_s7] sm:$0xff] }
 0x97e   : > { %9122 = vpow2.f32 %v3281_v2  ;;  %v3279_v7 = vsub.f32 %v3263_v55, %v3273_v6 }
 0x97f   : > { %v3283_v8 = vmul.f32 1.442695, %v3278_v4 }
 0x980   : > { %v3285_v10 = vmul.f32 1.442695, %v3279_v7  ;;  %v3310_v13 = vpop.permute.xlu1 %3309 }
 0x981   : > { %9124 = vpow2.f32 %v3283_v8  ;;  %v3276_v14 = vpop.xlane.xlu0 %3275  ;;  %8682 = vmatpush3.msra.mxu1 %v3310_v13 }
 0x982   : > { %9126 = vpow2.f32 %v3285_v10  ;;  %v3280_v16 = vsub.f32 %v3264_v62, %v3276_v14  ;;  %8691 = vmatprep.subr.mxu1 %v9254_v26 }
 0x984   : > { %v3287_v19 = vmul.f32 1.442695, %v3280_v16 }
 0x986   : > { %9128 = vpow2.f32 %v3287_v19 }
 0x98b   : > { %v9123_v30 = vpop.eup %9122 }
 0x98c   : > { %v3289_v20 = vsel %vm923_vm4, %v9123_v30, 0.0 }
 0x98d   : > { %3290 = vadd.xlane.f32.xlu1 %v3289_v20 }
 0x98e   : > { %v9125_v22 = vpop.eup %9124 }
 0x98f   : > { %v9127_v28 = vpop.eup %9126  ;;  %v3292_v29 = vsel %vm923_vm4, %v9125_v22, 0.0 }
 0x990   : > { %3293 = vadd.xlane.f32.xlu0 %v3292_v29  ;;  %v3295_v32 = vsel %vm923_vm4, %v9127_v28, 0.0 }
 0x991   : > { %3296 = vadd.xlane.f32.xlu1 %v3295_v32 }
 0x993   : > { %v9129_v36 = vpop.eup %9128 }
 0x994   : > { %v3298_v37 = vsel %vm923_vm4, %v9129_v36, 0.0 }
 0x995   : > { %3299 = vadd.xlane.f32.xlu0 %v3298_v37 }
 0x9a2   : > { %3461 = vrot.lane.b32.xlu1 %v9456_v34, %s10586_s24 }
 0x9a6   : > { %3537 = vrot.lane.b32.xlu1 %v9462_v35, %s10586_s24 }
 0x9aa   : > { %3619 = vrot.lane.b32.xlu1 %v9665_v47, %s10584_s22 }
 0x9ab   : > { %3385 = vrot.lane.b32.xlu0 %v9454_v33, %s10586_s24  ;;  %s10621_s24 = smov 72  }
 0x9ae   : > { %3635 = vrot.lane.b32.xlu1 %v9745_v23, %s9268_s5 }
 0x9af   : > { %3617 = vrot.lane.b32.xlu0 %v9663_v45, %s10584_s22 }
 0x9b2   : > { %3623 = vrot.lane.b32.xlu1 %v9669_v51, %s10584_s22 }
 0x9b3   : > { %3633 = vrot.lane.b32.xlu0 %v9743_v21, %s9268_s5 }
 0x9b7   : > { %3621 = vrot.lane.b32.xlu0 %v9667_v48, %s10584_s22  ;;  %s10600_s22 = smov 24  }
 0xa16   : > { %v3291_v34 = vpop.xlane.xlu1 %3290 }
 0xa17   : > { %9130 = vrcp.f32 %v3291_v34 }
 0xa19   : > { %v3294_v35 = vpop.xlane.xlu0 %3293 }
 0xa1a   : > { %v3297_v33 = vpop.xlane.xlu1 %3296  ;;  %9132 = vrcp.f32 %v3294_v35 }
 0xa1b   : > { %9134 = vrcp.f32 %v3297_v33 }
 0xa1e   : > { %v3300_v47 = vpop.xlane.xlu0 %3299  ;;  %v3462_v38 = vpop.permute.xlu1 %3461 }
 0xa1f   : > { %9136 = vrcp.f32 %v3300_v47 }
 0xa22   : > { %v3386_v23 = vpop.permute.xlu0 %3385  ;;  %v3538_v41 = vpop.permute.xlu1 %3537 }
 0xa23   : > { %8687 = vmatpush3.msra.mxu0 %v3386_v23 }
 0xa24   : > { %v9131_v45 = vpop.eup %9130  ;;  %8696 = vmatprep.subr.mxu0 %v9254_v26 }
 0xa25   : > { %v3305_v51 = vmul.f32 %v9131_v45, %v9123_v30 }
 0xa26   : > { %v3618_v0 = vpop.permute.xlu0 %3617  ;;  %v3620_v1 = vpop.permute.xlu1 %3619 }
 0xa27   : > { %v9133_v39 = vpop.eup %9132  ;;  %8684 = vmatmul.mubr.msk.f32.vlgmr.msra.gmra.mxu1 %vm923_vm4, %v3305_v51  ;;  %v3662_v10 = vsel %vm923_vm4, %v9585_v11, %v3620_v1 }
 0xa28   : > { %v9135_v21 = vpop.eup %9134  ;;  %8692 = vmatpush3.msra.mxu1 %v3462_v38  ;;  %8693 = vmatprep.mubr.msk.f32.mxu1 %vm9255_vm3, %v9254_v26  ;;  %v3306_v48 = vmul.f32 %v9133_v39, %v9125_v22 }
 0xa29   : > { %v3307_v40 = vmul.f32 %v9135_v21, %v9127_v28  ;;  %8701 = vmatprep.subr.mxu1 %v3678_v46 }
 0xa2a   : > { %8689 = vmatmul.mubr.msk.f32.vlgmr.msra.gmra.mxu0 %vm923_vm4, %v3306_v48  ;;  %v3634_v2 = vpop.permute.xlu0 %3633  ;;  %v3636_v3 = vpop.permute.xlu1 %3635 }
 0xa2b   : > { %8694 = vmatmul.mubr.msk.f32.vlgmr.msra.gmra.mxu1 %vm923_vm4, %v3307_v40  ;;  %8697 = vmatpush3.msra.mxu0 %v3538_v41  ;;  %v3667_v13 = vsel %vm3665_vm5, %v3662_v10, %v3636_v3  ;;  %v3865_v3 = vld [vmem:[%s10565_s11 + $0x18] sm:$0xff]  ;;  %v3986_v10 = vld [vmem:[%s10567_s13 + $0x60] sm:$0xff] }
 0xa2c   : > { %v9137_v42 = vpop.eup %9136  ;;  %8698 = vmatprep.mubr.msk.f32.mxu0 %vm9255_vm3, %v9254_v26  ;;  %8702 = vmatpush3.msra.mxu1 %v3678_v46 }
 0xa2d   : > { %v3308_v44 = vmul.f32 %v9137_v42, %v9129_v36  ;;  %8703 = vmatprep.subr.mxu1 %v3677_v49  ;;  %8715 = vmatprep.subr.mxu0 %v3865_v3 }
 0xa2e   : > { %8704 = vmatpush3.msra.mxu1 %v3677_v49  ;;  %v3622_v4 = vpop.permute.xlu0 %3621  ;;  %v3624_v6 = vpop.permute.xlu1 %3623 }
 0xa2f   : > { %8699 = vmatmul.mubr.msk.f32.vlgmr.msra.gmra.mxu0 %vm923_vm4, %v3308_v44  ;;  %8705 = vmatprep.subr.mxu1 %v3676_v50  ;;  %v3664_v11 = vsel %vm923_vm4, %v9589_v15, %v3624_v6  ;;  %v3862_v6 = vld [vmem:[%s10565_s11] sm:$0xff] }
 0xa30   : > { %8706 = vmatpush3.msra.mxu1 %v3676_v50  ;;  %8716 = vmatpush3.msra.mxu0 %v3865_v3 }
 0xa31   : > { %8707 = vmatprep.subr.mxu1 %v3675_v52 }
 0xa32   : > { %8708 = vmatpush3.msra.mxu1 %v3675_v52 }
 0xae7   : > { %v3381_v53 = vpop.f32.mrf.mxu1 }
 0xae8   : > { %3649 = vrot.lane.b32.xlu0 %v3381_v53, %s10600_s22 }
 0xae9   : > { %v8685_v55 = vpop.f32.mrf.mxu1 }
 0xaea   : > { %v3457_v56 = vpop.f32.mrf.mxu0 }
 0xaeb   : > { %v3533_v57 = vpop.f32.mrf.mxu1  ;;  %3651 = vrot.lane.b32.xlu1 %v3457_v56, %s10600_s22 }
 0xaec   : > { %3637 = vrot.lane.b32.xlu0 %v9747_v27, %s9268_s5  ;;  %v8690_v58 = vpop.f32.mrf.mxu0  ;;  %v3661_v27 = vsel %vm923_vm4, %v9583_v9, %v3618_v0  ;;  %v3663_v9 = vsel %vm923_vm4, %v9587_v12, %v3622_v4  ;;  %v8151_v12 = vld [vmem:[%s10562_s8] ss:$0 sm:$0xff]  ;;  %v3864_v4 = vld [vmem:[%s10565_s11 + $0x10] sm:$0xff] }
 0xaed   : > { %v8695_v61 = vpop.f32.mrf.mxu1  ;;  %v3666_v7 = vsel %vm3665_vm5, %v3661_v27, %v3634_v2  ;;  %v3863_v27 = vld [vmem:[%s10565_s11 + $0x8] sm:$0xff]  ;;  %8717 = vmatprep.subr.mxu0 %v3864_v4 }
 0xaee   : > { %8718 = vmatpush3.msra.mxu0 %v3864_v4 }
 0xaef   : > { %v3609_v62 = vpop.f32.mrf.mxu0  ;;  %3639 = vrot.lane.b32.xlu1 %v9749_v31, %s9268_s5  ;;  %8719 = vmatprep.subr.mxu0 %v3863_v27 }
 0xaf0   : > { %3653 = vrot.lane.b32.xlu0 %v3533_v57, %s10600_s22  ;;  %8720 = vmatpush3.msra.mxu0 %v3863_v27 }
 0xaf1   : > { %v8700_v63 = vpop.f32.mrf.mxu0  ;;  %8721 = vmatprep.subr.mxu0 %v3862_v6 }
 0xaf2   : > { %8722 = vmatpush3.msra.mxu0 %v3862_v6 }
 0xaf3   : > { %3655 = vrot.lane.b32.xlu1 %v3609_v62, %s10600_s22  ;;  %s10615_s22 = smov 88  }
 0xb5a   : > { %v3650_v8 = vpop.permute.xlu0 %3649 }
 0xb5b   : > { %v3671_v31 = vsel %vm3670_vm6, %v3666_v7, %v3650_v8  ;;  %v3989_v7 = vld [vmem:[%s10567_s13 + $0x78] sm:$0xff]  ;;  %v3988_v8 = vld [vmem:[%s10567_s13 + $0x70] sm:$0xff] }
 0xb5c   : > { %8709 = vmatprep.mubr.msk.f32.mxu1 %vm822_vm2, %v3671_v31  ;;  %8729 = vmatprep.subr.mxu1 %v3989_v7  ;;  %v3987_v31 = vld [vmem:[%s10567_s13 + $0x68] sm:$0xff] }
 0xb5d   : > { %v3652_v14 = vpop.permute.xlu1 %3651 }
 0xb5e   : > { %v3672_v16 = vsel %vm3670_vm6, %v3667_v13, %v3652_v14  ;;  %v3638_v19 = vpop.permute.xlu0 %3637  ;;  %v3985_v13 = vld [vmem:[%s10567_s13 + $0x58] sm:$0xff]  ;;  %v3984_v14 = vld [vmem:[%s10567_s13 + $0x50] sm:$0xff] }
 0xb5f   : > { %8710 = vmatmul.mubr.msk.f32.vlgmr.msra.gmra.mxu1 %vm822_vm2, %v3672_v16  ;;  %v3668_v20 = vsel %vm3665_vm5, %v3663_v9, %v3638_v19  ;;  %v3983_v16 = vld [vmem:[%s10567_s13 + $0x48] sm:$0xff]  ;;  %v3982_v19 = vld [vmem:[%s10567_s13 + $0x40] sm:$0xff]  ;;  %v3981_v9 = vld [vmem:[%s10567_s13 + $0x38] sm:$0xff] }
 0xb60   : > { %8730 = vmatpush3.msra.mxu1 %v3989_v7 }
 0xb61   : > { %v3640_v30 = vpop.permute.xlu1 %3639  ;;  %8731 = vmatprep.subr.mxu1 %v3988_v8 }
 0xb62   : > { %v3654_v22 = vpop.permute.xlu0 %3653  ;;  %v3669_v29 = vsel %vm3665_vm5, %v3664_v11, %v3640_v30  ;;  %8732 = vmatpush3.msra.mxu1 %v3988_v8  ;;  %v3980_v30 = vld [vmem:[%s10567_s13 + $0x30] sm:$0xff]  ;;  %v8163_v8 = vld [vmem:[%s10568_s14] ss:$0 sm:$0xff] }
 0xb63   : > { %v3673_v28 = vsel %vm3670_vm6, %v3668_v20, %v3654_v22  ;;  %8733 = vmatprep.subr.mxu1 %v3987_v31  ;;  %v3979_v20 = vld [vmem:[%s10567_s13 + $0x28] sm:$0xff]  ;;  %v3978_v22 = vld [vmem:[%s10567_s13 + $0x20] sm:$0xff] }
 0xb64   : > { %8712 = vmatprep.mubr.msk.f32.mxu1 %vm822_vm2, %v3673_v28  ;;  %8734 = vmatpush3.msra.mxu1 %v3987_v31 }
 0xb65   : > { %v3656_v32 = vpop.permute.xlu1 %3655  ;;  %8735 = vmatprep.subr.mxu1 %v3986_v10 }
 0xb66   : > { %v3674_v36 = vsel %vm3670_vm6, %v3669_v29, %v3656_v32  ;;  %8736 = vmatpush3.msra.mxu1 %v3986_v10 }
 0xb67   : > { %8713 = vmatmul.mubr.msk.f32.gmra.mxu1 %vm822_vm2, %v3674_v36  ;;  %8737 = vmatprep.subr.mxu1 %v3985_v13 }
 0xb68   : > { %8738 = vmatpush3.msra.mxu1 %v3985_v13 }
 0xb69   : > { %8739 = vmatprep.subr.mxu1 %v3984_v14 }
 0xb6a   : > { %8740 = vmatpush3.msra.mxu1 %v3984_v14 }
 0xb6b   : > { %8741 = vmatprep.subr.mxu1 %v3983_v16 }
 0xb6c   : > { %8742 = vmatpush3.msra.mxu1 %v3983_v16 }
 0xb6d   : > { %8743 = vmatprep.subr.mxu1 %v3982_v19 }
 0xb6e   : > { %8744 = vmatpush3.msra.mxu1 %v3982_v19 }
 0xb6f   : > { %8745 = vmatprep.subr.mxu1 %v3981_v9 }
 0xb70   : > { %8746 = vmatpush3.msra.mxu1 %v3981_v9 }
 0xb71   : > { %8747 = vmatprep.subr.mxu1 %v3980_v30 }
 0xb72   : > { %8748 = vmatpush3.msra.mxu1 %v3980_v30 }
 0xb73   : > { %8749 = vmatprep.subr.mxu1 %v3979_v20 }
 0xb74   : > { %8750 = vmatpush3.msra.mxu1 %v3979_v20 }
 0xb75   : > { %8751 = vmatprep.subr.mxu1 %v3978_v22 }
 0xb76   : > { %8752 = vmatpush3.msra.mxu1 %v3978_v22 }
 0xc1f   : > { %v8711_v37 = vpop.f32.mrf.mxu1 }
 0xc20   : > { %v3770_v34 = vadd.f32 %v8711_v37, %v8151_v12 }
 0xc21   : > { %v3764_v35 = vpop.f32.mrf.mxu1 }
 0xc22   : > { %v3765_v33 = vadd.f32 %v8151_v12, %v3764_v35  ;;  %v3784_v47 = vadd.f32 %v3770_v34, %v9421_v18 }
 0xc24   : > { %v3792_v15 = vsel %vm822_vm2, %v3784_v47, 0.0  ;;  %v3783_v23 = vadd.f32 %v3765_v33, %v9419_v17 }
 0xc25   : > { %3793 = vadd.xlane.f32.xlu1 %v3792_v15 }
 0xc26   : > { %v3789_v45 = vsel %vm822_vm2, %v3783_v23, 0.0 }
 0xc27   : > { %3790 = vadd.xlane.f32.xlu0 %v3789_v45  ;;  %v8714_v38 = vpop.f32.mrf.mxu1  ;;  %v8156_v45 = vld [vmem:[%s10563_s9] ss:$0 sm:$0xff] }
 0xc28   : > { %v3780_v39 = vadd.f32 %v8714_v38, %v8151_v12 }
 0xc29   : > { %v3774_v51 = vpop.f32.mrf.mxu1 }
 0xc2a   : > { %v3775_v21 = vadd.f32 %v8151_v12, %v3774_v51  ;;  %v3786_v41 = vadd.f32 %v3780_v39, %v9435_v25 }
 0xc2c   : > { %v3785_v48 = vadd.f32 %v3775_v21, %v9433_v24  ;;  %v3798_v18 = vsel %vm822_vm2, %v3786_v41, 0.0 }
 0xc2e   : > { %v3795_v40 = vsel %vm822_vm2, %v3785_v48, 0.0 }
 0xc2f   : > { %3796 = vadd.xlane.f32.xlu0 %v3795_v40 }
 0xc33   : > { %3799 = vadd.xlane.f32.xlu0 %v3798_v18 }
 0xcae   : > { %v3794_v42 = vpop.xlane.xlu1 %3793 }
 0xcaf   : > { %v3803_v17 = vmul.f32 0.03125, %v3794_v42 }
 0xcb0   : > { %v3791_v44 = vpop.xlane.xlu0 %3790 }
 0xcb1   : > { %v9844_v46 = vsub.f32 %v3784_v47, %v3803_v17  ;;  %v3802_v49 = vmul.f32 0.03125, %v3791_v44 }
 0xcb3   : > { %v9846_v50 = vsub.f32 %v3783_v23, %v3802_v49  ;;  %v3811_v52 = vmul.f32 %v9844_v46, %v9844_v46 }
 0xcb5   : > { %v3817_v24 = vsel %vm822_vm2, %v3811_v52, 0.0  ;;  %v3810_v25 = vmul.f32 %v9846_v50, %v9846_v50 }
 0xcb6   : > { %3818 = vadd.xlane.f32.xlu0 %v3817_v24 }
 0xcb7   : > { %v3814_v53 = vsel %vm822_vm2, %v3810_v25, 0.0  ;;  %v3977_v25 = vld [vmem:[%s10567_s13 + $0x18] sm:$0xff] }
 0xcb8   : > { %3815 = vadd.xlane.f32.xlu1 %v3814_v53  ;;  %v3797_v55 = vpop.xlane.xlu0 %3796  ;;  %8753 = vmatprep.subr.mxu1 %v3977_v25  ;;  %v3976_v53 = vld [vmem:[%s10567_s13 + $0x10] sm:$0xff] }
 0xcb9   : > { %v3804_v56 = vmul.f32 0.03125, %v3797_v55  ;;  %8754 = vmatpush3.msra.mxu1 %v3977_v25  ;;  %v3975_v55 = vld [vmem:[%s10567_s13 + $0x8] sm:$0xff] }
 0xcba   : > { %8755 = vmatprep.subr.mxu1 %v3976_v53 }
 0xcbb   : > { %v9854_v57 = vsub.f32 %v3785_v48, %v3804_v56  ;;  %v8157_v48 = vld [vmem:[%s10564_s10] ss:$0 sm:$0xff]  ;;  %8756 = vmatpush3.msra.mxu1 %v3976_v53 }
 0xcbc   : > { %v3800_v58 = vpop.xlane.xlu0 %3799  ;;  %v3974_v56 = vld [vmem:[%s10567_s13] sm:$0xff]  ;;  %8757 = vmatprep.subr.mxu1 %v3975_v55 }
 0xcbd   : > { %v3805_v61 = vmul.f32 0.03125, %v3800_v58  ;;  %v3812_v62 = vmul.f32 %v9854_v57, %v9854_v57  ;;  %8758 = vmatpush3.msra.mxu1 %v3975_v55 }
 0xcbe   : > { %8759 = vmatprep.subr.mxu1 %v3974_v56 }
 0xcbf   : > { %v9858_v63 = vsub.f32 %v3786_v41, %v3805_v61  ;;  %v3820_v0 = vsel %vm822_vm2, %v3812_v62, 0.0  ;;  %8760 = vmatpush3.msra.mxu1 %v3974_v56 }
 0xcc0   : > { %3821 = vadd.xlane.f32.xlu1 %v3820_v0  ;;  %8811 = vmatprep.subr.mxu1 %v9254_v26 }
 0xcc1   : > { %v3813_v1 = vmul.f32 %v9858_v63, %v9858_v63 }
 0xcc3   : > { %v3823_v2 = vsel %vm822_vm2, %v3813_v1, 0.0 }
 0xcc4   : > { %3824 = vadd.xlane.f32.xlu0 %v3823_v2 }
 0xd3f   : > { %v3819_v28 = vpop.xlane.xlu0 %3818 }
 0xd40   : > { %v3827_v11 = vmul.f32 0.03125, %v3819_v28 }
 0xd41   : > { %v3816_v29 = vpop.xlane.xlu1 %3815 }
 0xd42   : > { %v3831_v32 = vadd.f32 1e-05, %v3827_v11  ;;  %v3826_v36 = vmul.f32 0.03125, %v3816_v29 }
 0xd44   : > { %9138 = vrsqrt.f32 %v3831_v32  ;;  %v3830_v12 = vadd.f32 1e-05, %v3826_v36 }
 0xd46   : > { %9140 = vrsqrt.f32 %v3830_v12 }
 0xd49   : > { %v3822_v37 = vpop.xlane.xlu1 %3821 }
 0xd4a   : > { %v3828_v34 = vmul.f32 0.03125, %v3822_v37 }
 0xd4c   : > { %v3832_v35 = vadd.f32 1e-05, %v3828_v34 }
 0xd4d   : > { %v3825_v33 = vpop.xlane.xlu0 %3824 }
 0xd4e   : > { %9142 = vrsqrt.f32 %v3832_v35  ;;  %v3829_v47 = vmul.f32 0.03125, %v3825_v33 }
 0xd50   : > { %v3833_v15 = vadd.f32 1e-05, %v3829_v47 }
 0xd51   : > { %v9139_v23 = vpop.eup %9138 }
 0xd52   : > { %9144 = vrsqrt.f32 %v3833_v15  ;;  %v3839_v38 = vmul.f32 %v9139_v23, %v9844_v46 }
 0xd53   : > { %v9141_v51 = vpop.eup %9140 }
 0xd54   : > { %v3838_v39 = vmul.f32 %v9141_v51, %v9846_v50  ;;  %v3849_v21 = vmul.f32 %v8156_v45, %v3839_v38 }
 0xd56   : > { %v3848_v40 = vmul.f32 %v8156_v45, %v3838_v39  ;;  %v3859_v18 = vadd.f32 %v8157_v48, %v3849_v21 }
 0xd58   : > { %v3858_v41 = vadd.f32 %v8157_v48, %v3848_v40 }
 0xd5a   : > { %8723 = vmatprep.mubr.msk.f32.mxu0 %vm822_vm2, %v3858_v41 }
 0xd5b   : > { %v9143_v42 = vpop.eup %9142  ;;  %8724 = vmatmul.mubr.msk.f32.vlgmr.msra.gmra.mxu0 %vm822_vm2, %v3859_v18 }
 0xd5c   : > { %v3840_v17 = vmul.f32 %v9143_v42, %v9854_v57  ;;  %v8158_v57 = vld [vmem:[%s10566_s12] ss:$0 sm:$0xff] }
 0xd5e   : > { %v3850_v44 = vmul.f32 %v8156_v45, %v3840_v17 }
 0xd5f   : > { %v9145_v46 = vpop.eup %9144 }
 0xd60   : > { %v3860_v49 = vadd.f32 %v8157_v48, %v3850_v44  ;;  %v3841_v50 = vmul.f32 %v9145_v46, %v9858_v63 }
 0xd62   : > { %8726 = vmatprep.mubr.msk.f32.mxu0 %vm822_vm2, %v3860_v49  ;;  %v3851_v52 = vmul.f32 %v8156_v45, %v3841_v50  ;;  %v8168_v50 = vld [vmem:[%s10610_s1 + $0x30] sm:$0xff] }
 0xd64   : > { %v3861_v24 = vadd.f32 %v8157_v48, %v3851_v52  ;;  %v8167_v52 = vld [vmem:[%s10610_s1 + $0x28] sm:$0xff] }
 0xd66   : > { %8727 = vmatmul.mubr.msk.f32.gmra.mxu0 %vm822_vm2, %v3861_v24 }
 0xe1b   : > { %v8725_v58 = vpop.f32.mrf.mxu0 }
 0xe1c   : > { %v3957_v61 = vadd.f32 %v8725_v58, %v8158_v57 }
 0xe1d   : > { %v3951_v62 = vpop.f32.mrf.mxu0 }
 0xe1e   : > { %v3952_v63 = vadd.f32 %v8158_v57, %v3951_v62  ;;  %v3971_v1 = vmax.f32 %v3957_v61, 0.0 }
 0xe20   : > { %v3970_v0 = vmax.f32 %v3952_v63, 0.0 }
 0xe22   : > { %8761 = vmatprep.mubr.f32.mxu1 %v3970_v0 }
 0xe23   : > { %8762 = vmatmul.mubr.f32.vlgmr.msra.gmra.mxu1 %v3971_v1 }
 0xe26   : > { %v8728_v2 = vpop.f32.mrf.mxu0 }
 0xe27   : > { %v3967_v3 = vadd.f32 %v8728_v2, %v8158_v57 }
 0xe28   : > { %v3961_v4 = vpop.f32.mrf.mxu0 }
 0xe29   : > { %v3962_v27 = vadd.f32 %v8158_v57, %v3961_v4  ;;  %v3973_v7 = vmax.f32 %v3967_v3, 0.0 }
 0xe2b   : > { %v3972_v6 = vmax.f32 %v3962_v27, 0.0  ;;  %v8164_v27 = vld [vmem:[%s10569_s15] ss:$0 sm:$0xff] }
 0xe2d   : > { %8764 = vmatprep.mubr.f32.mxu1 %v3972_v6 }
 0xe2e   : > { %8765 = vmatmul.mubr.f32.gmra.mxu1 %v3973_v7 }
 0xe2f   : > { %8813 = vmatprep.mubr.msk.f32.mxu1 %vm9255_vm3, %v9254_v26 }
 0xee3   : > { %v8763_v31 = vpop.f32.mrf.mxu1 }
 0xee4   : > { %v4069_v10 = vadd.f32 %v8763_v31, %v8163_v8  ;;  %v8165_v31 = vld [vmem:[%s10570_s16] ss:$0 sm:$0xff] }
 0xee5   : > { %v4063_v13 = vpop.f32.mrf.mxu1 }
 0xee6   : > { %v4083_v14 = vadd.f32 %v4069_v10, %v3859_v18  ;;  %v4064_v16 = vadd.f32 %v8163_v8, %v4063_v13 }
 0xee8   : > { %v4091_v19 = vsel %vm822_vm2, %v4083_v14, 0.0  ;;  %v4082_v9 = vadd.f32 %v4064_v16, %v3858_v41 }
 0xee9   : > { %4092 = vadd.xlane.f32.xlu0 %v4091_v19 }
 0xeea   : > { %v4088_v30 = vsel %vm822_vm2, %v4082_v9, 0.0 }
 0xeeb   : > { %4089 = vadd.xlane.f32.xlu1 %v4088_v30 }
 0xeee   : > { %v8766_v20 = vpop.f32.mrf.mxu1 }
 0xeef   : > { %v4079_v22 = vadd.f32 %v8766_v20, %v8163_v8 }
 0xef0   : > { %v4073_v28 = vpop.f32.mrf.mxu1 }
 0xef1   : > { %v4085_v11 = vadd.f32 %v4079_v22, %v3861_v24  ;;  %v4074_v29 = vadd.f32 %v8163_v8, %v4073_v28  ;;  %v8166_v24 = vld [vmem:[%s10610_s1 + $0x20] sm:$0xff] }
 0xef3   : > { %v4097_v32 = vsel %vm822_vm2, %v4085_v11, 0.0  ;;  %v4084_v36 = vadd.f32 %v4074_v29, %v3860_v49  ;;  %v8169_v49 = vld [vmem:[%s10610_s1 + $0x38] sm:$0xff]  ;;  %v8171_v29 = vld [vmem:[%s10560_s6 + $0x1] ss:$0 sm:$0xff] }
 0xef4   : > { %4098 = vadd.xlane.f32.xlu0 %v4097_v32  ;;  %8767 = vmatprep.subr.mxu0 %v8169_v49 }
 0xef5   : > { %v4094_v12 = vsel %vm822_vm2, %v4084_v36, 0.0  ;;  %8768 = vmatpush3.msra.mxu0 %v8169_v49 }
 0xef6   : > { %4095 = vadd.xlane.f32.xlu1 %v4094_v12  ;;  %8769 = vmatprep.subr.mxu0 %v8168_v50 }
 0xef7   : > { %8770 = vmatpush3.msra.mxu0 %v8168_v50 }
 0xef8   : > { %8771 = vmatprep.subr.mxu0 %v8167_v52 }
 0xef9   : > { %8772 = vmatpush3.msra.mxu0 %v8167_v52 }
 0xefa   : > { %8773 = vmatprep.subr.mxu0 %v8166_v24 }
 0xefb   : > { %8774 = vmatpush3.msra.mxu0 %v8166_v24 }
 0xefc   : > { %8781 = vmatprep.subr.mxu0 %v9254_v26 }
 0xf72   : > { %v4093_v37 = vpop.xlane.xlu0 %4092 }
 0xf73   : > { %v4101_v34 = vmul.f32 0.03125, %v4093_v37 }
 0xf74   : > { %v4090_v35 = vpop.xlane.xlu1 %4089 }
 0xf75   : > { %v4105_v33 = vsub.f32 %v4083_v14, %v4101_v34  ;;  %v4100_v47 = vmul.f32 0.03125, %v4090_v35 }
 0xf77   : > { %v4104_v15 = vsub.f32 %v4082_v9, %v4100_v47  ;;  %v4109_v23 = vmul.f32 %v4105_v33, %v4105_v33 }
 0xf79   : > { %v4115_v45 = vsel %vm822_vm2, %v4109_v23, 0.0  ;;  %v4108_v38 = vmul.f32 %v4104_v15, %v4104_v15 }
 0xf7a   : > { %4116 = vadd.xlane.f32.xlu0 %v4115_v45 }
 0xf7b   : > { %v4112_v51 = vsel %vm822_vm2, %v4108_v38, 0.0 }
 0xf7c   : > { %4113 = vadd.xlane.f32.xlu1 %v4112_v51 }
 0xf7d   : > { %v4099_v39 = vpop.xlane.xlu0 %4098 }
 0xf7e   : > { %v4103_v21 = vmul.f32 0.03125, %v4099_v39 }
 0xf7f   : > { %v4096_v48 = vpop.xlane.xlu1 %4095 }
 0xf80   : > { %v4107_v40 = vsub.f32 %v4085_v11, %v4103_v21  ;;  %v4102_v41 = vmul.f32 0.03125, %v4096_v48 }
 0xf82   : > { %v4106_v18 = vsub.f32 %v4084_v36, %v4102_v41  ;;  %v4111_v42 = vmul.f32 %v4107_v40, %v4107_v40 }
 0xf84   : > { %v4121_v17 = vsel %vm822_vm2, %v4111_v42, 0.0  ;;  %v4110_v44 = vmul.f32 %v4106_v18, %v4106_v18 }
 0xf85   : > { %4122 = vadd.xlane.f32.xlu0 %v4121_v17 }
 0xf86   : > { %v4118_v46 = vsel %vm822_vm2, %v4110_v44, 0.0 }
 0xf87   : > { %4119 = vadd.xlane.f32.xlu1 %v4118_v46 }
0x1003   : > { %v4117_v25 = vpop.xlane.xlu0 %4116 }
0x1004   : > { %v4125_v53 = vmul.f32 0.03125, %v4117_v25 }
0x1005   : > { %v4114_v55 = vpop.xlane.xlu1 %4113 }
0x1006   : > { %v4129_v56 = vadd.f32 1e-05, %v4125_v53  ;;  %v4124_v57 = vmul.f32 0.03125, %v4114_v55 }
0x1008   : > { %9146 = vrsqrt.f32 %v4129_v56  ;;  %v4128_v58 = vadd.f32 1e-05, %v4124_v57 }
0x100a   : > { %9148 = vrsqrt.f32 %v4128_v58 }
0x100e   : > { %v4123_v61 = vpop.xlane.xlu0 %4122 }
0x100f   : > { %v4127_v62 = vmul.f32 0.03125, %v4123_v61 }
0x1010   : > { %v4120_v63 = vpop.xlane.xlu1 %4119 }
0x1011   : > { %v4131_v0 = vadd.f32 1e-05, %v4127_v62  ;;  %v4126_v1 = vmul.f32 0.03125, %v4120_v63 }
0x1013   : > { %9150 = vrsqrt.f32 %v4131_v0  ;;  %v4130_v2 = vadd.f32 1e-05, %v4126_v1 }
0x1015   : > { %v9147_v3 = vpop.eup %9146  ;;  %9152 = vrsqrt.f32 %v4130_v2 }
0x1016   : > { %v4137_v4 = vmul.f32 %v9147_v3, %v4105_v33 }
0x1017   : > { %v9149_v6 = vpop.eup %9148 }
0x1018   : > { %v4136_v7 = vmul.f32 %v9149_v6, %v4104_v15  ;;  %v4147_v8 = vmul.f32 %v8164_v27, %v4137_v4 }
0x101a   : > { %v4146_v10 = vmul.f32 %v8164_v27, %v4136_v7  ;;  %v9976_v14 = vadd.f32 %v8165_v31, %v4147_v8 }
0x101c   : > { %v9974_v13 = vadd.f32 %v8165_v31, %v4146_v10 }
0x101e   : > { %8775 = vmatprep.mubr.msk.f32.mxu0 %vm822_vm2, %v9974_v13 }
0x101f   : > { %8776 = vmatmul.mubr.msk.f32.vlgmr.msra.gmra.mxu0 %vm822_vm2, %v9976_v14 }
0x1020   : > { %v9151_v16 = vpop.eup %9150 }
0x1021   : > { %v4139_v19 = vmul.f32 %v9151_v16, %v4107_v40 }
0x1022   : > { %v9153_v9 = vpop.eup %9152 }
0x1023   : > { %v4138_v30 = vmul.f32 %v9153_v9, %v4106_v18  ;;  %v4149_v20 = vmul.f32 %v8164_v27, %v4139_v19 }
0x1025   : > { %v4148_v22 = vmul.f32 %v8164_v27, %v4138_v30  ;;  %v9984_v11 = vadd.f32 %v8165_v31, %v4149_v20 }
0x1027   : > { %v9982_v28 = vadd.f32 %v8165_v31, %v4148_v22 }
0x1029   : > { %8778 = vmatprep.mubr.msk.f32.mxu0 %vm822_vm2, %v9982_v28 }
0x102a   : > { %8779 = vmatmul.mubr.msk.f32.gmra.mxu0 %vm822_vm2, %v9984_v11 }
0x102b   : > { %8783 = vmatprep.mubr.msk.f32.mxu0 %vm9255_vm3, %v9254_v26 }
0x10df   : > { %v8777_v32 = vpop.f32.mrf.mxu0 }
0x10e0   : > { %v9995_v36 = vadd.f32 %v8777_v32, %v8171_v29 }
0x10e1   : > { %v4251_v12 = vpop.f32.mrf.mxu0 }
0x10e2   : > { %v9997_v37 = vadd.f32 %v8171_v29, %v4251_v12  ;;  %4348 = vrot.lane.b32.xlu0 %v9995_v36, %s9256_s30 }
0x10e4   : > { %4271 = vrot.lane.b32.xlu1 %v9997_v37, %s9256_s30 }
0x10ea   : > { %v8780_v34 = vpop.f32.mrf.mxu0 }
0x10eb   : > { %v10007_v47 = vadd.f32 %v8780_v34, %v8171_v29 }
0x10ec   : > { %v4261_v35 = vpop.f32.mrf.mxu0 }
0x10ed   : > { %v10003_v33 = vadd.f32 %v8171_v29, %v4261_v35 }
0x10ef   : > { %4425 = vrot.lane.b32.xlu1 %v10003_v33, %s9256_s30 }
0x10f3   : > { %4502 = vrot.lane.b32.xlu1 %v10007_v47, %s9256_s30  ;;  %s10614_s30 = smov 64  }
0x1154   : > { %v4349_v23 = vpop.permute.xlu0 %4348 }
0x1156   : > { %v4272_v15 = vpop.permute.xlu1 %4271 }
0x1157   : > { %8782 = vmatpush3.xpose.msk.msra.mxu0 %vm923_vm4, %v4272_v15 }
0x1158   : > { %8786 = vmatprep.subr.mxu0 %v9254_v26 }
0x115a   : > { %8784 = vmatmul.mubr.msk.f32.vlgmr.msra.gmra.mxu0 %vm923_vm4, %v9997_v37 }
0x115b   : > { %8787 = vmatpush3.xpose.msk.msra.mxu0 %vm923_vm4, %v4349_v23  ;;  %8788 = vmatprep.mubr.msk.f32.mxu0 %vm9255_vm3, %v9254_v26 }
0x115c   : > { %8791 = vmatprep.subr.mxu0 %v9254_v26 }
0x115e   : > { %8789 = vmatmul.mubr.msk.f32.vlgmr.msra.gmra.mxu0 %vm923_vm4, %v9995_v36 }
0x115f   : > { %8793 = vmatprep.mubr.msk.f32.mxu0 %vm9255_vm3, %v9254_v26 }
0x1161   : > { %v4426_v45 = vpop.permute.xlu1 %4425 }
0x1162   : > { %8792 = vmatpush3.xpose.msk.msra.mxu0 %vm923_vm4, %v4426_v45 }
0x1163   : > { %8796 = vmatprep.subr.mxu0 %v9254_v26 }
0x1165   : > { %v4503_v38 = vpop.permute.xlu1 %4502  ;;  %8794 = vmatmul.mubr.msk.f32.vlgmr.msra.gmra.mxu0 %vm923_vm4, %v10003_v33 }
0x1166   : > { %8797 = vmatpush3.xpose.msk.msra.mxu0 %vm923_vm4, %v4503_v38  ;;  %8798 = vmatprep.mubr.msk.f32.mxu0 %vm9255_vm3, %v9254_v26 }
0x1167   : > { %8801 = vmatprep.subr.mxu0 %v9254_v26 }
0x1169   : > { %8799 = vmatmul.mubr.msk.f32.vlgmr.msra.gmra.mxu0 %vm923_vm4, %v10007_v47 }
0x116a   : > { %8803 = vmatprep.mubr.msk.f32.mxu0 %vm9255_vm3, %v9254_v26 }
0x121a   : > { %v4343_v51 = vpop.f32.mrf.mxu0 }
0x121b   : > { %v4578_v39 = vmul.f32 0.35355338, %v4343_v51 }
0x121c   : > { %v8785_v21 = vpop.f32.mrf.mxu0 }
0x121d   : > { %v4582_v48 = vadd.f32 %v4578_v39, %v9503_v54 }
0x121e   : > { %v4420_v40 = vpop.f32.mrf.mxu0 }
0x121f   : > { %v4579_v41 = vmul.f32 0.35355338, %v4420_v40  ;;  %v4586_v18 = vsel %vm923_vm4, %v4582_v48, -inf }
0x1220   : > { %4587 = vmax.xlane.f32.xlu0 %v4586_v18  ;;  %v8790_v42 = vpop.f32.mrf.mxu0 }
0x1221   : > { %v4583_v17 = vadd.f32 %v4579_v41, %v9505_v59 }
0x1223   : > { %v4589_v44 = vsel %vm923_vm4, %v4583_v17, -inf }
0x1224   : > { %4590 = vmax.xlane.f32.xlu1 %v4589_v44 }
0x1225   : > { %v4497_v46 = vpop.f32.mrf.mxu0 }
0x1226   : > { %v4580_v49 = vmul.f32 0.35355338, %v4497_v46 }
0x1227   : > { %v8795_v50 = vpop.f32.mrf.mxu0 }
0x1228   : > { %v4584_v52 = vadd.f32 %v4580_v49, %v9507_v60 }
0x1229   : > { %v4574_v24 = vpop.f32.mrf.mxu0 }
0x122a   : > { %v4581_v25 = vmul.f32 0.35355338, %v4574_v24  ;;  %v4592_v53 = vsel %vm923_vm4, %v4584_v52, -inf }
0x122b   : > { %4593 = vmax.xlane.f32.xlu0 %v4592_v53  ;;  %v8800_v55 = vpop.f32.mrf.mxu0 }
0x122c   : > { %v4585_v56 = vadd.f32 %v4581_v25, %v9511_v5 }
0x122e   : > { %v4595_v57 = vsel %vm923_vm4, %v4585_v56, -inf }
0x122f   : > { %4596 = vmax.xlane.f32.xlu0 %v4595_v57 }
0x1235   : > { %4630 = vrot.lane.b32.xlu1 %v9997_v37, %s10614_s30 }
0x1239   : > { %4782 = vrot.lane.b32.xlu1 %v10003_v33, %s10614_s30 }
0x123d   : > { %4858 = vrot.lane.b32.xlu1 %v10007_v47, %s10614_s30 }
0x1241   : > { %5014 = vrot.lane.b32.xlu1 %v9995_v36, %s10615_s22 }
0x1245   : > { %5012 = vrot.lane.b32.xlu1 %v9995_v36, %s10616_s27  ;;  %4706 = vrot.lane.b32.xlu0 %v9995_v36, %s10614_s30  ;;  %s10623_s30 = smov 40  }
0x1249   : > { %4936 = vrot.lane.b32.xlu0 %v9997_v37, %s10615_s22 }
0x124d   : > { %4934 = vrot.lane.b32.xlu0 %v9997_v37, %s10616_s27 }
0x12a9   : > { %v4588_v58 = vpop.xlane.xlu0 %4587 }
0x12aa   : > { %v4598_v61 = vsub.f32 %v4582_v48, %v4588_v58 }
0x12ac   : > { %v4602_v62 = vmul.f32 1.442695, %v4598_v61 }
0x12ad   : > { %v4591_v63 = vpop.xlane.xlu1 %4590 }
0x12ae   : > { %9154 = vpow2.f32 %v4602_v62  ;;  %v4599_v0 = vsub.f32 %v4583_v17, %v4591_v63 }
0x12b0   : > { %v4604_v1 = vmul.f32 1.442695, %v4599_v0 }
0x12b1   : > { %v4631_v2 = vpop.permute.xlu1 %4630 }
0x12b2   : > { %9156 = vpow2.f32 %v4604_v1  ;;  %8802 = vmatpush3.msra.mxu0 %v4631_v2 }
0x12b3   : > { %8806 = vmatprep.subr.mxu0 %v9254_v26 }
0x12b4   : > { %v4594_v3 = vpop.xlane.xlu0 %4593 }
0x12b5   : > { %v4600_v4 = vsub.f32 %v4584_v52, %v4594_v3  ;;  %v4783_v27 = vpop.permute.xlu1 %4782 }
0x12b6   : > { %8812 = vmatpush3.msra.mxu1 %v4783_v27 }
0x12b7   : > { %v4606_v6 = vmul.f32 1.442695, %v4600_v4  ;;  %8821 = vmatprep.subr.mxu1 %v9254_v26 }
0x12b8   : > { %v4597_v7 = vpop.xlane.xlu0 %4596 }
0x12b9   : > { %9158 = vpow2.f32 %v4606_v6  ;;  %v4601_v8 = vsub.f32 %v4585_v56, %v4597_v7  ;;  %v4859_v32 = vpop.permute.xlu1 %4858 }
0x12bb   : > { %v9155_v31 = vpop.eup %9154  ;;  %v4608_v10 = vmul.f32 1.442695, %v4601_v8 }
0x12bc   : > { %v4610_v16 = vsel %vm923_vm4, %v9155_v31, 0.0  ;;  %v4707_v12 = vpop.permute.xlu0 %4706 }
0x12bd   : > { %9160 = vpow2.f32 %v4608_v10  ;;  %4611 = vadd.xlane.f32.xlu1 %v4610_v16  ;;  %v5015_v34 = vpop.permute.xlu1 %5014 }
0x12bf   : > { %v9157_v19 = vpop.eup %9156 }
0x12c0   : > { %v4613_v9 = vsel %vm923_vm4, %v9157_v19, 0.0  ;;  %v4937_v35 = vpop.permute.xlu0 %4936 }
0x12c1   : > { %4614 = vadd.xlane.f32.xlu0 %v4613_v9  ;;  %v5013_v15 = vpop.permute.xlu1 %5012 }
0x12c4   : > { %v4935_v23 = vpop.permute.xlu0 %4934 }
0x12c6   : > { %v9159_v30 = vpop.eup %9158 }
0x12c7   : > { %v4616_v20 = vsel %vm923_vm4, %v9159_v30, 0.0 }
0x12c8   : > { %4617 = vadd.xlane.f32.xlu1 %v4616_v20 }
0x12ca   : > { %v9161_v22 = vpop.eup %9160 }
0x12cb   : > { %v4619_v29 = vsel %vm923_vm4, %v9161_v22, 0.0 }
0x12cc   : > { %4620 = vadd.xlane.f32.xlu0 %v4619_v29 }
0x12d9   : > { %5170 = vrot.lane.b32.xlu1 %v10007_v47, %s10615_s22 }
0x12dd   : > { %5168 = vrot.lane.b32.xlu1 %v10007_v47, %s10616_s27 }
0x12e2   : > { %5092 = vrot.lane.b32.xlu0 %v10003_v33, %s10615_s22  ;;  %s10624_s22 = smov 8  }
0x12e6   : > { %5090 = vrot.lane.b32.xlu0 %v10003_v33, %s10616_s27 }
0x1346   : > { %v4612_v45 = vpop.xlane.xlu1 %4611 }
0x1347   : > { %9162 = vrcp.f32 %v4612_v45 }
0x134a   : > { %v4615_v38 = vpop.xlane.xlu0 %4614 }
0x134b   : > { %9164 = vrcp.f32 %v4615_v38 }
0x1351   : > { %v4618_v51 = vpop.xlane.xlu1 %4617 }
0x1352   : > { %9166 = vrcp.f32 %v4618_v51 }
0x1354   : > { %v9163_v39 = vpop.eup %9162 }
0x1355   : > { %v4621_v21 = vpop.xlane.xlu0 %4620  ;;  %v4626_v48 = vmul.f32 %v9163_v39, %v9155_v31  ;;  %v5171_v49 = vpop.permute.xlu1 %5170 }
0x1356   : > { %9168 = vrcp.f32 %v4621_v21 }
0x1357   : > { %8804 = vmatmul.mubr.msk.f32.vlgmr.msra.gmra.mxu0 %vm923_vm4, %v4626_v48 }
0x1358   : > { %v9165_v40 = vpop.eup %9164  ;;  %8807 = vmatpush3.msra.mxu0 %v4707_v12  ;;  %8808 = vmatprep.mubr.msk.f32.mxu0 %vm9255_vm3, %v9254_v26 }
0x1359   : > { %8816 = vmatprep.subr.mxu0 %v9254_v26  ;;  %v4627_v41 = vmul.f32 %v9165_v40, %v9157_v19  ;;  %v5093_v44 = vpop.permute.xlu0 %5092  ;;  %v5169_v52 = vpop.permute.xlu1 %5168 }
0x135b   : > { %8809 = vmatmul.mubr.msk.f32.vlgmr.msra.gmra.mxu0 %vm923_vm4, %v4627_v41 }
0x135c   : > { %8817 = vmatpush3.msra.mxu0 %v4859_v32  ;;  %8818 = vmatprep.mubr.msk.f32.mxu0 %vm9255_vm3, %v9254_v26 }
0x135d   : > { %8826 = vmatprep.subr.mxu0 %v9254_v26  ;;  %v5091_v50 = vpop.permute.xlu0 %5090 }
0x135f   : > { %v9167_v18 = vpop.eup %9166 }
0x1360   : > { %v4628_v42 = vmul.f32 %v9167_v18, %v9159_v30 }
0x1362   : > { %8814 = vmatmul.mubr.msk.f32.vlgmr.msra.gmra.mxu1 %vm923_vm4, %v4628_v42 }
0x1363   : > { %v9169_v17 = vpop.eup %9168  ;;  %8822 = vmatpush3.xpose.msk.msra.mxu1 %vm923_vm4, %v4937_v35  ;;  %8823 = vmatprep.mubr.msk.f32.mxu1 %vm9255_vm3, %v9254_v26 }
0x1364   : > { %8831 = vmatprep.subr.mxu1 %v9254_v26  ;;  %v4629_v46 = vmul.f32 %v9169_v17, %v9161_v22 }
0x1366   : > { %8819 = vmatmul.mubr.msk.f32.vlgmr.msra.gmra.mxu0 %vm923_vm4, %v4629_v46  ;;  %8824 = vmatmul.mubr.msk.f32.vlgmr.msra.gmra.mxu1 %vm923_vm4, %v4935_v23 }
0x1367   : > { %8827 = vmatpush3.xpose.msk.msra.mxu0 %vm923_vm4, %v5015_v34  ;;  %8832 = vmatpush3.xpose.msk.msra.mxu1 %vm923_vm4, %v5093_v44 }
0x1368   : > { %8828 = vmatprep.mubr.msk.f32.mxu0 %vm9255_vm3, %v9254_v26  ;;  %8833 = vmatprep.mubr.msk.f32.mxu1 %vm9255_vm3, %v9254_v26 }
0x1369   : > { %8836 = vmatprep.subr.mxu0 %v9254_v26  ;;  %8841 = vmatprep.subr.mxu1 %v9254_v26 }
0x136a   : > { %8829 = vmatmul.mubr.msk.f32.vlgmr.msra.gmra.mxu0 %vm923_vm4, %v5013_v15  ;;  %8834 = vmatmul.mubr.msk.f32.vlgmr.msra.gmra.mxu1 %vm923_vm4, %v5091_v50 }
0x136b   : > { %8837 = vmatpush3.xpose.msk.msra.mxu0 %vm923_vm4, %v5171_v49  ;;  %8838 = vmatprep.mubr.msk.f32.mxu0 %vm9255_vm3, %v9254_v26 }
0x136c   : > { %8846 = vmatprep.subr.mxu0 %v9254_v26  ;;  %8843 = vmatprep.mubr.msk.f32.mxu1 %vm9255_vm3, %v9254_v26 }
0x136e   : > { %8839 = vmatmul.mubr.msk.f32.vlgmr.msra.gmra.mxu0 %vm923_vm4, %v5169_v52 }
0x136f   : > { %8848 = vmatprep.mubr.msk.f32.mxu0 %vm9255_vm3, %v9254_v26 }
0x1417   : > { %v10107_v24 = vpop.f32.mrf.mxu0 }
0x1419   : > { %v8805_v25 = vpop.f32.mrf.mxu0 }
0x141b   : > { %v10109_v53 = vpop.f32.mrf.mxu0 }
0x141d   : > { %v8810_v55 = vpop.f32.mrf.mxu0 }
0x1422   : > { %v10111_v56 = vpop.f32.mrf.mxu1 }
0x1424   : > { %v8815_v57 = vpop.f32.mrf.mxu1 }
0x1426   : > { %v10113_v58 = vpop.f32.mrf.mxu0  ;;  %v5008_v61 = vpop.f32.mrf.mxu1 }
0x1427   : > { %v5246_v62 = vmul.f32 0.35355338, %v5008_v61 }
0x1428   : > { %v8820_v63 = vpop.f32.mrf.mxu0  ;;  %v8825_v0 = vpop.f32.mrf.mxu1 }
0x1429   : > { %v5250_v1 = vadd.f32 %v5246_v62, %v9503_v54 }
0x142a   : > { %v5086_v2 = vpop.f32.mrf.mxu0  ;;  %v5164_v3 = vpop.f32.mrf.mxu1 }
0x142b   : > { %v5247_v4 = vmul.f32 0.35355338, %v5086_v2  ;;  %v5248_v27 = vmul.f32 0.35355338, %v5164_v3  ;;  %v5254_v6 = vsel %vm923_vm4, %v5250_v1, -inf }
0x142c   : > { %5255 = vmax.xlane.f32.xlu0 %v5254_v6  ;;  %v8830_v7 = vpop.f32.mrf.mxu0  ;;  %v8835_v8 = vpop.f32.mrf.mxu1 }
0x142d   : > { %v5251_v31 = vadd.f32 %v5247_v4, %v9505_v59  ;;  %v5252_v10 = vadd.f32 %v5248_v27, %v9507_v60 }
0x142e   : > { %v5242_v16 = vpop.f32.mrf.mxu0 }
0x142f   : > { %v5249_v19 = vmul.f32 0.35355338, %v5242_v16  ;;  %v5257_v9 = vsel %vm923_vm4, %v5251_v31, -inf  ;;  %v5260_v30 = vsel %vm923_vm4, %v5252_v10, -inf }
0x1430   : > { %5258 = vmax.xlane.f32.xlu1 %v5257_v9  ;;  %v8840_v20 = vpop.f32.mrf.mxu0  ;;  %5261 = vmax.xlane.f32.xlu0 %v5260_v30 }
0x1431   : > { %v5253_v22 = vadd.f32 %v5249_v19, %v9511_v5 }
0x1433   : > { %v5263_v29 = vsel %vm923_vm4, %v5253_v22, -inf }
0x1434   : > { %5264 = vmax.xlane.f32.xlu0 %v5263_v29 }
0x1441   : > { %5298 = vrot.lane.b32.xlu1 %v9997_v37, %s10617_s3 }
0x1445   : > { %5450 = vrot.lane.b32.xlu1 %v10003_v33, %s10617_s3 }
0x1449   : > { %5526 = vrot.lane.b32.xlu1 %v10007_v47, %s10617_s3 }
0x144a   : > { %5374 = vrot.lane.b32.xlu0 %v9995_v36, %s10617_s3 }
0x144d   : > { %5682 = vrot.lane.b32.xlu1 %v9995_v36, %s10618_s29 }
0x144e   : > { %5604 = vrot.lane.b32.xlu0 %v9997_v37, %s10618_s29 }
0x1451   : > { %5680 = vrot.lane.b32.xlu1 %v9995_v36, %s10619_s0 }
0x1452   : > { %5602 = vrot.lane.b32.xlu0 %v9997_v37, %s10619_s0 }
0x14b5   : > { %v5256_v32 = vpop.xlane.xlu0 %5255 }
0x14b6   : > { %v5266_v12 = vsub.f32 %v5250_v1, %v5256_v32 }
0x14b8   : > { %v5270_v34 = vmul.f32 1.442695, %v5266_v12 }
0x14b9   : > { %v5259_v35 = vpop.xlane.xlu1 %5258  ;;  %v5262_v15 = vpop.xlane.xlu0 %5261 }
0x14ba   : > { %9170 = vpow2.f32 %v5270_v34  ;;  %v5267_v23 = vsub.f32 %v5251_v31, %v5259_v35  ;;  %v5268_v45 = vsub.f32 %v5252_v10, %v5262_v15 }
0x14bc   : > { %v5272_v38 = vmul.f32 1.442695, %v5267_v23  ;;  %v5274_v51 = vmul.f32 1.442695, %v5268_v45 }
0x14bd   : > { %v5299_v39 = vpop.permute.xlu1 %5298  ;;  %v5265_v21 = vpop.xlane.xlu0 %5264 }
0x14be   : > { %9172 = vpow2.f32 %v5272_v38  ;;  %v5269_v48 = vsub.f32 %v5253_v22, %v5265_v21  ;;  %8842 = vmatpush3.msra.mxu1 %v5299_v39 }
0x14bf   : > { %9174 = vpow2.f32 %v5274_v51  ;;  %8851 = vmatprep.subr.mxu1 %v9254_v26 }
0x14c0   : > { %v5276_v40 = vmul.f32 1.442695, %v5269_v48 }
0x14c1   : > { %v5375_v41 = vpop.permute.xlu0 %5374  ;;  %v5451_v25 = vpop.permute.xlu1 %5450 }
0x14c2   : > { %9176 = vpow2.f32 %v5276_v40  ;;  %8847 = vmatpush3.msra.mxu0 %v5375_v41 }
0x14c3   : > { %8856 = vmatprep.subr.mxu0 %v9254_v26 }
0x14c5   : > { %v5527_v55 = vpop.permute.xlu1 %5526  ;;  %v5605_v61 = vpop.permute.xlu0 %5604 }
0x14c7   : > { %v9171_v18 = vpop.eup %9170 }
0x14c8   : > { %v5278_v42 = vsel %vm923_vm4, %v9171_v18, 0.0 }
0x14c9   : > { %5279 = vadd.xlane.f32.xlu1 %v5278_v42  ;;  %v5683_v57 = vpop.permute.xlu1 %5682  ;;  %v5603_v63 = vpop.permute.xlu0 %5602 }
0x14cb   : > { %v9173_v17 = vpop.eup %9172 }
0x14cc   : > { %v9175_v44 = vpop.eup %9174  ;;  %v5281_v46 = vsel %vm923_vm4, %v9173_v17, 0.0 }
0x14cd   : > { %5282 = vadd.xlane.f32.xlu0 %v5281_v46  ;;  %v5284_v49 = vsel %vm923_vm4, %v9175_v44, 0.0  ;;  %v5681_v62 = vpop.permute.xlu1 %5680 }
0x14ce   : > { %5285 = vadd.xlane.f32.xlu1 %v5284_v49 }
0x14cf   : > { %v9177_v50 = vpop.eup %9176 }
0x14d0   : > { %v5287_v52 = vsel %vm923_vm4, %v9177_v50, 0.0 }
0x14d1   : > { %5288 = vadd.xlane.f32.xlu0 %v5287_v52 }
0x14df   : > { %5838 = vrot.lane.b32.xlu1 %v10007_v47, %s10618_s29 }
0x14e3   : > { %5836 = vrot.lane.b32.xlu1 %v10007_v47, %s10619_s0 }
0x14e7   : > { %5760 = vrot.lane.b32.xlu0 %v10003_v33, %s10618_s29  ;;  %s675_s29 = scalar_lea.vmem %s10575_s21, %s10627_s28 }
0x14eb   : > { %5758 = vrot.lane.b32.xlu0 %v10003_v33, %s10619_s0 }
0x1552   : > { %v5280_v0 = vpop.xlane.xlu1 %5279 }
0x1553   : > { %9178 = vrcp.f32 %v5280_v0 }
0x1556   : > { %v5283_v1 = vpop.xlane.xlu0 %5282 }
0x1557   : > { %v5286_v2 = vpop.xlane.xlu1 %5285  ;;  %9180 = vrcp.f32 %v5283_v1 }
0x1558   : > { %9182 = vrcp.f32 %v5286_v2 }
0x155a   : > { %v5289_v3 = vpop.xlane.xlu0 %5288 }
0x155b   : > { %9184 = vrcp.f32 %v5289_v3  ;;  %v5839_v9 = vpop.permute.xlu1 %5838 }
0x155e   : > { %v5761_v16 = vpop.permute.xlu0 %5760 }
0x155f   : > { %v5837_v20 = vpop.permute.xlu1 %5836 }
0x1560   : > { %v9179_v4 = vpop.eup %9178 }
0x1561   : > { %v5294_v27 = vmul.f32 %v9179_v4, %v9171_v18 }
0x1562   : > { %v5759_v30 = vpop.permute.xlu0 %5758 }
0x1563   : > { %8844 = vmatmul.mubr.msk.f32.vlgmr.msra.gmra.mxu1 %vm923_vm4, %v5294_v27 }
0x1564   : > { %v9181_v6 = vpop.eup %9180  ;;  %8852 = vmatpush3.msra.mxu1 %v5451_v25  ;;  %8853 = vmatprep.mubr.msk.f32.mxu1 %vm9255_vm3, %v9254_v26 }
0x1565   : > { %v9183_v7 = vpop.eup %9182  ;;  %8861 = vmatprep.subr.mxu1 %v9254_v26  ;;  %v5295_v8 = vmul.f32 %v9181_v6, %v9173_v17 }
0x1566   : > { %v5296_v31 = vmul.f32 %v9183_v7, %v9175_v44 }
0x1567   : > { %8849 = vmatmul.mubr.msk.f32.vlgmr.msra.gmra.mxu0 %vm923_vm4, %v5295_v8 }
0x1568   : > { %v9185_v10 = vpop.eup %9184  ;;  %8854 = vmatmul.mubr.msk.f32.vlgmr.msra.gmra.mxu1 %vm923_vm4, %v5296_v31  ;;  %8857 = vmatpush3.msra.mxu0 %v5527_v55 }
0x1569   : > { %8862 = vmatpush3.xpose.msk.msra.mxu1 %vm923_vm4, %v5605_v61  ;;  %8858 = vmatprep.mubr.msk.f32.mxu0 %vm9255_vm3, %v9254_v26  ;;  %v5297_v19 = vmul.f32 %v9185_v10, %v9177_v50 }
0x156a   : > { %8863 = vmatprep.mubr.msk.f32.mxu1 %vm9255_vm3, %v9254_v26  ;;  %8866 = vmatprep.subr.mxu0 %v9254_v26 }
0x156b   : > { %8871 = vmatprep.subr.mxu1 %v9254_v26  ;;  %8859 = vmatmul.mubr.msk.f32.vlgmr.msra.gmra.mxu0 %vm923_vm4, %v5297_v19 }
0x156c   : > { %8864 = vmatmul.mubr.msk.f32.vlgmr.msra.gmra.mxu1 %vm923_vm4, %v5603_v63  ;;  %8867 = vmatpush3.xpose.msk.msra.mxu0 %vm923_vm4, %v5683_v57 }
0x156d   : > { %8872 = vmatpush3.xpose.msk.msra.mxu1 %vm923_vm4, %v5761_v16  ;;  %8868 = vmatprep.mubr.msk.f32.mxu0 %vm9255_vm3, %v9254_v26 }
0x156e   : > { %8873 = vmatprep.mubr.msk.f32.mxu1 %vm9255_vm3, %v9254_v26  ;;  %8876 = vmatprep.subr.mxu0 %v9254_v26 }
0x156f   : > { %8869 = vmatmul.mubr.msk.f32.vlgmr.msra.gmra.mxu0 %vm923_vm4, %v5681_v62  ;;  %8881 = vmatprep.subr.mxu1 %v9254_v26 }
0x1570   : > { %8874 = vmatmul.mubr.msk.f32.vlgmr.msra.gmra.mxu1 %vm923_vm4, %v5759_v30  ;;  %8877 = vmatpush3.xpose.msk.msra.mxu0 %vm923_vm4, %v5839_v9 }
0x1571   : > { %8878 = vmatprep.mubr.msk.f32.mxu0 %vm9255_vm3, %v9254_v26  ;;  %8886 = vmatprep.subr.mxu0 %v9254_v26 }
0x1572   : > { %8883 = vmatprep.mubr.msk.f32.mxu1 %vm9255_vm3, %v9254_v26 }
0x1573   : > { %8879 = vmatmul.mubr.msk.f32.vlgmr.msra.gmra.mxu0 %vm923_vm4, %v5837_v20 }
0x1574   : > { %8888 = vmatprep.mubr.msk.f32.mxu0 %vm9255_vm3, %v9254_v26 }
0x1623   : > { %v10187_v22 = vpop.f32.mrf.mxu1 }
0x1625   : > { %v8845_v29 = vpop.f32.mrf.mxu1 }
0x1627   : > { %v10189_v32 = vpop.f32.mrf.mxu0 }
0x1628   : > { %v10191_v12 = vpop.f32.mrf.mxu1 }
0x1629   : > { %v8850_v34 = vpop.f32.mrf.mxu0 }
0x162a   : > { %v8855_v35 = vpop.f32.mrf.mxu1 }
0x162b   : > { %v10193_v15 = vpop.f32.mrf.mxu0 }
0x162c   : > { %v5676_v23 = vpop.f32.mrf.mxu1 }
0x162d   : > { %v5914_v45 = vmul.f32 0.35355338, %v5676_v23  ;;  %v8860_v38 = vpop.f32.mrf.mxu0 }
0x162e   : > { %v8865_v51 = vpop.f32.mrf.mxu1 }
0x162f   : > { %v5918_v39 = vadd.f32 %v5914_v45, %v9503_v54  ;;  %v5754_v21 = vpop.f32.mrf.mxu0 }
0x1630   : > { %v5915_v48 = vmul.f32 0.35355338, %v5754_v21  ;;  %v5832_v40 = vpop.f32.mrf.mxu1 }
0x1631   : > { %v5916_v41 = vmul.f32 0.35355338, %v5832_v40  ;;  %v5922_v18 = vsel %vm923_vm4, %v5918_v39, -inf  ;;  %v8870_v42 = vpop.f32.mrf.mxu0 }
0x1632   : > { %v5919_v17 = vadd.f32 %v5915_v48, %v9505_v59  ;;  %5923 = vmax.xlane.f32.xlu0 %v5922_v18  ;;  %v8875_v44 = vpop.f32.mrf.mxu1 }
0x1633   : > { %v5920_v46 = vadd.f32 %v5916_v41, %v9507_v60  ;;  %v5910_v49 = vpop.f32.mrf.mxu0 }
0x1634   : > { %v5917_v50 = vmul.f32 0.35355338, %v5910_v49  ;;  %v5925_v52 = vsel %vm923_vm4, %v5919_v17, -inf }
0x1635   : > { %5926 = vmax.xlane.f32.xlu1 %v5925_v52  ;;  %v8880_v25 = vpop.f32.mrf.mxu0  ;;  %v5928_v55 = vsel %vm923_vm4, %v5920_v46, -inf }
0x1636   : > { %v5921_v57 = vadd.f32 %v5917_v50, %v9511_v5  ;;  %5929 = vmax.xlane.f32.xlu0 %v5928_v55 }
0x1638   : > { %v5931_v61 = vsel %vm923_vm4, %v5921_v57, -inf }
0x163a   : > { %5932 = vmax.xlane.f32.xlu0 %v5931_v61 }
0x1646   : > { %5966 = vrot.lane.b32.xlu1 %v9997_v37, %s10620_s4 }
0x164a   : > { %6118 = vrot.lane.b32.xlu1 %v10003_v33, %s10620_s4 }
0x164e   : > { %6194 = vrot.lane.b32.xlu1 %v10007_v47, %s10620_s4 }
0x1650   : > { %6042 = vrot.lane.b32.xlu0 %v9995_v36, %s10620_s4 }
0x1652   : > { %6350 = vrot.lane.b32.xlu1 %v9995_v36, %s10621_s24 }
0x1654   : > { %6272 = vrot.lane.b32.xlu0 %v9997_v37, %s10621_s24 }
0x16bb   : > { %v5924_v62 = vpop.xlane.xlu0 %5923 }
0x16bc   : > { %v5934_v63 = vsub.f32 %v5918_v39, %v5924_v62 }
0x16be   : > { %v5938_v0 = vmul.f32 1.442695, %v5934_v63  ;;  %v5927_v1 = vpop.xlane.xlu1 %5926 }
0x16bf   : > { %v5935_v2 = vsub.f32 %v5919_v17, %v5927_v1  ;;  %v5930_v3 = vpop.xlane.xlu0 %5929 }
0x16c0   : > { %9186 = vpow2.f32 %v5938_v0  ;;  %v5936_v4 = vsub.f32 %v5920_v46, %v5930_v3 }
0x16c1   : > { %v5940_v27 = vmul.f32 1.442695, %v5935_v2 }
0x16c2   : > { %v5942_v6 = vmul.f32 1.442695, %v5936_v4  ;;  %v5967_v7 = vpop.permute.xlu1 %5966 }
0x16c3   : > { %9188 = vpow2.f32 %v5940_v27  ;;  %v5933_v8 = vpop.xlane.xlu0 %5932  ;;  %8882 = vmatpush3.msra.mxu1 %v5967_v7 }
0x16c4   : > { %9190 = vpow2.f32 %v5942_v6  ;;  %v5937_v31 = vsub.f32 %v5921_v57, %v5933_v8  ;;  %8891 = vmatprep.subr.mxu1 %v9254_v26 }
0x16c6   : > { %v5944_v10 = vmul.f32 1.442695, %v5937_v31  ;;  %v6119_v45 = vpop.permute.xlu1 %6118 }
0x16c7   : > { %v6043_v16 = vpop.permute.xlu0 %6042 }
0x16c8   : > { %9192 = vpow2.f32 %v5944_v10  ;;  %8887 = vmatpush3.msra.mxu0 %v6043_v16 }
0x16c9   : > { %8896 = vmatprep.subr.mxu0 %v9254_v26 }
0x16ca   : > { %v6195_v38 = vpop.permute.xlu1 %6194 }
0x16cb   : > { %v6273_v39 = vpop.permute.xlu0 %6272 }
0x16cd   : > { %v9187_v19 = vpop.eup %9186 }
0x16ce   : > { %v5946_v9 = vsel %vm923_vm4, %v9187_v19, 0.0  ;;  %v6351_v51 = vpop.permute.xlu1 %6350 }
0x16cf   : > { %5947 = vadd.xlane.f32.xlu1 %v5946_v9 }
0x16d0   : > { %v9189_v30 = vpop.eup %9188 }
0x16d1   : > { %v9191_v20 = vpop.eup %9190  ;;  %v5949_v29 = vsel %vm923_vm4, %v9189_v30, 0.0 }
0x16d2   : > { %5950 = vadd.xlane.f32.xlu0 %v5949_v29  ;;  %v5952_v34 = vsel %vm923_vm4, %v9191_v20, 0.0 }
0x16d3   : > { %5953 = vadd.xlane.f32.xlu1 %v5952_v34 }
0x16d5   : > { %v9193_v35 = vpop.eup %9192 }
0x16d6   : > { %v5955_v23 = vsel %vm923_vm4, %v9193_v35, 0.0 }
0x16d7   : > { %5956 = vadd.xlane.f32.xlu0 %v5955_v23 }
0x16e4   : > { %6348 = vrot.lane.b32.xlu1 %v9995_v36, %s10622_s26 }
0x16e8   : > { %6506 = vrot.lane.b32.xlu1 %v10007_v47, %s10621_s24 }
0x16ec   : > { %6504 = vrot.lane.b32.xlu1 %v10007_v47, %s10622_s26 }
0x16ed   : > { %6270 = vrot.lane.b32.xlu0 %v9997_v37, %s10622_s26 }
0x16f1   : > { %6428 = vrot.lane.b32.xlu0 %v10003_v33, %s10621_s24 }
0x16f5   : > { %6426 = vrot.lane.b32.xlu0 %v10003_v33, %s10622_s26 }
0x1758   : > { %v5948_v21 = vpop.xlane.xlu1 %5947 }
0x1759   : > { %9194 = vrcp.f32 %v5948_v21 }
0x175b   : > { %v5951_v48 = vpop.xlane.xlu0 %5950 }
0x175c   : > { %v5954_v40 = vpop.xlane.xlu1 %5953  ;;  %9196 = vrcp.f32 %v5951_v48 }
0x175d   : > { %9198 = vrcp.f32 %v5954_v40 }
0x1760   : > { %v5957_v41 = vpop.xlane.xlu0 %5956  ;;  %v6349_v52 = vpop.permute.xlu1 %6348 }
0x1761   : > { %9200 = vrcp.f32 %v5957_v41 }
0x1764   : > { %v6271_v17 = vpop.permute.xlu0 %6270  ;;  %v6507_v61 = vpop.permute.xlu1 %6506 }
0x1766   : > { %v9195_v18 = vpop.eup %9194 }
0x1767   : > { %v5962_v42 = vmul.f32 %v9195_v18, %v9187_v19 }
0x1768   : > { %v6429_v55 = vpop.permute.xlu0 %6428  ;;  %v6505_v63 = vpop.permute.xlu1 %6504 }
0x1769   : > { %v9197_v44 = vpop.eup %9196  ;;  %8884 = vmatmul.mubr.msk.f32.vlgmr.msra.gmra.mxu1 %vm923_vm4, %v5962_v42 }
0x176a   : > { %v9199_v46 = vpop.eup %9198  ;;  %8892 = vmatpush3.msra.mxu1 %v6119_v45  ;;  %8893 = vmatprep.mubr.msk.f32.mxu1 %vm9255_vm3, %v9254_v26  ;;  %v5963_v49 = vmul.f32 %v9197_v44, %v9189_v30 }
0x176b   : > { %8901 = vmatprep.subr.mxu1 %v9254_v26  ;;  %v5964_v50 = vmul.f32 %v9199_v46, %v9191_v20 }
0x176c   : > { %8889 = vmatmul.mubr.msk.f32.vlgmr.msra.gmra.mxu0 %vm923_vm4, %v5963_v49  ;;  %v6427_v62 = vpop.permute.xlu0 %6426 }
0x176d   : > { %8894 = vmatmul.mubr.msk.f32.vlgmr.msra.gmra.mxu1 %vm923_vm4, %v5964_v50  ;;  %8897 = vmatpush3.msra.mxu0 %v6195_v38 }
0x176e   : > { %v9201_v25 = vpop.eup %9200  ;;  %8902 = vmatpush3.xpose.msk.msra.mxu1 %vm923_vm4, %v6273_v39  ;;  %8898 = vmatprep.mubr.msk.f32.mxu0 %vm9255_vm3, %v9254_v26 }
0x176f   : > { %8903 = vmatprep.mubr.msk.f32.mxu1 %vm9255_vm3, %v9254_v26  ;;  %8906 = vmatprep.subr.mxu0 %v9254_v26  ;;  %v5965_v57 = vmul.f32 %v9201_v25, %v9193_v35 }
0x1770   : > { %8911 = vmatprep.subr.mxu1 %v9254_v26 }
0x1771   : > { %8899 = vmatmul.mubr.msk.f32.vlgmr.msra.gmra.mxu0 %vm923_vm4, %v5965_v57  ;;  %8904 = vmatmul.mubr.msk.f32.vlgmr.msra.gmra.mxu1 %vm923_vm4, %v6271_v17 }
0x1772   : > { %8907 = vmatpush3.xpose.msk.msra.mxu0 %vm923_vm4, %v6351_v51  ;;  %8912 = vmatpush3.xpose.msk.msra.mxu1 %vm923_vm4, %v6429_v55 }
0x1773   : > { %8908 = vmatprep.mubr.msk.f32.mxu0 %vm9255_vm3, %v9254_v26  ;;  %8913 = vmatprep.mubr.msk.f32.mxu1 %vm9255_vm3, %v9254_v26 }
0x1774   : > { %8916 = vmatprep.subr.mxu0 %v9254_v26  ;;  %8921 = vmatprep.subr.mxu1 %v9254_v26 }
0x1775   : > { %8909 = vmatmul.mubr.msk.f32.vlgmr.msra.gmra.mxu0 %vm923_vm4, %v6349_v52  ;;  %8914 = vmatmul.mubr.msk.f32.vlgmr.msra.gmra.mxu1 %vm923_vm4, %v6427_v62 }
0x1776   : > { %8917 = vmatpush3.xpose.msk.msra.mxu0 %vm923_vm4, %v6507_v61  ;;  %8918 = vmatprep.mubr.msk.f32.mxu0 %vm9255_vm3, %v9254_v26 }
0x1777   : > { %8926 = vmatprep.subr.mxu0 %v9254_v26  ;;  %8923 = vmatprep.mubr.msk.f32.mxu1 %vm9255_vm3, %v9254_v26 }
0x1779   : > { %8919 = vmatmul.mubr.msk.f32.vlgmr.msra.gmra.mxu0 %vm923_vm4, %v6505_v63 }
0x177a   : > { %8928 = vmatprep.mubr.msk.f32.mxu0 %vm9255_vm3, %v9254_v26 }
0x1829   : > { %v10267_v0 = vpop.f32.mrf.mxu1 }
0x182b   : > { %v8885_v1 = vpop.f32.mrf.mxu1 }
0x182c   : > { %v10269_v2 = vpop.f32.mrf.mxu0 }
0x182d   : > { %v10271_v3 = vpop.f32.mrf.mxu1 }
0x182e   : > { %v8890_v4 = vpop.f32.mrf.mxu0 }
0x182f   : > { %v8895_v27 = vpop.f32.mrf.mxu1 }
0x1831   : > { %v10273_v6 = vpop.f32.mrf.mxu0  ;;  %v6344_v7 = vpop.f32.mrf.mxu1 }
0x1832   : > { %v6582_v8 = vmul.f32 0.35355338, %v6344_v7 }
0x1833   : > { %v8900_v31 = vpop.f32.mrf.mxu0  ;;  %v8905_v10 = vpop.f32.mrf.mxu1 }
0x1834   : > { %v6586_v16 = vadd.f32 %v6582_v8, %v9503_v54 }
0x1835   : > { %v6422_v19 = vpop.f32.mrf.mxu0  ;;  %v6500_v9 = vpop.f32.mrf.mxu1 }
0x1836   : > { %v6583_v30 = vmul.f32 0.35355338, %v6422_v19  ;;  %v6584_v20 = vmul.f32 0.35355338, %v6500_v9  ;;  %v6590_v29 = vsel %vm923_vm4, %v6586_v16, -inf  ;;  %v8227_v19 = vld [vmem:[%s10561_s7 + $0x38] sm:$0xff] }
0x1837   : > { %v8910_v34 = vpop.f32.mrf.mxu0  ;;  %6591 = vmax.xlane.f32.xlu0 %v6590_v29  ;;  %v8915_v35 = vpop.f32.mrf.mxu1  ;;  %v8226_v9 = vld [vmem:[%s10561_s7 + $0x30] sm:$0xff] }
0x1838   : > { %v6587_v23 = vadd.f32 %v6583_v30, %v9505_v59  ;;  %v6588_v45 = vadd.f32 %v6584_v20, %v9507_v60  ;;  %v8225_v30 = vld [vmem:[%s10561_s7 + $0x28] sm:$0xff]  ;;  %v8224_v20 = vld [vmem:[%s10561_s7 + $0x20] sm:$0xff] }
0x1839   : > { %v6578_v38 = vpop.f32.mrf.mxu0 }
0x183a   : > { %v6585_v51 = vmul.f32 0.35355338, %v6578_v38  ;;  %v6593_v39 = vsel %vm923_vm4, %v6587_v23, -inf  ;;  %v6596_v21 = vsel %vm923_vm4, %v6588_v45, -inf }
0x183b   : > { %6594 = vmax.xlane.f32.xlu1 %v6593_v39  ;;  %v8920_v54 = vpop.f32.mrf.mxu0  ;;  %6597 = vmax.xlane.f32.xlu0 %v6596_v21 }
0x183c   : > { %v6589_v48 = vadd.f32 %v6585_v51, %v9511_v5 }
0x183e   : > { %v6599_v40 = vsel %vm923_vm4, %v6589_v48, -inf }
0x183f   : > { %6600 = vmax.xlane.f32.xlu0 %v6599_v40 }
0x184c   : > { %6634 = vrot.lane.b32.xlu1 %v9997_v37, %s10623_s30 }
0x18c0   : > { %v6592_v59 = vpop.xlane.xlu0 %6591 }
0x18c1   : > { %v6602_v41 = vsub.f32 %v6586_v16, %v6592_v59 }
0x18c3   : > { %v6606_v60 = vmul.f32 1.442695, %v6602_v41 }
0x18c4   : > { %v6595_v18 = vpop.xlane.xlu1 %6594  ;;  %v6598_v42 = vpop.xlane.xlu0 %6597 }
0x18c5   : > { %9202 = vpow2.f32 %v6606_v60  ;;  %v6603_v17 = vsub.f32 %v6587_v23, %v6595_v18  ;;  %v6604_v44 = vsub.f32 %v6588_v45, %v6598_v42 }
0x18c7   : > { %v6608_v46 = vmul.f32 1.442695, %v6603_v17  ;;  %v6610_v49 = vmul.f32 1.442695, %v6604_v44 }
0x18c8   : > { %v6635_v50 = vpop.permute.xlu1 %6634  ;;  %v6601_v52 = vpop.xlane.xlu0 %6600 }
0x18c9   : > { %9204 = vpow2.f32 %v6608_v46  ;;  %v6605_v5 = vsub.f32 %v6589_v48, %v6601_v52  ;;  %8922 = vmatpush3.msra.mxu1 %v6635_v50 }
0x18ca   : > { %9206 = vpow2.f32 %v6610_v49  ;;  %8931 = vmatprep.subr.mxu1 %v9254_v26 }
0x18cb   : > { %v6612_v25 = vmul.f32 1.442695, %v6605_v5 }
0x18cd   : > { %9208 = vpow2.f32 %v6612_v25 }
0x18d2   : > { %v9203_v37 = vpop.eup %9202 }
0x18d3   : > { %v6614_v55 = vsel %vm923_vm4, %v9203_v37, 0.0 }
0x18d4   : > { %6615 = vadd.xlane.f32.xlu1 %v6614_v55 }
0x18d6   : > { %v9205_v57 = vpop.eup %9204 }
0x18d7   : > { %v9207_v61 = vpop.eup %9206  ;;  %v6617_v62 = vsel %vm923_vm4, %v9205_v57, 0.0 }
0x18d8   : > { %6618 = vadd.xlane.f32.xlu0 %v6617_v62  ;;  %v6620_v63 = vsel %vm923_vm4, %v9207_v61, 0.0 }
0x18d9   : > { %6621 = vadd.xlane.f32.xlu1 %v6620_v63 }
0x18da   : > { %v9209_v1 = vpop.eup %9208 }
0x18db   : > { %v6623_v4 = vsel %vm923_vm4, %v9209_v1, 0.0 }
0x18dc   : > { %6624 = vadd.xlane.f32.xlu0 %v6623_v4 }
0x18ea   : > { %6786 = vrot.lane.b32.xlu1 %v10003_v33, %s10623_s30 }
0x18ee   : > { %6862 = vrot.lane.b32.xlu1 %v10007_v47, %s10623_s30 }
0x18f2   : > { %6944 = vrot.lane.b32.xlu1 %v10189_v32, %s10624_s22  ;;  %6710 = vrot.lane.b32.xlu0 %v9995_v36, %s10623_s30 }
0x18f6   : > { %6960 = vrot.lane.b32.xlu1 %v10269_v2, %s9268_s5  ;;  %6942 = vrot.lane.b32.xlu0 %v10187_v22, %s10624_s22 }
0x18fa   : > { %6948 = vrot.lane.b32.xlu1 %v10193_v15, %s10624_s22  ;;  %6958 = vrot.lane.b32.xlu0 %v10267_v0, %s9268_s5 }
0x18fe   : > { %6946 = vrot.lane.b32.xlu0 %v10191_v12, %s10624_s22  ;;  %s10625_s22 = smov 24  }
0x195d   : > { %v6616_v33 = vpop.xlane.xlu1 %6615 }
0x195e   : > { %9210 = vrcp.f32 %v6616_v33 }
0x1961   : > { %v6619_v47 = vpop.xlane.xlu0 %6618 }
0x1962   : > { %v6622_v32 = vpop.xlane.xlu1 %6621  ;;  %9212 = vrcp.f32 %v6619_v47 }
0x1963   : > { %9214 = vrcp.f32 %v6622_v32 }
0x1965   : > { %v6625_v36 = vpop.xlane.xlu0 %6624 }
0x1966   : > { %9216 = vrcp.f32 %v6625_v36  ;;  %v6787_v15 = vpop.permute.xlu1 %6786 }
0x1969   : > { %v6711_v2 = vpop.permute.xlu0 %6710 }
0x196a   : > { %8927 = vmatpush3.msra.mxu0 %v6711_v2  ;;  %v6863_v31 = vpop.permute.xlu1 %6862 }
0x196b   : > { %v9211_v22 = vpop.eup %9210  ;;  %8936 = vmatprep.subr.mxu0 %v9254_v26 }
0x196c   : > { %v6630_v27 = vmul.f32 %v9211_v22, %v9203_v37 }
0x196d   : > { %v6943_v21 = vpop.permute.xlu0 %6942 }
0x196e   : > { %8924 = vmatmul.mubr.msk.f32.vlgmr.msra.gmra.mxu1 %vm923_vm4, %v6630_v27  ;;  %v6945_v54 = vpop.permute.xlu1 %6944 }
0x196f   : > { %v9213_v0 = vpop.eup %9212  ;;  %8932 = vmatpush3.msra.mxu1 %v6787_v15  ;;  %8933 = vmatprep.mubr.msk.f32.mxu1 %vm9255_vm3, %v9254_v26 }
0x1970   : > { %v9215_v12 = vpop.eup %9214  ;;  %v6631_v7 = vmul.f32 %v9213_v0, %v9205_v57  ;;  %8941 = vmatprep.subr.mxu1 %v8227_v19 }
0x1971   : > { %v6632_v8 = vmul.f32 %v9215_v12, %v9207_v61  ;;  %v6959_v48 = vpop.permute.xlu0 %6958 }
0x1972   : > { %8929 = vmatmul.mubr.msk.f32.vlgmr.msra.gmra.mxu0 %vm923_vm4, %v6631_v7  ;;  %v6961_v40 = vpop.permute.xlu1 %6960 }
0x1973   : > { %v9217_v10 = vpop.eup %9216  ;;  %8934 = vmatmul.mubr.msk.f32.vlgmr.msra.gmra.mxu1 %vm923_vm4, %v6632_v8  ;;  %8937 = vmatpush3.msra.mxu0 %v6863_v31 }
0x1974   : > { %8938 = vmatprep.mubr.msk.f32.mxu0 %vm9255_vm3, %v9254_v26  ;;  %v6633_v16 = vmul.f32 %v9217_v10, %v9209_v1  ;;  %8942 = vmatpush3.msra.mxu1 %v8227_v19 }
0x1975   : > { %8943 = vmatprep.subr.mxu1 %v8226_v9  ;;  %v6947_v59 = vpop.permute.xlu0 %6946 }
0x1976   : > { %8939 = vmatmul.mubr.msk.f32.vlgmr.msra.gmra.mxu0 %vm923_vm4, %v6633_v16  ;;  %8944 = vmatpush3.msra.mxu1 %v8226_v9  ;;  %v6949_v60 = vpop.permute.xlu1 %6948 }
0x1977   : > { %8945 = vmatprep.subr.mxu1 %v8225_v30 }
0x1978   : > { %8946 = vmatpush3.msra.mxu1 %v8225_v30 }
0x1979   : > { %8947 = vmatprep.subr.mxu1 %v8224_v20 }
0x197a   : > { %8948 = vmatpush3.msra.mxu1 %v8224_v20 }
0x1a2e   : > { %v6706_v29 = vpop.f32.mrf.mxu1 }
0x1a2f   : > { %6974 = vrot.lane.b32.xlu0 %v6706_v29, %s10625_s22 }
0x1a30   : > { %v8925_v34 = vpop.f32.mrf.mxu1 }
0x1a32   : > { %v6782_v35 = vpop.f32.mrf.mxu0 }
0x1a33   : > { %v6858_v23 = vpop.f32.mrf.mxu1  ;;  %6962 = vrot.lane.b32.xlu0 %v10271_v3, %s9268_s5  ;;  %6976 = vrot.lane.b32.xlu1 %v6782_v35, %s10625_s22  ;;  %v6986_v3 = vsel %vm923_vm4, %v10107_v24, %v6943_v21  ;;  %v6988_v24 = vsel %vm923_vm4, %v10111_v56, %v6947_v59  ;;  %v8229_v56 = vld [vmem:[%s10562_s8 + $0x1] ss:$0 sm:$0xff]  ;;  %v8240_v21 = vld [vmem:[%s10565_s11 + $0x30] sm:$0xff] }
0x1a34   : > { %v8930_v45 = vpop.f32.mrf.mxu0  ;;  %v6990_v41 = vsel %vm3665_vm5, %v6986_v3, %v6959_v48  ;;  %v8238_v48 = vld [vmem:[%s10565_s11 + $0x20] sm:$0xff]  ;;  %v8262_v59 = vld [vmem:[%s10567_s13 + $0xf0] sm:$0xff]  ;;  %v8261_v3 = vld [vmem:[%s10567_s13 + $0xe8] sm:$0xff] }
0x1a35   : > { %v8935_v38 = vpop.f32.mrf.mxu1 }
0x1a36   : > { %v6934_v51 = vpop.f32.mrf.mxu0 }
0x1a37   : > { %6978 = vrot.lane.b32.xlu0 %v6858_v23, %s10625_s22  ;;  %6964 = vrot.lane.b32.xlu1 %v10273_v6, %s9268_s5  ;;  %v6987_v6 = vsel %vm923_vm4, %v10109_v53, %v6945_v54  ;;  %v6989_v53 = vsel %vm923_vm4, %v10113_v58, %v6949_v60  ;;  %v8239_v54 = vld [vmem:[%s10565_s11 + $0x28] sm:$0xff]  ;;  %v8259_v60 = vld [vmem:[%s10567_s13 + $0xd8] sm:$0xff] }
0x1a38   : > { %v8940_v39 = vpop.f32.mrf.mxu0  ;;  %v6991_v17 = vsel %vm3665_vm5, %v6987_v6, %v6961_v40  ;;  %v8263_v40 = vld [vmem:[%s10567_s13 + $0xf8] sm:$0xff]  ;;  %v8256_v6 = vld [vmem:[%s10567_s13 + $0xc0] sm:$0xff] }
0x1a39   : > { %v8241_v39 = vld [vmem:[%s10565_s11 + $0x38] sm:$0xff]  ;;  %8969 = vmatprep.subr.mxu1 %v8263_v40 }
0x1a3a   : > { %8955 = vmatprep.subr.mxu0 %v8241_v39 }
0x1a3b   : > { %6980 = vrot.lane.b32.xlu1 %v6934_v51, %s10625_s22  ;;  %8956 = vmatpush3.msra.mxu0 %v8241_v39 }
0x1a3c   : > { %8957 = vmatprep.subr.mxu0 %v8240_v21 }
0x1a3d   : > { %8958 = vmatpush3.msra.mxu0 %v8240_v21  ;;  %v8265_v21 = vld [vmem:[%s10568_s14 + $0x1] ss:$0 sm:$0xff] }
0x1a3e   : > { %8959 = vmatprep.subr.mxu0 %v8239_v54 }
0x1a3f   : > { %8960 = vmatpush3.msra.mxu0 %v8239_v54 }
0x1a40   : > { %8961 = vmatprep.subr.mxu0 %v8238_v48 }
0x1a41   : > { %8962 = vmatpush3.msra.mxu0 %v8238_v48 }
0x1a42   : > { %9007 = vmatprep.subr.mxu0 %v9254_v26 }
0x1aa1   : > { %v6975_v18 = vpop.permute.xlu0 %6974 }
0x1aa2   : > { %v6994_v42 = vsel %vm3670_vm6, %v6990_v41, %v6975_v18  ;;  %v8260_v41 = vld [vmem:[%s10567_s13 + $0xe0] sm:$0xff]  ;;  %v8258_v18 = vld [vmem:[%s10567_s13 + $0xd0] sm:$0xff] }
0x1aa3   : > { %8949 = vmatprep.mubr.msk.f32.mxu1 %vm822_vm2, %v6994_v42  ;;  %v8257_v42 = vld [vmem:[%s10567_s13 + $0xc8] sm:$0xff] }
0x1aa5   : > { %v6977_v44 = vpop.permute.xlu1 %6976  ;;  %v6963_v46 = vpop.permute.xlu0 %6962 }
0x1aa6   : > { %v6995_v49 = vsel %vm3670_vm6, %v6991_v17, %v6977_v44  ;;  %v6992_v50 = vsel %vm3665_vm5, %v6988_v24, %v6963_v46  ;;  %v8255_v17 = vld [vmem:[%s10567_s13 + $0xb8] sm:$0xff]  ;;  %v8254_v44 = vld [vmem:[%s10567_s13 + $0xb0] sm:$0xff]  ;;  %v8253_v46 = vld [vmem:[%s10567_s13 + $0xa8] sm:$0xff] }
0x1aa7   : > { %8950 = vmatmul.mubr.msk.f32.vlgmr.msra.gmra.mxu1 %vm822_vm2, %v6995_v49  ;;  %v8252_v49 = vld [vmem:[%s10567_s13 + $0xa0] sm:$0xff] }
0x1aa8   : > { %8970 = vmatpush3.msra.mxu1 %v8263_v40 }
0x1aa9   : > { %v6965_v52 = vpop.permute.xlu1 %6964  ;;  %v6979_v5 = vpop.permute.xlu0 %6978  ;;  %8971 = vmatprep.subr.mxu1 %v8262_v59 }
0x1aaa   : > { %v6996_v25 = vsel %vm3670_vm6, %v6992_v50, %v6979_v5  ;;  %v6993_v37 = vsel %vm3665_vm5, %v6989_v53, %v6965_v52  ;;  %8972 = vmatpush3.msra.mxu1 %v8262_v59 }
0x1aab   : > { %8952 = vmatprep.mubr.msk.f32.mxu1 %vm822_vm2, %v6996_v25  ;;  %8973 = vmatprep.subr.mxu1 %v8261_v3 }
0x1aac   : > { %8974 = vmatpush3.msra.mxu1 %v8261_v3 }
0x1aad   : > { %v6981_v55 = vpop.permute.xlu1 %6980  ;;  %8975 = vmatprep.subr.mxu1 %v8260_v41 }
0x1aae   : > { %v6997_v57 = vsel %vm3670_vm6, %v6993_v37, %v6981_v55  ;;  %8976 = vmatpush3.msra.mxu1 %v8260_v41 }
0x1aaf   : > { %8953 = vmatmul.mubr.msk.f32.gmra.mxu1 %vm822_vm2, %v6997_v57  ;;  %8977 = vmatprep.subr.mxu1 %v8259_v60 }
0x1ab0   : > { %8978 = vmatpush3.msra.mxu1 %v8259_v60 }
0x1ab1   : > { %8979 = vmatprep.subr.mxu1 %v8258_v18 }
0x1ab2   : > { %8980 = vmatpush3.msra.mxu1 %v8258_v18 }
0x1ab3   : > { %8981 = vmatprep.subr.mxu1 %v8257_v42 }
0x1ab4   : > { %8982 = vmatpush3.msra.mxu1 %v8257_v42 }
0x1ab5   : > { %8983 = vmatprep.subr.mxu1 %v8256_v6 }
0x1ab6   : > { %8984 = vmatpush3.msra.mxu1 %v8256_v6 }
0x1ab7   : > { %8985 = vmatprep.subr.mxu1 %v8255_v17 }
0x1ab8   : > { %8986 = vmatpush3.msra.mxu1 %v8255_v17 }
0x1ab9   : > { %8987 = vmatprep.subr.mxu1 %v8254_v44 }
0x1aba   : > { %8988 = vmatpush3.msra.mxu1 %v8254_v44 }
0x1abb   : > { %8989 = vmatprep.subr.mxu1 %v8253_v46 }
0x1abc   : > { %8990 = vmatpush3.msra.mxu1 %v8253_v46 }
0x1abd   : > { %8991 = vmatprep.subr.mxu1 %v8252_v49 }
0x1abe   : > { %8992 = vmatpush3.msra.mxu1 %v8252_v49 }
0x1b67   : > { %v8951_v61 = vpop.f32.mrf.mxu1 }
0x1b68   : > { %v7095_v62 = vadd.f32 %v8951_v61, %v8229_v56 }
0x1b69   : > { %v7089_v63 = vpop.f32.mrf.mxu1 }
0x1b6a   : > { %v7109_v1 = vadd.f32 %v7095_v62, %v9976_v14  ;;  %v7090_v4 = vadd.f32 %v8229_v56, %v7089_v63 }
0x1b6c   : > { %v7108_v33 = vadd.f32 %v7090_v4, %v9974_v13  ;;  %v7119_v58 = vsel %vm822_vm2, %v7109_v1, 0.0  ;;  %v8236_v4 = vld [vmem:[%s10563_s9 + $0x1] ss:$0 sm:$0xff] }
0x1b6d   : > { %7120 = vadd.xlane.f32.xlu1 %v7119_v58 }
0x1b6e   : > { %v7116_v47 = vsel %vm822_vm2, %v7108_v33, 0.0 }
0x1b6f   : > { %7117 = vadd.xlane.f32.xlu0 %v7116_v47  ;;  %v8954_v32 = vpop.f32.mrf.mxu1 }
0x1b70   : > { %v7105_v2 = vadd.f32 %v8954_v32, %v8229_v56  ;;  %v8237_v32 = vld [vmem:[%s10564_s10 + $0x1] ss:$0 sm:$0xff] }
0x1b71   : > { %v7099_v36 = vpop.f32.mrf.mxu1 }
0x1b72   : > { %v7100_v22 = vadd.f32 %v8229_v56, %v7099_v36  ;;  %v7111_v27 = vadd.f32 %v7105_v2, %v9984_v11 }
0x1b74   : > { %v7110_v15 = vadd.f32 %v7100_v22, %v9982_v28  ;;  %v7125_v14 = vsel %vm822_vm2, %v7111_v27, 0.0 }
0x1b76   : > { %v7122_v0 = vsel %vm822_vm2, %v7110_v15, 0.0 }
0x1b77   : > { %7123 = vadd.xlane.f32.xlu0 %v7122_v0 }
0x1b7b   : > { %7126 = vadd.xlane.f32.xlu0 %v7125_v14 }
0x1bf6   : > { %v7121_v13 = vpop.xlane.xlu1 %7120 }
0x1bf7   : > { %v7129_v12 = vmul.f32 0.03125, %v7121_v13 }
0x1bf8   : > { %v7118_v7 = vpop.xlane.xlu0 %7117 }
0x1bf9   : > { %v10368_v8 = vsub.f32 %v7109_v1, %v7129_v12  ;;  %v7128_v31 = vmul.f32 0.03125, %v7118_v7 }
0x1bfb   : > { %v10370_v10 = vsub.f32 %v7108_v33, %v7128_v31  ;;  %v7137_v16 = vmul.f32 %v10368_v8, %v10368_v8  ;;  %v8251_v31 = vld [vmem:[%s10567_s13 + $0x98] sm:$0xff] }
0x1bfc   : > { %8993 = vmatprep.subr.mxu1 %v8251_v31 }
0x1bfd   : > { %v7143_v28 = vsel %vm822_vm2, %v7137_v16, 0.0  ;;  %v7136_v11 = vmul.f32 %v10370_v10, %v10370_v10  ;;  %8994 = vmatpush3.msra.mxu1 %v8251_v31  ;;  %v8249_v16 = vld [vmem:[%s10567_s13 + $0x88] sm:$0xff] }
0x1bfe   : > { %7144 = vadd.xlane.f32.xlu0 %v7143_v28  ;;  %v8248_v28 = vld [vmem:[%s10567_s13 + $0x80] sm:$0xff] }
0x1bff   : > { %v7140_v19 = vsel %vm822_vm2, %v7136_v11, 0.0  ;;  %v8243_v11 = vld [vmem:[%s10566_s12 + $0x1] ss:$0 sm:$0xff] }
0x1c00   : > { %7141 = vadd.xlane.f32.xlu1 %v7140_v19  ;;  %v7124_v9 = vpop.xlane.xlu0 %7123 }
0x1c01   : > { %v7130_v30 = vmul.f32 0.03125, %v7124_v9 }
0x1c03   : > { %v10378_v20 = vsub.f32 %v7110_v15, %v7130_v30 }
0x1c04   : > { %v7127_v29 = vpop.xlane.xlu0 %7126 }
0x1c05   : > { %v7131_v34 = vmul.f32 0.03125, %v7127_v29  ;;  %v7138_v35 = vmul.f32 %v10378_v20, %v10378_v20 }
0x1c07   : > { %v10382_v23 = vsub.f32 %v7111_v27, %v7131_v34  ;;  %v7146_v45 = vsel %vm822_vm2, %v7138_v35, 0.0 }
0x1c08   : > { %7147 = vadd.xlane.f32.xlu1 %v7146_v45 }
0x1c09   : > { %v7139_v38 = vmul.f32 %v10382_v23, %v10382_v23 }
0x1c0b   : > { %v7149_v51 = vsel %vm822_vm2, %v7139_v38, 0.0 }
0x1c0c   : > { %7150 = vadd.xlane.f32.xlu0 %v7149_v51 }
0x1c87   : > { %v7145_v24 = vpop.xlane.xlu0 %7144 }
0x1c88   : > { %v7153_v50 = vmul.f32 0.03125, %v7145_v24 }
0x1c89   : > { %v7142_v52 = vpop.xlane.xlu1 %7141 }
0x1c8a   : > { %v7157_v5 = vadd.f32 1e-05, %v7153_v50  ;;  %v7152_v25 = vmul.f32 0.03125, %v7142_v52 }
0x1c8c   : > { %9218 = vrsqrt.f32 %v7157_v5  ;;  %v7156_v53 = vadd.f32 1e-05, %v7152_v25 }
0x1c8e   : > { %9220 = vrsqrt.f32 %v7156_v53 }
0x1c91   : > { %v7148_v37 = vpop.xlane.xlu1 %7147 }
0x1c92   : > { %v7154_v55 = vmul.f32 0.03125, %v7148_v37 }
0x1c94   : > { %v7158_v57 = vadd.f32 1e-05, %v7154_v55 }
0x1c95   : > { %v7151_v56 = vpop.xlane.xlu0 %7150 }
0x1c96   : > { %9222 = vrsqrt.f32 %v7158_v57  ;;  %v7155_v61 = vmul.f32 0.03125, %v7151_v56 }
0x1c98   : > { %v7159_v62 = vadd.f32 1e-05, %v7155_v61 }
0x1c99   : > { %v9219_v63 = vpop.eup %9218 }
0x1c9a   : > { %v7165_v1 = vmul.f32 %v9219_v63, %v10368_v8  ;;  %9224 = vrsqrt.f32 %v7159_v62 }
0x1c9b   : > { %v9221_v33 = vpop.eup %9220 }
0x1c9c   : > { %v7164_v58 = vmul.f32 %v9221_v33, %v10370_v10  ;;  %v7175_v47 = vmul.f32 %v8236_v4, %v7165_v1  ;;  %v8250_v10 = vld [vmem:[%s10567_s13 + $0x90] sm:$0xff] }
0x1c9d   : > { %8995 = vmatprep.subr.mxu1 %v8250_v10 }
0x1c9e   : > { %v7174_v36 = vmul.f32 %v8236_v4, %v7164_v58  ;;  %v7185_v22 = vadd.f32 %v8237_v32, %v7175_v47  ;;  %8996 = vmatpush3.msra.mxu1 %v8250_v10 }
0x1c9f   : > { %8997 = vmatprep.subr.mxu1 %v8249_v16 }
0x1ca0   : > { %v7184_v2 = vadd.f32 %v8237_v32, %v7174_v36  ;;  %8998 = vmatpush3.msra.mxu1 %v8249_v16 }
0x1ca1   : > { %8999 = vmatprep.subr.mxu1 %v8248_v28 }
0x1ca2   : > { %8963 = vmatprep.mubr.msk.f32.mxu0 %vm822_vm2, %v7184_v2  ;;  %9000 = vmatpush3.msra.mxu1 %v8248_v28 }
0x1ca3   : > { %v9223_v15 = vpop.eup %9222  ;;  %8964 = vmatmul.mubr.msk.f32.vlgmr.msra.gmra.mxu0 %vm822_vm2, %v7185_v22 }
0x1ca4   : > { %v7166_v27 = vmul.f32 %v9223_v15, %v10378_v20  ;;  %v9242_v15 = vld [vmem:[%s9494_s25 + $0x1] sm:$0x1] }
0x1ca6   : > { %v7176_v0 = vmul.f32 %v8236_v4, %v7166_v27  ;;  %v7496_v27 = vsel %vm7492_vm7, %v9242_v15, 0.0 }
0x1ca7   : > { %v9225_v14 = vpop.eup %9224 }
0x1ca8   : > { %v7186_v13 = vadd.f32 %v8237_v32, %v7176_v0  ;;  %v7167_v12 = vmul.f32 %v9225_v14, %v10382_v23  ;;  %v9243_v0 = vld [vmem:[%s9494_s25 + $0x2] sm:$0x1] }
0x1ca9   : > { %v7499_v14 = vsel %vm7492_vm7, %v9243_v0, 0.0 }
0x1caa   : > { %8966 = vmatprep.mubr.msk.f32.mxu0 %vm822_vm2, %v7186_v13  ;;  %v7177_v7 = vmul.f32 %v8236_v4, %v7167_v12 }
0x1cac   : > { %v7187_v8 = vadd.f32 %v8237_v32, %v7177_v7  ;;  %v9245_v7 = vld [vmem:[%s9494_s25 + $0x3] sm:$0x1] }
0x1cae   : > { %8967 = vmatmul.mubr.msk.f32.gmra.mxu0 %vm822_vm2, %v7187_v8 }
0x1caf   : > { %9009 = vmatprep.mubr.msk.f32.mxu0 %vm9255_vm3, %v9254_v26 }
0x1d63   : > { %v8965_v19 = vpop.f32.mrf.mxu0 }
0x1d64   : > { %v7285_v9 = vadd.f32 %v8965_v19, %v8243_v11 }
0x1d65   : > { %v7279_v30 = vpop.f32.mrf.mxu0 }
0x1d66   : > { %v7280_v20 = vadd.f32 %v8243_v11, %v7279_v30  ;;  %v7299_v34 = vmax.f32 %v7285_v9, 0.0 }
0x1d68   : > { %v7298_v29 = vmax.f32 %v7280_v20, 0.0 }
0x1d6a   : > { %9001 = vmatprep.mubr.f32.mxu1 %v7298_v29 }
0x1d6b   : > { %9002 = vmatmul.mubr.f32.vlgmr.msra.gmra.mxu1 %v7299_v34 }
0x1d6e   : > { %v8968_v35 = vpop.f32.mrf.mxu0 }
0x1d6f   : > { %v7295_v23 = vadd.f32 %v8968_v35, %v8243_v11 }
0x1d70   : > { %v7289_v45 = vpop.f32.mrf.mxu0 }
0x1d71   : > { %v7290_v38 = vadd.f32 %v8243_v11, %v7289_v45  ;;  %v7301_v39 = vmax.f32 %v7295_v23, 0.0 }
0x1d73   : > { %v7300_v51 = vmax.f32 %v7290_v38, 0.0 }
0x1d75   : > { %9004 = vmatprep.mubr.f32.mxu1 %v7300_v51  ;;  %v8268_v51 = vld [vmem:[%s10569_s15 + $0x1] ss:$0 sm:$0xff] }
0x1d76   : > { %9005 = vmatmul.mubr.f32.gmra.mxu1 %v7301_v39 }
0x1e2b   : > { %v9003_v54 = vpop.f32.mrf.mxu1 }
0x1e2c   : > { %v7399_v48 = vadd.f32 %v9003_v54, %v8265_v21 }
0x1e2d   : > { %v7393_v40 = vpop.f32.mrf.mxu1 }
0x1e2e   : > { %v7413_v59 = vadd.f32 %v7399_v48, %v7185_v22  ;;  %v7394_v3 = vadd.f32 %v8265_v21, %v7393_v40  ;;  %v8269_v48 = vld [vmem:[%s10570_s16 + $0x1] ss:$0 sm:$0xff] }
0x1e30   : > { %v7412_v41 = vadd.f32 %v7394_v3, %v7184_v2  ;;  %v7423_v60 = vsel %vm822_vm2, %v7413_v59, 0.0 }
0x1e31   : > { %7424 = vadd.xlane.f32.xlu0 %v7423_v60 }
0x1e32   : > { %v7420_v18 = vsel %vm822_vm2, %v7412_v41, 0.0 }
0x1e33   : > { %7421 = vadd.xlane.f32.xlu1 %v7420_v18 }
0x1e36   : > { %v9006_v42 = vpop.f32.mrf.mxu1 }
0x1e37   : > { %v7409_v6 = vadd.f32 %v9006_v42, %v8265_v21 }
0x1e38   : > { %v7403_v17 = vpop.f32.mrf.mxu1 }
0x1e39   : > { %v7415_v44 = vadd.f32 %v7409_v6, %v7187_v8  ;;  %v7404_v46 = vadd.f32 %v8265_v21, %v7403_v17  ;;  %v7502_v8 = vsel %vm7492_vm7, %v9245_v7, 0.0 }
0x1e3b   : > { %v7414_v49 = vadd.f32 %v7404_v46, %v7186_v13  ;;  %v7429_v24 = vsel %vm822_vm2, %v7415_v44, 0.0  ;;  %v9244_v13 = vld [vmem:[%s9494_s25] sm:$0x1]  ;;  %v7812_v46 = vld [vmem:[%s10571_s17 + $0x18] sm:$0xff] }
0x1e3c   : > { %7430 = vadd.xlane.f32.xlu0 %v7429_v24  ;;  %v7493_v12 = vsel %vm7492_vm7, %v9244_v13, 0.0  ;;  %v7810_v24 = vld [vmem:[%s10571_s17 + $0x8] sm:$0xff] }
0x1e3d   : > { %v7426_v50 = vsel %vm822_vm2, %v7414_v49, 0.0 }
0x1e3e   : > { %7427 = vadd.xlane.f32.xlu1 %v7426_v50  ;;  %v7809_v50 = vld [vmem:[%s10571_s17] sm:$0xff] }
0x1eba   : > { %v7425_v52 = vpop.xlane.xlu0 %7424 }
0x1ebb   : > { %v7433_v5 = vmul.f32 0.03125, %v7425_v52 }
0x1ebc   : > { %v7422_v25 = vpop.xlane.xlu1 %7421 }
0x1ebd   : > { %v7437_v53 = vsub.f32 %v7413_v59, %v7433_v5  ;;  %v7432_v37 = vmul.f32 0.03125, %v7422_v25 }
0x1ebf   : > { %v7436_v55 = vsub.f32 %v7412_v41, %v7432_v37  ;;  %v7441_v57 = vmul.f32 %v7437_v53, %v7437_v53 }
0x1ec1   : > { %v7447_v56 = vsel %vm822_vm2, %v7441_v57, 0.0  ;;  %v7440_v61 = vmul.f32 %v7436_v55, %v7436_v55 }
0x1ec2   : > { %7448 = vadd.xlane.f32.xlu0 %v7447_v56 }
0x1ec3   : > { %v7444_v62 = vsel %vm822_vm2, %v7440_v61, 0.0 }
0x1ec4   : > { %7445 = vadd.xlane.f32.xlu1 %v7444_v62 }
0x1ec5   : > { %v7431_v63 = vpop.xlane.xlu0 %7430 }
0x1ec6   : > { %v7435_v1 = vmul.f32 0.03125, %v7431_v63 }
0x1ec7   : > { %v7428_v4 = vpop.xlane.xlu1 %7427 }
0x1ec8   : > { %v7439_v33 = vsub.f32 %v7415_v44, %v7435_v1  ;;  %v7434_v58 = vmul.f32 0.03125, %v7428_v4 }
0x1eca   : > { %v7438_v47 = vsub.f32 %v7414_v49, %v7434_v58  ;;  %v7443_v32 = vmul.f32 %v7439_v33, %v7439_v33  ;;  %v7811_v49 = vld [vmem:[%s10571_s17 + $0x10] sm:$0xff] }
0x1ecc   : > { %v7453_v36 = vsel %vm822_vm2, %v7443_v32, 0.0  ;;  %v7442_v2 = vmul.f32 %v7438_v47, %v7438_v47 }
0x1ecd   : > { %7454 = vadd.xlane.f32.xlu0 %v7453_v36 }
0x1ece   : > { %v7450_v22 = vsel %vm822_vm2, %v7442_v2, 0.0 }
0x1ecf   : > { %7451 = vadd.xlane.f32.xlu1 %v7450_v22 }
0x1ed1   : > { %7500 = vadd.xlane.f32.xlu0 %v7499_v14 }
0x1ed3   : > { %7497 = vadd.xlane.f32.xlu1 %v7496_v27 }
0x1ed5   : > { %7503 = vadd.xlane.f32.xlu0 %v7502_v8 }
0x1ed7   : > { %7494 = vadd.xlane.f32.xlu1 %v7493_v12 }
0x1f4b   : > { %v7449_v31 = vpop.xlane.xlu0 %7448 }
0x1f4c   : > { %v7457_v10 = vmul.f32 0.03125, %v7449_v31 }
0x1f4d   : > { %v7446_v16 = vpop.xlane.xlu1 %7445 }
0x1f4e   : > { %v7461_v28 = vadd.f32 1e-05, %v7457_v10  ;;  %v7456_v11 = vmul.f32 0.03125, %v7446_v16  ;;  %v7909_v10 = vld [vmem:[%s10573_s19 + $0x18] sm:$0xff] }
0x1f50   : > { %9226 = vrsqrt.f32 %v7461_v28  ;;  %v7460_v19 = vadd.f32 1e-05, %v7456_v11  ;;  %v7908_v28 = vld [vmem:[%s10573_s19 + $0x10] sm:$0xff]  ;;  %v7907_v11 = vld [vmem:[%s10573_s19 + $0x8] sm:$0xff] }
0x1f52   : > { %9228 = vrsqrt.f32 %v7460_v19  ;;  %v7906_v19 = vld [vmem:[%s10573_s19] sm:$0xff] }
0x1f56   : > { %v7455_v9 = vpop.xlane.xlu0 %7454 }
0x1f57   : > { %v7459_v30 = vmul.f32 0.03125, %v7455_v9  ;;  %v8274_v9 = vld [vmem:[%s10572_s18] ss:$0 sm:$0xff] }
0x1f58   : > { %v7452_v20 = vpop.xlane.xlu1 %7451 }
0x1f59   : > { %v7463_v29 = vadd.f32 1e-05, %v7459_v30  ;;  %v7458_v34 = vmul.f32 0.03125, %v7452_v20 }
0x1f5a   : > { %v7501_v5 = vpop.xlane.xlu0 %7500 }
0x1f5b   : > { %9230 = vrsqrt.f32 %v7463_v29  ;;  %v7462_v35 = vadd.f32 1e-05, %v7458_v34  ;;  %v7507_v37 = vmax.f32 %v7501_v5, 1.0 }
0x1f5c   : > { %v7498_v52 = vpop.xlane.xlu1 %7497 }
0x1f5d   : > { %v9227_v23 = vpop.eup %9226  ;;  %9232 = vrsqrt.f32 %v7462_v35  ;;  %v7506_v25 = vmax.f32 %v7498_v52, 1.0  ;;  %v9270_v35 = vmov 1966171168  }
0x1f5e   : > { %v7469_v45 = vmul.f32 %v9227_v23, %v7437_v53  ;;  %v7992_v23 = vunpack.c.l.s4 %v9270_v35 }
0x1f5f   : > { %v9229_v38 = vpop.eup %9228  ;;  %9234 = vrcp.f32 %v7506_v25 }
0x1f60   : > { %v7468_v39 = vmul.f32 %v9229_v38, %v7436_v55  ;;  %v7479_v54 = vmul.f32 %v8268_v51, %v7469_v45  ;;  %v7495_v53 = vpop.xlane.xlu1 %7494  ;;  %v7504_v55 = vpop.xlane.xlu0 %7503  ;;  %9236 = vrcp.f32 %v7507_v37  ;;  %v7993_v45 = vunpack.c.0.s8 %v7992_v23  ;;  %v8276_v38 = vld [vmem:[%s10574_s20] ss:$0 sm:$0xff] }
0x1f61   : > { %v7505_v57 = vmax.f32 %v7495_v53, 1.0  ;;  %v7508_v56 = vmax.f32 %v7504_v55, 1.0 }
0x1f62   : > { %v7478_v21 = vmul.f32 %v8268_v51, %v7468_v39  ;;  %v7489_v59 = vadd.f32 %v8269_v48, %v7479_v54 }
0x1f63   : > { %9238 = vrcp.f32 %v7505_v57 }
0x1f64   : > { %v7488_v40 = vadd.f32 %v8269_v48, %v7478_v21  ;;  %9240 = vrcp.f32 %v7508_v56 }
0x1f66   : > { %9008 = vmatpush3.msra.mxu0 %v7488_v40 }
0x1f67   : > { %9012 = vmatprep.subr.mxu0 %v9254_v26  ;;  %9010 = vmatmul.mubr.msk.f32.vlgmr.msra.gmra.mxu0 %vm923_vm4, %v9244_v13 }
0x1f68   : > { %v9231_v3 = vpop.eup %9230  ;;  %9013 = vmatpush3.msra.mxu0 %v7489_v59  ;;  %9014 = vmatprep.mubr.msk.f32.mxu0 %vm9255_vm3, %v9254_v26 }
0x1f69   : > { %9017 = vmatprep.subr.mxu0 %v9254_v26  ;;  %v7471_v41 = vmul.f32 %v9231_v3, %v7439_v33 }
0x1f6a   : > { %v9233_v60 = vpop.eup %9232 }
0x1f6b   : > { %9015 = vmatmul.mubr.msk.f32.vlgmr.msra.gmra.mxu0 %vm923_vm4, %v9242_v15  ;;  %v7470_v18 = vmul.f32 %v9233_v60, %v7438_v47  ;;  %v7481_v6 = vmul.f32 %v8268_v51, %v7471_v41 }
0x1f6c   : > { %9019 = vmatprep.mubr.msk.f32.mxu0 %vm9255_vm3, %v9254_v26  ;;  %v9235_v4 = vpop.eup %9234 }
0x1f6d   : > { %v7480_v42 = vmul.f32 %v8268_v51, %v7470_v18  ;;  %v7491_v44 = vadd.f32 %v8269_v48, %v7481_v6  ;;  %v9237_v33 = vpop.eup %9236 }
0x1f6f   : > { %v7490_v17 = vadd.f32 %v8269_v48, %v7480_v42 }
0x1f70   : > { %v9239_v32 = vpop.eup %9238 }
0x1f71   : > { %9018 = vmatpush3.msra.mxu0 %v7490_v17  ;;  %v9241_v2 = vpop.eup %9240 }
0x1f72   : > { %9020 = vmatmul.mubr.msk.f32.vlgmr.msra.gmra.mxu0 %vm923_vm4, %v9243_v0  ;;  %9022 = vmatprep.subr.mxu0 %v9254_v26 }
0x1f73   : > { %9023 = vmatpush3.msra.mxu0 %v7491_v44  ;;  %9024 = vmatprep.mubr.msk.f32.mxu0 %vm9255_vm3, %v9254_v26 }
0x1f74   : > { %9027 = vmatprep.subr.mxu0 %v9254_v26 }
0x1f76   : > { %9025 = vmatmul.mubr.msk.f32.vlgmr.msra.gmra.mxu0 %vm923_vm4, %v9245_v7 }
0x1f77   : > { %9035 = vmatprep.mubr.msk.f32.mxu0 %vm9255_vm3, %v9254_v26  ;;  %9028 = vmatpush3.msra.mxu0 %v7812_v46 }
0x1f78   : > { %9029 = vmatprep.subr.mxu0 %v9254_v26 }
0x1f79   : > { %9030 = vmatpush3.msra.mxu0 %v7811_v49 }
0x1f7a   : > { %9031 = vmatprep.subr.mxu0 %v9254_v26 }
0x1f7b   : > { %9032 = vmatpush3.msra.mxu0 %v7810_v24 }
0x1f7c   : > { %9033 = vmatprep.subr.mxu0 %v9254_v26 }
0x1f7d   : > { %9034 = vmatpush3.msra.mxu0 %v7809_v50 }
0x1f7e   : > { %9038 = vmatprep.subr.mxu0 %v9254_v26 }
0x2027   : > { %v7578_v61 = vpop.f32.mrf.mxu0 }
0x2028   : > { %v7805_v14 = vmul.f32 %v9239_v32, %v7578_v61 }
0x2029   : > { %v9011_v62 = vpop.f32.mrf.mxu0 }
0x202b   : > { %v7651_v63 = vpop.f32.mrf.mxu0 }
0x202c   : > { %v7806_v58 = vmul.f32 %v9235_v4, %v7651_v63 }
0x202d   : > { %v9016_v1 = vpop.f32.mrf.mxu0 }
0x202e   : > { %v7824_v15 = vrot.slane %v7806_v58, 7 }
0x2030   : > { %v7826_v7 = vsel %vm7825_vm8, %v7824_v15, %v7805_v14 }
0x2032   : > { %v7724_v47 = vpop.f32.mrf.mxu0 }
0x2033   : > { %v7807_v36 = vmul.f32 %v9237_v33, %v7724_v47 }
0x2034   : > { %v9021_v22 = vpop.f32.mrf.mxu0 }
0x2035   : > { %v7827_v27 = vrot.slane %v7807_v36, 6 }
0x2036   : > { %v7797_v0 = vpop.f32.mrf.mxu0 }
0x2037   : > { %v7808_v13 = vmul.f32 %v9241_v2, %v7797_v0  ;;  %v7829_v31 = vsel %vm7828_vm9, %v7827_v27, %v7826_v7 }
0x2038   : > { %v9026_v12 = vpop.f32.mrf.mxu0 }
0x2039   : > { %v7830_v8 = vrot.slane %v7808_v13, 5 }
0x203b   : > { %v7832_v16 = vsel %vm7831_vm10, %v7830_v8, %v7829_v31 }
0x203c   : > { %9036 = vmatmul.mubr.msk.f32.vlgmr.msra.gmra.mxu0 %vm822_vm2, %v7832_v16 }
0x203d   : > { %9039 = vmatpush3.msra.mxu0 %v7909_v10  ;;  %9046 = vmatprep.mubr.msk.f32.mxu0 %vm9255_vm3, %v9254_v26 }
0x203e   : > { %9040 = vmatprep.subr.mxu0 %v9254_v26 }
0x203f   : > { %9041 = vmatpush3.msra.mxu0 %v7908_v28 }
0x2040   : > { %9042 = vmatprep.subr.mxu0 %v9254_v26 }
0x2041   : > { %9043 = vmatpush3.msra.mxu0 %v7907_v11 }
0x2042   : > { %9044 = vmatprep.subr.mxu0 %v9254_v26  ;;  %v7996_v26 = vsub.s32 %v7993_v45, %v9497_v43 }
0x2043   : > { %9045 = vmatpush3.msra.mxu0 %v7906_v19 }
0x20fc   : > { %v7901_v30 = vpop.f32.mrf.mxu0 }
0x20fd   : > { %v7902_v20 = vadd.f32 %v8274_v9, %v7901_v30 }
0x20fe   : > { %v9037_v29 = vpop.f32.mrf.mxu0 }
0x20ff   : > { %v7905_v34 = vmax.f32 %v7902_v20, 0.0 }
0x2101   : > { %9047 = vmatmul.mubr.msk.f32.vlgmr.msra.gmra.mxu0 %vm822_vm2, %v7905_v34 }
0x21c1   : > { %v7986_v51 = vpop.f32.mrf.mxu0 }
0x21c2   : > { %v7987_v39 = vadd.f32 %v8276_v38, %v7986_v51 }
0x21c3   : > { %v9048_v21 = vpop.f32.mrf.mxu0 }
0x21c4   : > { %v7997_v54 = vrot.slane %v7987_v39, %v7996_v26 }
0x21c6   : > { %v7998_v48 = vcombine.high %v7997_v54, %v7997_v54  ;;  %v8005_v40 = vrot.slane %v7997_v54, %v7996_v26 }
0x21c8   : > { %v8012_v59 = vrot.slane %v7998_v48, %v7996_v26  ;;  %v8013_v3 = vcombine.high %v8005_v40, %v8005_v40  ;;  %8020 = vst.msk [vmem:[%s675_s29] sm:$0x1] %vm8019_vm11, %v8005_v40 }
0x21ca   : > { %v8014_v41 = vcombine.high %v8012_v59, %v8012_v59  ;;  %8021 = vst.msk [vmem:[%s675_s29 + $0x1] sm:$0x1] %vm8019_vm11, %v8012_v59  ;;  %8022 = vst.msk [vmem:[%s675_s29 + $0x2] sm:$0x1] %vm8019_vm11, %v8013_v3 }
0x21cc   : > { %8023 = vst.msk [vmem:[%s675_s29 + $0x3] sm:$0x1] %vm8019_vm11, %v8014_v41 }
0x21cd PF: > { %s31_s2 = sadd.s32 1, %s9252_s2  }
0x21ce   : > { %p28_p4 = scmp.ge.s32.totalorder %s31_s2, 4  }
0x21d0   :  { %30 = sbr.rel (!%p28_p4) target bundleno = 7 (0x7), region = 149 }

</bundles_post_ra>
